<compile_context>
chip_gen: v5e
topology: v5e:2x2
jax: 0.10.0
libtpu: 0.0.40
codegen_flags: <defaults>
</compile_context>

<pallas_src>
import functools

import jax
import jax.numpy as jnp
import numpy as np
from jax.experimental import pallas as pl
from jax.experimental.pallas import tpu as pltpu

C = 192        # fused per-stage width: 128 feature cols + up-to-64 attention cols (zero padded)
F_FEAT = 128   # feature-branch columns
ATT_COL = 128  # column holding the attention logit after the third conv


def samr_kernel(p1_ref, a_ref, m_ref, wc23_ref, bcs_ref,
                mw1_ref, mb1_ref, mw2_ref, mb2_ref,
                out_ref, h0_ref, h1_ref, *, row_tile, resident_a):
    s = pl.program_id(0)          # GCN stage 0..2 (slow axis)
    r = pl.program_id(1)          # A_hat row-tile index (fast axis)
    nr = pl.num_programs(1)
    row0 = pl.multiple_of(r * row_tile, row_tile)

    # Row panel of A_hat for this step: sliced out of the VMEM-resident copy, or the
    # streamed (double-buffered) BlockSpec panel.
    if resident_a:
        a_panel = a_ref[pl.ds(row0, row_tile), :]
    else:
        a_panel = a_ref[...]

    def store(dst_ref, acc, bias):
        dst_ref[pl.ds(row0, row_tile), :] = jnp.maximum(acc + bias, 0.0).astype(jnp.bfloat16)

    # ---- stage 0: H0 rows = relu(A_panel @ P1 + b1); P1 = x @ [W1|AW1] comes from XLA ----
    @pl.when(s == 0)
    def _():
        acc = jnp.dot(a_panel, p1_ref[...], preferred_element_type=jnp.float32)
        store(h0_ref, acc, bcs_ref[0])

    # ---- stages 1/2: H_s rows = relu((A_panel @ H_{s-1}) @ Wc_s + b_s) --------------------
    # Associativity distributes the stage projection per row tile (no r==0 stall, no p_ref).
    def gcn_tile(src_ref, dst_ref, widx):
        t = jnp.dot(a_panel, src_ref[...], preferred_element_type=jnp.float32)
        acc = jnp.dot(t.astype(jnp.bfloat16), wc23_ref[widx],
                      preferred_element_type=jnp.float32)
        store(dst_ref, acc, bcs_ref[widx + 1])

    @pl.when(s == 1)
    def _():
        gcn_tile(h0_ref, h1_ref, 0)

    @pl.when(s == 2)
    def _():
        gcn_tile(h1_ref, h0_ref, 1)

    # ---- final grid step: segment softmax + attention readout + MLP ----------------------
    @pl.when((s == 2) & (r == nr - 1))
    def _():
        f = h0_ref[:, :F_FEAT].astype(jnp.float32)               # [Np, 128] node features
        w = h0_ref[:, ATT_COL:ATT_COL + 1].astype(jnp.float32)   # [Np, 1]   attention logits
        M = m_ref[...]                                           # [Np, G]   one-hot assignment

        # PyG softmax(weight, batch): per-graph max, exp, per-graph sum (f32 throughout).
        masked = jnp.where(M > 0.5, w, -1e30)                               # [Np, G]
        gmax = jnp.max(masked, axis=0, keepdims=True)                       # [1, G]
        node_max = jax.lax.dot_general(M, gmax, (((1,), (1,)), ((), ())),
                                       preferred_element_type=jnp.float32)  # [Np, 1]
        e = jnp.exp(w - node_max)                                           # [Np, 1]
        gsum = jax.lax.dot_general(M, e, (((0,), (0,)), ((), ())),
                                   preferred_element_type=jnp.float32)      # [G, 1]
        node_den = jnp.dot(M, gsum, preferred_element_type=jnp.float32)     # [Np, 1]
        attn = e / (node_den + 1e-16)

        # graph_sum(features * weight, batch): contract M over the node axis.
        fa = jax.lax.dot_general(M, f * attn, (((0,), (0,)), ((), ())),
                                 preferred_element_type=jnp.float32)        # [G, 128]

        # MLP([128, 128, 256], batch_norm=False): Linear + ReLU + Linear (f32, tiny).
        h1 = jnp.maximum(
            jnp.dot(fa, mw1_ref[...], preferred_element_type=jnp.float32)
            + mb1_ref[...], 0.0)
        out_ref[...] = (jnp.dot(h1, mw2_ref[...],
                                preferred_element_type=jnp.float32)
                        + mb2_ref[...])


def build_fused_params(p):
    """One-off parameter prep (do NOT call per forward)."""
    f32 = jnp.float32
    # Stage 0: x @ [W1 | AW1] -> [N, 192]; done outside the kernel, kept f32.
    wc1 = jnp.concatenate([p["w1"], p["aw1"]], axis=1)                      # [F_in, 192]
    # Stages 1/2: block-diagonal combined weights, padded to 192x192, bf16 for the MXU.
    wc2 = (jnp.zeros((C, C), f32)
           .at[:128, :128].set(p["w2"])
           .at[128:192, 128:160].set(p["aw2"]))
    wc3 = (jnp.zeros((C, C), f32)
           .at[:128, :128].set(p["w3"])
           .at[128:160, 128:129].set(p["aw3"]))
    wc23 = jnp.stack([wc2, wc3], axis=0).astype(jnp.bfloat16)               # [2, 192, 192]

    def pad_bias(b_feat, b_attn):
        b = jnp.zeros((1, C), f32).at[:, :128].set(b_feat)
        return b.at[:, 128:128 + b_attn.shape[1]].set(b_attn)

    bcs = jnp.stack([pad_bias(p["b1"], p["ab1"]),
                     pad_bias(p["b2"], p["ab2"]),
                     pad_bias(p["b3"], p["ab3"])], axis=0)                  # [3, 1, 192]
    return {"wc1": wc1, "wc23": wc23, "bcs": bcs,
            "mw1": p["mw1"], "mb1": p["mb1"],
            "mw2": p["mw2"], "mb2": p["mb2"]}


def _round_up(v, m):
    return -(-v // m) * m


def _vmem_budget_bytes():
    try:
        cap = int(pltpu.get_tpu_info().vmem_capacity_bytes)
    except Exception:
        cap = 64 * 2**20          # conservative (v7x-sized) fallback
    return int(cap * 0.85)        # leave headroom for Mosaic internal scratch


def samr_forward(x, a_hat_bf16, m, fused, row_tile=None, force_stream=False):
    """x [N,Fin] f32, a_hat_bf16 [N,N] bf16 (built once by caller), m [N,G] f32 one-hot."""
    N = x.shape[0]
    G = m.shape[1]
    out_features = fused["mw2"].shape[1]
    budget = _vmem_budget_bytes()

    # ---- generation-aware planning: resident A vs streamed row panels ---------------------
    c_pad = _round_up(C, 128)                       # lane-padded slab width in VMEM
    n16 = _round_up(N, 16)
    # BlockSpec'd operands counted twice (double buffering); scratch counted once.
    fixed = (2 * n16 * c_pad * 2                    # P1 (bf16)
             + 2 * n16 * max(G, 128) * 4            # M (G lane-pads to 128)
             + 2 * n16 * c_pad * 2                  # H ping-pong scratch (bf16)
             + 6 * n16 * 512                        # epilogue f32 temporaries (f, f*attn, ...)
             + 4 * 2**20)                           # weights, biases, out + slack
    resident = (not force_stream) and (fixed + 2 * n16 * n16 * 2 <= budget)

    if row_tile is None:
        if resident:
            row_tile = min(512, n16)
        else:
            panel_budget = max(budget - fixed, 4 * 128 * n16)
            row_tile = max(128, min(1024, (panel_budget // (4 * n16)) // 16 * 16))
    row_tile = min(_round_up(row_tile, 16), n16)
    Np = _round_up(N, row_tile)
    nr = Np // row_tile

    # ---- one-off projection + padding to the tile grid ------------------------------------
    # Padded nodes have zero adjacency rows/cols and a zero assignment row, so they cannot
    # contribute to any real graph's readout.
    p1 = jnp.dot(x, fused["wc1"], preferred_element_type=jnp.float32)
    if Np != N:
        p1 = jnp.pad(p1, ((0, Np - N), (0, 0)))
        a = jnp.pad(a_hat_bf16, ((0, Np - N), (0, Np - N)))
        m_in = jnp.pad(m, ((0, Np - N), (0, 0)))
    else:
        a, m_in = a_hat_bf16, m
    p1 = p1.astype(jnp.bfloat16)

    def full(shape):
        return pl.BlockSpec(shape, lambda s, r, _rank=len(shape): (0,) * _rank)

    if resident:
        # Constant block index => whole A_hat DMA'd into VMEM exactly once (not once per
        # stage); row panels are sliced out inside the kernel.
        a_spec = full((Np, Np))
    else:
        a_spec = pl.BlockSpec((row_tile, Np), lambda s, r: (r, 0))

    in_specs = [full((Np, C)),                       # P1 (bf16)
                a_spec,                              # A_hat (bf16)
                full((Np, G)),                       # M
                full(fused["wc23"].shape), full(fused["bcs"].shape),
                full(fused["mw1"].shape), full(fused["mb1"].shape),
                full(fused["mw2"].shape), full(fused["mb2"].shape)]

    kernel = functools.partial(samr_kernel, row_tile=row_tile, resident_a=resident)

    return pl.pallas_call(
        kernel,
        out_shape=jax.ShapeDtypeStruct((G, out_features), jnp.float32),
        grid=(3, nr),                                # (GCN stage, A row tile) — row fastest
        in_specs=in_specs,
        out_specs=pl.BlockSpec((G, out_features), lambda s, r: (0, 0)),
        scratch_shapes=[pltpu.VMEM((Np, C), jnp.bfloat16),    # H for even stages (0, 2)
                        pltpu.VMEM((Np, C), jnp.bfloat16)],   # H for odd stage  (1)
        compiler_params=pltpu.CompilerParams(
            dimension_semantics=("arbitrary", "arbitrary"),
            vmem_limit_bytes=budget),
    )(p1, a, m_in, fused["wc23"], fused["bcs"],
      fused["mw1"], fused["mb1"], fused["mw2"], fused["mb2"])


def reference_forward(x, a_hat, m, p):
    def gcn(h, w, b):
        return jnp.maximum(a_hat @ (h @ w) + b, 0.0)
    f = gcn(gcn(gcn(x, p["w1"], p["b1"]), p["w2"], p["b2"]), p["w3"], p["b3"])
    w = gcn(gcn(gcn(x, p["aw1"], p["ab1"]), p["aw2"], p["ab2"]), p["aw3"], p["ab3"])
    masked = jnp.where(m > 0.5, w, -1e30)
    gmax = jnp.max(masked, axis=0, keepdims=True)
    e = jnp.exp(w - jnp.sum(m * gmax, axis=1, keepdims=True))
    gsum = jnp.sum(m * e, axis=0, keepdims=True)
    attn = e / (jnp.sum(m * gsum, axis=1, keepdims=True) + 1e-16)
    fa = m.T @ (f * attn)
    h = jnp.maximum(fa @ p["mw1"] + p["mb1"], 0.0)
    return h @ p["mw2"] + p["mb2"]


def make_params(key, in_features, out_features=256):
    ks = jax.random.split(key, 10)
    def lin(k, fi, fo, scale=0.1):
        return (scale * jax.random.normal(k, (fi, fo), jnp.float32),
                jnp.zeros((1, fo), jnp.float32))
    p = {}
    p["w1"], p["b1"] = lin(ks[0], in_features, 128)
    p["w2"], p["b2"] = lin(ks[1], 128, 128)
    p["w3"], p["b3"] = lin(ks[2], 128, 128)
    p["aw1"], p["ab1"] = lin(ks[3], in_features, 64)
    p["aw2"], p["ab2"] = lin(ks[4], 64, 32)
    p["aw3"], p["ab3"] = lin(ks[5], 32, 1)
    p["mw1"], p["mb1"] = lin(ks[6], 128, 128)
    p["mw2"], p["mb2"] = lin(ks[7], 128, out_features)
    return p


def make_graph(num_graphs=2, nodes_per_graph=8):
    N = num_graphs * nodes_per_graph
    A = np.zeros((N, N), np.float32)
    for g in range(num_graphs):
        o = g * nodes_per_graph
        for i in range(nodes_per_graph):            # ring within each graph
            u, v = o + i, o + (i + 1) % nodes_per_graph
            A[u, v] = 1.0
            A[v, u] = 1.0
    A = A + np.eye(N, dtype=np.float32)             # self loops
    dinv = 1.0 / np.sqrt(A.sum(axis=1))
    a_hat = dinv[:, None] * A * dinv[None, :]       # D^-1/2 (A+I) D^-1/2
    batch = np.repeat(np.arange(num_graphs), nodes_per_graph)
    M = np.eye(num_graphs, dtype=np.float32)[batch]  # [N, G] one-hot
    return jnp.asarray(a_hat), jnp.asarray(M)


if __name__ == "__main__":
    in_features = 16
    num_graphs = 2
    nodes_per_graph = 128        # N = 256 -> (3, 2) grid actually exercises the tiling
    N = num_graphs * nodes_per_graph

    key = jax.random.PRNGKey(0)
    kx, kp = jax.random.split(key)
    x = jax.random.normal(kx, (N, in_features), jnp.float32)
    a_hat, M = make_graph(num_graphs, nodes_per_graph)
    params = make_params(kp, in_features, out_features=256)

    # One-off prep (persistent bf16 A_hat + fused/bf16 weight slabs).
    fused = build_fused_params(params)
    a_bf16 = a_hat.astype(jnp.bfloat16)

    ref = jax.block_until_ready(reference_forward(x, a_hat, M, params))

    # Resident-A path (A fits VMEM at this size on every TPU generation).
    out_res = jax.block_until_ready(samr_forward(x, a_bf16, M, fused, row_tile=128))
    assert out_res.shape == (num_graphs, 256)
    # Tolerance loosened vs. the pure-f32 reference: A_hat, per-stage H and the fused
    # stage weights go through the MXU in bfloat16 (f32 accumulation).
    np.testing.assert_allclose(np.asarray(out_res), np.asarray(ref), rtol=5e-2, atol=2e-2)

    # Streamed-panel path (what large N falls back to) exercised on the same data.
    out_str = jax.block_until_ready(
        samr_forward(x, a_bf16, M, fused, row_tile=128, force_stream=True))
    np.testing.assert_allclose(np.asarray(out_str), np.asarray(ref), rtol=5e-2, atol=2e-2)

    print("KERNEL_OK")
</pallas_src>

<mosaic_0001>
module attributes {stable_mosaic.version = 11 : i64} {
  func.func @samr_kernel(%arg0: i32, %arg1: i32, %arg2: memref<256x192xbf16, #tpu.memory_space<vmem>>, %arg3: memref<256x256xbf16, #tpu.memory_space<vmem>>, %arg4: memref<256x2xf32, #tpu.memory_space<vmem>>, %arg5: memref<2x192x192xbf16, #tpu.memory_space<vmem>>, %arg6: memref<3x1x192xf32, #tpu.memory_space<vmem>>, %arg7: memref<128x128xf32, #tpu.memory_space<vmem>>, %arg8: memref<1x128xf32, #tpu.memory_space<vmem>>, %arg9: memref<128x256xf32, #tpu.memory_space<vmem>>, %arg10: memref<1x256xf32, #tpu.memory_space<vmem>>, %arg11: memref<2x256xf32, #tpu.memory_space<vmem>>, %arg12: memref<256x192xbf16, #tpu.memory_space<vmem>>, %arg13: memref<256x192xbf16, #tpu.memory_space<vmem>>) attributes {dimension_semantics = [#tpu.dimension_semantics<arbitrary>, #tpu.dimension_semantics<arbitrary>], iteration_bounds = array<i64: 3, 2>, scalar_prefetch = 0 : i64, scratch_operands = 2 : i64, tpu.core_type = #tpu.core_type<tc>, window_params = [{pipeline_mode = #tpu.pipeline_mode<synchronous>, transform_indices = @transform_0, window_bounds = array<i64: 256, 192>}, {pipeline_mode = #tpu.pipeline_mode<synchronous>, transform_indices = @transform_1, window_bounds = array<i64: 256, 256>}, {pipeline_mode = #tpu.pipeline_mode<synchronous>, transform_indices = @transform_2, window_bounds = array<i64: 256, 2>}, {pipeline_mode = #tpu.pipeline_mode<synchronous>, transform_indices = @transform_3, window_bounds = array<i64: 2, 192, 192>}, {pipeline_mode = #tpu.pipeline_mode<synchronous>, transform_indices = @transform_4, window_bounds = array<i64: 3, 1, 192>}, {pipeline_mode = #tpu.pipeline_mode<synchronous>, transform_indices = @transform_5, window_bounds = array<i64: 128, 128>}, {pipeline_mode = #tpu.pipeline_mode<synchronous>, transform_indices = @transform_6, window_bounds = array<i64: 1, 128>}, {pipeline_mode = #tpu.pipeline_mode<synchronous>, transform_indices = @transform_7, window_bounds = array<i64: 128, 256>}, {pipeline_mode = #tpu.pipeline_mode<synchronous>, transform_indices = @transform_8, window_bounds = array<i64: 1, 256>}, {pipeline_mode = #tpu.pipeline_mode<synchronous>, transform_indices = @transform_9, window_bounds = array<i64: 2, 256>}]} {
    %c128_i32 = arith.constant 128 : i32
    %0 = arith.muli %arg1, %c128_i32 : i32
    %1 = tpu.assume_multiple %0, 128 : i32
    %2 = arith.index_cast %1 : i32 to index
    %c0 = arith.constant 0 : index
    %3 = vector.load %arg3[%2, %c0] : memref<256x256xbf16, #tpu.memory_space<vmem>>, vector<128x256xbf16>
    %c0_i32 = arith.constant 0 : i32
    %4 = arith.cmpi eq, %arg0, %c0_i32 : i32
    %5 = arith.extui %4 : i1 to i32
    %c0_i32_0 = arith.constant 0 : i32
    %6 = arith.cmpi ne, %5, %c0_i32_0 : i32
    scf.if %6 {
      %c0_6 = arith.constant 0 : index
      %c0_7 = arith.constant 0 : index
      %18 = vector.load %arg2[%c0_6, %c0_7] : memref<256x192xbf16, #tpu.memory_space<vmem>>, vector<256x192xbf16>
      %cst = arith.constant dense<0.000000e+00> : vector<128x192xf32>
      %19 = tpu.matmul %3, %18, %cst {dimension_numbers = #tpu.dot_dimension_numbers<[1], [0], [0], [1], [0, 0, 1, 1], [], []>} : vector<128x256xbf16>, vector<256x192xbf16>, vector<128x192xf32> -> vector<128x192xf32>
      %c0_8 = arith.constant 0 : index
      %c0_9 = arith.constant 0 : index
      %c0_10 = arith.constant 0 : index
      %20 = vector.load %arg6[%c0_8, %c0_9, %c0_10] : memref<3x1x192xf32, #tpu.memory_space<vmem>>, vector<1x1x192xf32>
      %21 = vector.shape_cast %20 : vector<1x1x192xf32> to vector<1x192xf32>
      %22 = vector.broadcast %21 : vector<1x192xf32> to vector<128x192xf32>
      %23 = arith.addf %19, %22 : vector<128x192xf32>
      %cst_11 = arith.constant 0.000000e+00 : f32
      %24 = vector.broadcast %cst_11 : f32 to vector<128x192xf32>
      %25 = arith.maximumf %23, %24 : vector<128x192xf32>
      %26 = arith.truncf %25 : vector<128x192xf32> to vector<128x192xbf16>
      %27 = arith.index_cast %1 : i32 to index
      %c0_12 = arith.constant 0 : index
      %28 = vector.load %arg12[%27, %c0_12] : memref<256x192xbf16, #tpu.memory_space<vmem>>, vector<128x192xbf16>
      tpu.vector_store %arg12[%27, %c0_12], %26 {strides = array<i32>} : memref<256x192xbf16, #tpu.memory_space<vmem>>, vector<128x192xbf16>,
    } else {
    }
    %c1_i32 = arith.constant 1 : i32
    %7 = arith.cmpi eq, %arg0, %c1_i32 : i32
    %8 = arith.extui %7 : i1 to i32
    %c0_i32_1 = arith.constant 0 : i32
    %9 = arith.cmpi ne, %8, %c0_i32_1 : i32
    scf.if %9 {
      %c0_6 = arith.constant 0 : index
      %c0_7 = arith.constant 0 : index
      %18 = vector.load %arg12[%c0_6, %c0_7] : memref<256x192xbf16, #tpu.memory_space<vmem>>, vector<256x192xbf16>
      %cst = arith.constant dense<0.000000e+00> : vector<128x192xf32>
      %19 = tpu.matmul %3, %18, %cst {dimension_numbers = #tpu.dot_dimension_numbers<[1], [0], [0], [1], [0, 0, 1, 1], [], []>} : vector<128x256xbf16>, vector<256x192xbf16>, vector<128x192xf32> -> vector<128x192xf32>
      %20 = arith.truncf %19 : vector<128x192xf32> to vector<128x192xbf16>
      %c0_8 = arith.constant 0 : index
      %c0_9 = arith.constant 0 : index
      %c0_10 = arith.constant 0 : index
      %21 = vector.load %arg5[%c0_8, %c0_9, %c0_10] : memref<2x192x192xbf16, #tpu.memory_space<vmem>>, vector<1x192x192xbf16>
      %22 = vector.shape_cast %21 : vector<1x192x192xbf16> to vector<192x192xbf16>
      %cst_11 = arith.constant dense<0.000000e+00> : vector<128x192xf32>
      %23 = tpu.matmul %20, %22, %cst_11 {dimension_numbers = #tpu.dot_dimension_numbers<[1], [0], [0], [1], [0, 0, 1, 1], [], []>} : vector<128x192xbf16>, vector<192x192xbf16>, vector<128x192xf32> -> vector<128x192xf32>
      %c1 = arith.constant 1 : index
      %c0_12 = arith.constant 0 : index
      %c0_13 = arith.constant 0 : index
      %24 = vector.load %arg6[%c1, %c0_12, %c0_13] : memref<3x1x192xf32, #tpu.memory_space<vmem>>, vector<1x1x192xf32>
      %25 = vector.shape_cast %24 : vector<1x1x192xf32> to vector<1x192xf32>
      %26 = vector.broadcast %25 : vector<1x192xf32> to vector<128x192xf32>
      %27 = arith.addf %23, %26 : vector<128x192xf32>
      %cst_14 = arith.constant 0.000000e+00 : f32
      %28 = vector.broadcast %cst_14 : f32 to vector<128x192xf32>
      %29 = arith.maximumf %27, %28 : vector<128x192xf32>
      %30 = arith.truncf %29 : vector<128x192xf32> to vector<128x192xbf16>
      %31 = arith.index_cast %1 : i32 to index
      %c0_15 = arith.constant 0 : index
      %32 = vector.load %arg13[%31, %c0_15] : memref<256x192xbf16, #tpu.memory_space<vmem>>, vector<128x192xbf16>
      tpu.vector_store %arg13[%31, %c0_15], %30 {strides = array<i32>} : memref<256x192xbf16, #tpu.memory_space<vmem>>, vector<128x192xbf16>,
    } else {
    }
    %c2_i32 = arith.constant 2 : i32
    %10 = arith.cmpi eq, %arg0, %c2_i32 : i32
    %11 = arith.extui %10 : i1 to i32
    %c0_i32_2 = arith.constant 0 : i32
    %12 = arith.cmpi ne, %11, %c0_i32_2 : i32
    scf.if %12 {
      %c0_6 = arith.constant 0 : index
      %c0_7 = arith.constant 0 : index
      %18 = vector.load %arg13[%c0_6, %c0_7] : memref<256x192xbf16, #tpu.memory_space<vmem>>, vector<256x192xbf16>
      %cst = arith.constant dense<0.000000e+00> : vector<128x192xf32>
      %19 = tpu.matmul %3, %18, %cst {dimension_numbers = #tpu.dot_dimension_numbers<[1], [0], [0], [1], [0, 0, 1, 1], [], []>} : vector<128x256xbf16>, vector<256x192xbf16>, vector<128x192xf32> -> vector<128x192xf32>
      %20 = arith.truncf %19 : vector<128x192xf32> to vector<128x192xbf16>
      %c1 = arith.constant 1 : index
      %c0_8 = arith.constant 0 : index
      %c0_9 = arith.constant 0 : index
      %21 = vector.load %arg5[%c1, %c0_8, %c0_9] : memref<2x192x192xbf16, #tpu.memory_space<vmem>>, vector<1x192x192xbf16>
      %22 = vector.shape_cast %21 : vector<1x192x192xbf16> to vector<192x192xbf16>
      %cst_10 = arith.constant dense<0.000000e+00> : vector<128x192xf32>
      %23 = tpu.matmul %20, %22, %cst_10 {dimension_numbers = #tpu.dot_dimension_numbers<[1], [0], [0], [1], [0, 0, 1, 1], [], []>} : vector<128x192xbf16>, vector<192x192xbf16>, vector<128x192xf32> -> vector<128x192xf32>
      %c2 = arith.constant 2 : index
      %c0_11 = arith.constant 0 : index
      %c0_12 = arith.constant 0 : index
      %24 = vector.load %arg6[%c2, %c0_11, %c0_12] : memref<3x1x192xf32, #tpu.memory_space<vmem>>, vector<1x1x192xf32>
      %25 = vector.shape_cast %24 : vector<1x1x192xf32> to vector<1x192xf32>
      %26 = vector.broadcast %25 : vector<1x192xf32> to vector<128x192xf32>
      %27 = arith.addf %23, %26 : vector<128x192xf32>
      %cst_13 = arith.constant 0.000000e+00 : f32
      %28 = vector.broadcast %cst_13 : f32 to vector<128x192xf32>
      %29 = arith.maximumf %27, %28 : vector<128x192xf32>
      %30 = arith.truncf %29 : vector<128x192xf32> to vector<128x192xbf16>
      %31 = arith.index_cast %1 : i32 to index
      %c0_14 = arith.constant 0 : index
      %32 = vector.load %arg12[%31, %c0_14] : memref<256x192xbf16, #tpu.memory_space<vmem>>, vector<128x192xbf16>
      tpu.vector_store %arg12[%31, %c0_14], %30 {strides = array<i32>} : memref<256x192xbf16, #tpu.memory_space<vmem>>, vector<128x192xbf16>,
    } else {
    }
    %c2_i32_3 = arith.constant 2 : i32
    %13 = arith.cmpi eq, %arg0, %c2_i32_3 : i32
    %c1_i32_4 = arith.constant 1 : i32
    %14 = arith.cmpi eq, %arg1, %c1_i32_4 : i32
    %15 = arith.andi %13, %14 : i1
    %16 = arith.extui %15 : i1 to i32
    %c0_i32_5 = arith.constant 0 : i32
    %17 = arith.cmpi ne, %16, %c0_i32_5 : i32
    scf.if %17 {
      %c0_6 = arith.constant 0 : index
      %c0_7 = arith.constant 0 : index
      %18 = vector.load %arg12[%c0_6, %c0_7] : memref<256x192xbf16, #tpu.memory_space<vmem>>, vector<256x128xbf16>
      %19 = arith.extf %18 : vector<256x128xbf16> to vector<256x128xf32>
      %c0_8 = arith.constant 0 : index
      %c128 = arith.constant 128 : index
      %20 = vector.load %arg12[%c0_8, %c128] : memref<256x192xbf16, #tpu.memory_space<vmem>>, vector<256x1xbf16>
      %21 = arith.extf %20 : vector<256x1xbf16> to vector<256x1xf32>
      %c0_9 = arith.constant 0 : index
      %c0_10 = arith.constant 0 : index
      %22 = vector.load %arg4[%c0_9, %c0_10] : memref<256x2xf32, #tpu.memory_space<vmem>>, vector<256x2xf32>
      %cst = arith.constant 5.000000e-01 : f32
      %23 = vector.broadcast %cst : f32 to vector<256x2xf32>
      %24 = arith.cmpf ogt, %22, %23 : vector<256x2xf32>
      %cst_11 = arith.constant -1.000000e+30 : f32
      %25 = vector.shape_cast %21 : vector<256x1xf32> to vector<256x1xf32>
      %26 = vector.broadcast %25 : vector<256x1xf32> to vector<256x2xf32>
      %27 = vector.broadcast %cst_11 : f32 to vector<256x2xf32>
      %28 = arith.select %24, %26, %27 : vector<256x2xi1>, vector<256x2xf32>
      %cst_12 = arith.constant dense<0xFF800000> : vector<2xf32>
      %29 = vector.multi_reduction <maximumf>, %28, %cst_12 [0] : vector<256x2xf32> to vector<2xf32>
      %30 = vector.shape_cast %29 : vector<2xf32> to vector<1x2xf32>
      %cst_13 = arith.constant dense<0.000000e+00> : vector<256x1xf32>
      %31 = tpu.matmul %22, %30, %cst_13 {dimension_numbers = #tpu.dot_dimension_numbers<[1], [1], [0], [0], [0, 0, 1, 0], [], []>} : vector<256x2xf32>, vector<1x2xf32>, vector<256x1xf32> -> vector<256x1xf32>
      %32 = arith.subf %21, %31 : vector<256x1xf32>
      %33 = math.exp %32 : vector<256x1xf32>
      %cst_14 = arith.constant dense<0.000000e+00> : vector<2x1xf32>
      %34 = tpu.matmul %22, %33, %cst_14 {dimension_numbers = #tpu.dot_dimension_numbers<[0], [0], [1], [1], [0, 1, 1, 1], [], []>} : vector<256x2xf32>, vector<256x1xf32>, vector<2x1xf32> -> vector<2x1xf32>
      %cst_15 = arith.constant dense<0.000000e+00> : vector<256x1xf32>
      %35 = tpu.matmul %22, %34, %cst_15 {dimension_numbers = #tpu.dot_dimension_numbers<[1], [0], [0], [1], [0, 0, 1, 1], [], []>} : vector<256x2xf32>, vector<2x1xf32>, vector<256x1xf32> -> vector<256x1xf32>
      %cst_16 = arith.constant 1.000000e-16 : f32
      %36 = vector.broadcast %cst_16 : f32 to vector<256x1xf32>
      %37 = arith.addf %35, %36 : vector<256x1xf32>
      %38 = arith.divf %33, %37 : vector<256x1xf32>
      %39 = vector.broadcast %38 : vector<256x1xf32> to vector<256x128xf32>
      %40 = arith.mulf %19, %39 : vector<256x128xf32>
      %cst_17 = arith.constant dense<0.000000e+00> : vector<2x128xf32>
      %41 = tpu.matmul %22, %40, %cst_17 {dimension_numbers = #tpu.dot_dimension_numbers<[0], [0], [1], [1], [0, 1, 1, 1], [], []>} : vector<256x2xf32>, vector<256x128xf32>, vector<2x128xf32> -> vector<2x128xf32>
      %c0_18 = arith.constant 0 : index
      %c0_19 = arith.constant 0 : index
      %42 = vector.load %arg7[%c0_18, %c0_19] : memref<128x128xf32, #tpu.memory_space<vmem>>, vector<128x128xf32>
      %cst_20 = arith.constant dense<0.000000e+00> : vector<2x128xf32>
      %43 = tpu.matmul %41, %42, %cst_20 {dimension_numbers = #tpu.dot_dimension_numbers<[1], [0], [0], [1], [0, 0, 1, 1], [], []>} : vector<2x128xf32>, vector<128x128xf32>, vector<2x128xf32> -> vector<2x128xf32>
      %c0_21 = arith.constant 0 : index
      %c0_22 = arith.constant 0 : index
      %44 = vector.load %arg8[%c0_21, %c0_22] : memref<1x128xf32, #tpu.memory_space<vmem>>, vector<1x128xf32>
      %45 = vector.broadcast %44 : vector<1x128xf32> to vector<2x128xf32>
      %46 = arith.addf %43, %45 : vector<2x128xf32>
      %cst_23 = arith.constant 0.000000e+00 : f32
      %47 = vector.broadcast %cst_23 : f32 to vector<2x128xf32>
      %48 = arith.maximumf %46, %47 : vector<2x128xf32>
      %c0_24 = arith.constant 0 : index
      %c0_25 = arith.constant 0 : index
      %49 = vector.load %arg9[%c0_24, %c0_25] : memref<128x256xf32, #tpu.memory_space<vmem>>, vector<128x256xf32>
      %cst_26 = arith.constant dense<0.000000e+00> : vector<2x256xf32>
      %50 = tpu.matmul %48, %49, %cst_26 {dimension_numbers = #tpu.dot_dimension_numbers<[1], [0], [0], [1], [0, 0, 1, 1], [], []>} : vector<2x128xf32>, vector<128x256xf32>, vector<2x256xf32> -> vector<2x256xf32>
      %c0_27 = arith.constant 0 : index
      %c0_28 = arith.constant 0 : index
      %51 = vector.load %arg10[%c0_27, %c0_28] : memref<1x256xf32, #tpu.memory_space<vmem>>, vector<1x256xf32>
      %52 = vector.broadcast %51 : vector<1x256xf32> to vector<2x256xf32>
      %53 = arith.addf %50, %52 : vector<2x256xf32>
      %c0_29 = arith.constant 0 : index
      %c0_30 = arith.constant 0 : index
      %54 = vector.load %arg11[%c0_29, %c0_30] : memref<2x256xf32, #tpu.memory_space<vmem>>, vector<2x256xf32>
      tpu.vector_store %arg11[%c0_29, %c0_30], %53 {strides = array<i32>} : memref<2x256xf32, #tpu.memory_space<vmem>>, vector<2x256xf32>,
    } else {
    }
    return
  }
  func.func @transform_0(%arg0: i32, %arg1: i32) -> (i32, i32) {
    %c0_i32 = arith.constant 0 : i32
    %c0_i32_0 = arith.constant 0 : i32
    %c0_i32_1 = arith.constant 0 : i32
    return %c0_i32, %c0_i32_0 : i32, i32
  }
  func.func @transform_1(%arg0: i32, %arg1: i32) -> (i32, i32) {
    %c0_i32 = arith.constant 0 : i32
    %c0_i32_0 = arith.constant 0 : i32
    %c0_i32_1 = arith.constant 0 : i32
    return %c0_i32, %c0_i32_0 : i32, i32
  }
  func.func @transform_2(%arg0: i32, %arg1: i32) -> (i32, i32) {
    %c0_i32 = arith.constant 0 : i32
    %c0_i32_0 = arith.constant 0 : i32
    %c0_i32_1 = arith.constant 0 : i32
    return %c0_i32, %c0_i32_0 : i32, i32
  }
  func.func @transform_3(%arg0: i32, %arg1: i32) -> (i32, i32, i32) {
    %c0_i32 = arith.constant 0 : i32
    %c0_i32_0 = arith.constant 0 : i32
    %c0_i32_1 = arith.constant 0 : i32
    %c0_i32_2 = arith.constant 0 : i32
    return %c0_i32, %c0_i32_0, %c0_i32_1 : i32, i32, i32
  }
  func.func @transform_4(%arg0: i32, %arg1: i32) -> (i32, i32, i32) {
    %c0_i32 = arith.constant 0 : i32
    %c0_i32_0 = arith.constant 0 : i32
    %c0_i32_1 = arith.constant 0 : i32
    %c0_i32_2 = arith.constant 0 : i32
    return %c0_i32, %c0_i32_0, %c0_i32_1 : i32, i32, i32
  }
  func.func @transform_5(%arg0: i32, %arg1: i32) -> (i32, i32) {
    %c0_i32 = arith.constant 0 : i32
    %c0_i32_0 = arith.constant 0 : i32
    %c0_i32_1 = arith.constant 0 : i32
    return %c0_i32, %c0_i32_0 : i32, i32
  }
  func.func @transform_6(%arg0: i32, %arg1: i32) -> (i32, i32) {
    %c0_i32 = arith.constant 0 : i32
    %c0_i32_0 = arith.constant 0 : i32
    %c0_i32_1 = arith.constant 0 : i32
    return %c0_i32, %c0_i32_0 : i32, i32
  }
  func.func @transform_7(%arg0: i32, %arg1: i32) -> (i32, i32) {
    %c0_i32 = arith.constant 0 : i32
    %c0_i32_0 = arith.constant 0 : i32
    %c0_i32_1 = arith.constant 0 : i32
    return %c0_i32, %c0_i32_0 : i32, i32
  }
  func.func @transform_8(%arg0: i32, %arg1: i32) -> (i32, i32) {
    %c0_i32 = arith.constant 0 : i32
    %c0_i32_0 = arith.constant 0 : i32
    %c0_i32_1 = arith.constant 0 : i32
    return %c0_i32, %c0_i32_0 : i32, i32
  }
  func.func @transform_9(%arg0: i32, %arg1: i32) -> (i32, i32) {
    %c0_i32 = arith.constant 0 : i32
    %c0_i32_0 = arith.constant 0 : i32
    %c0_i32_1 = arith.constant 0 : i32
    return %c0_i32, %c0_i32_0 : i32, i32
  }
}

</mosaic_0001>

<bundles_post_ra>
// kernel: tpu_custom_call.1
= control target key start
LH: loop header
LB: loop body
LE: loop exit
PB: predicated region body
PF: predicated region fallthrough
CT: control target
= control target key end

     0   :  { %14 = vsyncpa [#allocation5], 0  ;;  %s9088_s0 = inlined_call_operand.vmem [shape: bf16[256,192], index: 0, kind: input, shape index: {}]   ;;  %s9089_s1 = inlined_call_operand.vmem [shape: bf16[256,256], index: 1, kind: input, shape index: {}]   ;;  %s9090_s2 = inlined_call_operand.vmem [shape: f32[256,2], index: 2, kind: input, shape index: {}]   ;;  %s9091_s3 = inlined_call_operand.vmem [shape: bf16[2,192,192], index: 3, kind: input, shape index: {}]   ;;  %s9092_s4 = inlined_call_operand.vmem [shape: f32[3,1,192], index: 4, kind: input, shape index: {}]   ;;  %s9093_s5 = inlined_call_operand.hbm [shape: f32[128,128], index: 5, kind: input, shape index: {}]   ;;  %s9094_s6 = inlined_call_operand.vmem [shape: f32[1,128], index: 6, kind: input, shape index: {}]   ;;  %s9095_s7 = inlined_call_operand.hbm [shape: f32[128,256], index: 7, kind: input, shape index: {}]   ;;  %s9096_s8 = inlined_call_operand.vmem [shape: f32[1,256], index: 8, kind: input, shape index: {}]   ;;  %s9097_s9 = inlined_call_operand.hbm [shape: f32[2,256], index: 9, kind: output, shape index: {}]  }
   0x1   :  { %15 = vsyncpa [#allocation8], 0 }
   0x2   :  { %16 = vsyncpa [#allocation6], 0  ;;  %s6307_s30 = smov 0   ;;  %s6309_s10 = smov 0  }
   0x3   :  { %s6311_s11 = smov 0   ;;  %s6313_s12 = smov 0  }
   0x4   :  { %s6315_s13 = smov 0  }
   0x5 LB: > { %s9098_s14 = sadd.s32 4294967295, %s6247_s13   ;;  %s31_s15 = sadd.s32 1, %s6239_s11  ;;  %s6247_s13 = sphi %s6315_s13, %s22_s13   ;;  %s6243_s12 = sphi %s6313_s12, %s9405_s12   ;;  %s6239_s11 = sphi %s6311_s11, %s9404_s11   ;;  %s6235_s10 = sphi %s6309_s10, %s9403_s10   ;;  %s6231_s30 = sphi %s6307_s30, %s9402_s30  }
   0x6   : > { %p32_p0 = scmp.ge.s32.totalorder %s31_s15, 2  ;;  %s34_s16 = sadd.s32 1, %s6243_s12 }
   0x7   : > { %p4690_p1 = scmp.ge.s32.totalorder %s6247_s13, 1  ;;  %p249_p2 = scmp.lt.s32.totalorder %s6247_s13, 7 }
   0x8   : > { %s9407_s15 = smov (%p32_p0, %s31_s15), 0  ;;  %s9409_s16 = smov (!%p32_p0, %s34_s16), %s6243_s12 }
   0x9   : > { %p6340_p3 = pnand %p4690_p1, %p249_p2  ;;  %p36_p4 = scmp.ge.s32.totalorder %s9409_s16, 3 }
   0xa   : > { %p6346_p5 = scmp.eq.s32.totalorder %s9098_s14, 0  ;;  %s275_s21 = sshll.u32 %s9093_s5, 4  ;;  %s276_s21 = int_to_ptr.hbm [resolvable:$true] %s275_s21 }
   0xb   : > { %p5784_p6 = pneg %p6340_p3  ;;  %s9411_s16 = smov (%p36_p4, %s9409_s16), 0 }
   0xc   : > { %s6249_s22 = smov [#allocation4]   ;;  %s6250_s24 = smov 128  }
   0xd   : > { %s277_s23 = sshll.u32 %s6249_s22, 4  ;;  %p5785_p7 = pnand %p6346_p5, %p5784_p6  ;;  %s278_s23 = int_to_ptr.vmem [resolvable:$true] %s277_s23 }
   0xe   : > { %s6251_s25 = smov 8   ;;  %s292_s28 = sshll.u32 %s9095_s7, 4  ;;  %s293_s28 = int_to_ptr.hbm [resolvable:$true] %s292_s28 }
   0xf   : > { %5787 = dma.hbm_to_vmem [thread:$0]  (!%p5785_p7), %s276_s21, 2048, %s278_s23, [#allocation5], %s6250_s24, %s6250_s24, %s6251_s25  }
  0x10   : > { %s6252_s29 = smov [#allocation7]   ;;  %s6253_s19 = smov 256  }
  0x11   : > { %s294_s14 = sshll.u32 %s6252_s29, 4  ;;  %s6254_s20 = smov 16   ;;  %s295_s14 = int_to_ptr.vmem [resolvable:$true] %s294_s14 }
  0x12   : > { %5790 = dma.hbm_to_vmem [thread:$0]  (!%p5785_p7), %s293_s28, 4096, %s295_s14, [#allocation8], %s6253_s19, %s6253_s19, %s6254_s20  }
  0x13   : > { %313 = sbr.rel (%p6340_p3) target bundleno = 2675 (0xa73), region = 56 }
  0x18   : > { %6218 = dma.done.wait (%p6346_p5), [#allocation5], 2048  }
  0x19   : > { %6220 = vsyncadd (%p6346_p5), [#allocation5], 4294965248 }
  0x1a   : > { %6222 = dma.done.wait (%p6346_p5), [#allocation8], 4096  }
  0x1b   : > { %6224 = vsyncadd (%p6346_p5), [#allocation8], 4294963200  ;;  %s6373_s21 = sshll.u32 %s6231_s30, 7  ;;  %p4699_p8 = scmp.ne.s32.totalorder %s6235_s10, 0 }
  0x1c   : > { %s6379_s17 = scalar_lea.vmem %s9089_s1, %s6373_s21  ;;  %s6909_s18 = scalar_lea.vmem (!%p4699_p8), [#allocation2], %s6373_s21 }
  0x1d   : > { %v6382_v0 = vld [vmem:[%s6379_s17 + $0x4] sm:$0xf]  ;;  %v6385_v1 = vld [vmem:[%s6379_s17] sm:$0xf]  ;;  %v6400_v6 = vld [vmem:[%s6379_s17 + $0x8] sm:$0xf0] }
  0x1e   : > { %9156 = vst [vmem:[#allocation13_spill] sm:$0xff] %v6382_v0  ;;  %v6388_v2 = vld [vmem:[%s6379_s17 + $0x4] sm:$0xf]  ;;  %v6391_v3 = vld [vmem:[%s6379_s17] sm:$0xf] }
  0x1f   : > { %9157 = vst [vmem:[#allocation14_spill] sm:$0xff] %v6385_v1  ;;  %v6394_v4 = vld [vmem:[%s6379_s17 + $0x4] sm:$0xf]  ;;  %v6397_v5 = vld [vmem:[%s6379_s17] sm:$0xf] }
  0x20   : > { %9158 = vst [vmem:[#allocation15_spill] sm:$0xff] %v6400_v6  ;;  %v6403_v7 = vld [vmem:[%s6379_s17 + $0x4] sm:$0xf0]  ;;  %v6406_v8 = vld [vmem:[%s6379_s17 + $0x8] sm:$0xf0] }
  0x21   : > { %9159 = vst [vmem:[#allocation16_spill] sm:$0xff] %v6403_v7  ;;  %v6409_v9 = vld [vmem:[%s6379_s17 + $0x4] sm:$0xf0]  ;;  %v6412_v10 = vld [vmem:[%s6379_s17 + $0x8] sm:$0xf0] }
  0x22   : > { %v6415_v11 = vld [vmem:[%s6379_s17 + $0x4] sm:$0xf0]  ;;  %v6418_v12 = vld [vmem:[%s6379_s17 + $0x14] sm:$0xf]  ;;  %v6421_v13 = vld [vmem:[%s6379_s17 + $0x10] sm:$0xf] }
  0x23   : > { %9160 = vst [vmem:[#allocation17_spill] sm:$0xff] %v6418_v12  ;;  %v6424_v14 = vld [vmem:[%s6379_s17 + $0x14] sm:$0xf]  ;;  %v6427_v15 = vld [vmem:[%s6379_s17 + $0x10] sm:$0xf] }
  0x24   : > { %9161 = vst [vmem:[#allocation18_spill] sm:$0xff] %v6421_v13  ;;  %v6430_v16 = vld [vmem:[%s6379_s17 + $0x14] sm:$0xf]  ;;  %v6433_v17 = vld [vmem:[%s6379_s17 + $0x10] sm:$0xf] }
  0x25   : > { %v6436_v18 = vld [vmem:[%s6379_s17 + $0x18] sm:$0xf0]  ;;  %v6439_v19 = vld [vmem:[%s6379_s17 + $0x14] sm:$0xf0]  ;;  %v6454_v24 = vld [vmem:[%s6379_s17 + $0x24] sm:$0xf] }
  0x26   : > { %9162 = vst [vmem:[#allocation19_spill] sm:$0xff] %v6436_v18  ;;  %v6442_v20 = vld [vmem:[%s6379_s17 + $0x18] sm:$0xf0]  ;;  %v6445_v21 = vld [vmem:[%s6379_s17 + $0x14] sm:$0xf0] }
  0x27   : > { %9163 = vst [vmem:[#allocation20_spill] sm:$0xff] %v6439_v19  ;;  %v6448_v22 = vld [vmem:[%s6379_s17 + $0x18] sm:$0xf0]  ;;  %v6451_v23 = vld [vmem:[%s6379_s17 + $0x14] sm:$0xf0] }
  0x28   : > { %9164 = vst [vmem:[#allocation21_spill] sm:$0xff] %v6454_v24  ;;  %v6457_v25 = vld [vmem:[%s6379_s17 + $0x20] sm:$0xf]  ;;  %v6460_v26 = vld [vmem:[%s6379_s17 + $0x24] sm:$0xf] }
  0x29   : > { %9165 = vst [vmem:[#allocation22_spill] sm:$0xff] %v6457_v25  ;;  %v6463_v27 = vld [vmem:[%s6379_s17 + $0x20] sm:$0xf]  ;;  %v6466_v28 = vld [vmem:[%s6379_s17 + $0x24] sm:$0xf] }
  0x2a   : > { %v6469_v29 = vld [vmem:[%s6379_s17 + $0x20] sm:$0xf]  ;;  %v6472_v30 = vld [vmem:[%s6379_s17 + $0x28] sm:$0xf0]  ;;  %v6475_v31 = vld [vmem:[%s6379_s17 + $0x24] sm:$0xf0] }
  0x2b   : > { %9166 = vst [vmem:[#allocation23_spill] sm:$0xff] %v6472_v30  ;;  %v6478_v32 = vld [vmem:[%s6379_s17 + $0x28] sm:$0xf0]  ;;  %v6481_v33 = vld [vmem:[%s6379_s17 + $0x24] sm:$0xf0] }
  0x2c   : > { %9167 = vst [vmem:[#allocation24_spill] sm:$0xff] %v6475_v31  ;;  %v6484_v34 = vld [vmem:[%s6379_s17 + $0x28] sm:$0xf0]  ;;  %v6487_v35 = vld [vmem:[%s6379_s17 + $0x24] sm:$0xf0] }
  0x2d   : > { %v6490_v36 = vld [vmem:[%s6379_s17 + $0x34] sm:$0xf]  ;;  %v6493_v37 = vld [vmem:[%s6379_s17 + $0x30] sm:$0xf]  ;;  %v6508_v42 = vld [vmem:[%s6379_s17 + $0x38] sm:$0xf0] }
  0x2e   : > { %9168 = vst [vmem:[#allocation25_spill] sm:$0xff] %v6490_v36  ;;  %v6496_v38 = vld [vmem:[%s6379_s17 + $0x34] sm:$0xf]  ;;  %v6499_v39 = vld [vmem:[%s6379_s17 + $0x30] sm:$0xf] }
  0x2f   : > { %9169 = vst [vmem:[#allocation26_spill] sm:$0xff] %v6493_v37  ;;  %v6502_v40 = vld [vmem:[%s6379_s17 + $0x34] sm:$0xf]  ;;  %v6505_v41 = vld [vmem:[%s6379_s17 + $0x30] sm:$0xf] }
  0x30   : > { %9170 = vst [vmem:[#allocation27_spill] sm:$0xff] %v6496_v38  ;;  %v6511_v43 = vld [vmem:[%s6379_s17 + $0x34] sm:$0xf0]  ;;  %v6514_v44 = vld [vmem:[%s6379_s17 + $0x38] sm:$0xf0] }
  0x31   : > { %9171 = vst [vmem:[#allocation28_spill] sm:$0xff] %v6508_v42  ;;  %v6517_v45 = vld [vmem:[%s6379_s17 + $0x34] sm:$0xf0]  ;;  %v6520_v46 = vld [vmem:[%s6379_s17 + $0x38] sm:$0xf0] }
  0x32   : > { %9172 = vst [vmem:[#allocation29_spill] sm:$0xff] %v6511_v43  ;;  %v6523_v47 = vld [vmem:[%s6379_s17 + $0x34] sm:$0xf0]  ;;  %v6526_v48 = vld [vmem:[%s6379_s17 + $0x44] sm:$0xf] }
  0x33   : > { %9173 = vst [vmem:[#allocation30_spill] sm:$0xff] %v6514_v44  ;;  %v6529_v49 = vld [vmem:[%s6379_s17 + $0x40] sm:$0xf]  ;;  %v6532_v50 = vld [vmem:[%s6379_s17 + $0x44] sm:$0xf] }
  0x34   : > { %9174 = vst [vmem:[#allocation31_spill] sm:$0xff] %v6517_v45  ;;  %v6535_v51 = vld [vmem:[%s6379_s17 + $0x40] sm:$0xf]  ;;  %v6538_v52 = vld [vmem:[%s6379_s17 + $0x44] sm:$0xf] }
  0x35   : > { %9175 = vst [vmem:[#allocation32_spill] sm:$0xff] %v6526_v48  ;;  %v6541_v53 = vld [vmem:[%s6379_s17 + $0x40] sm:$0xf]  ;;  %v6544_v54 = vld [vmem:[%s6379_s17 + $0x48] sm:$0xf0] }
  0x36   : > { %9176 = vst [vmem:[#allocation33_spill] sm:$0xff] %v6529_v49  ;;  %v6547_v55 = vld [vmem:[%s6379_s17 + $0x44] sm:$0xf0]  ;;  %v6550_v56 = vld [vmem:[%s6379_s17 + $0x48] sm:$0xf0] }
  0x37   : > { %9177 = vst [vmem:[#allocation34_spill] sm:$0xff] %v6532_v50  ;;  %v6553_v57 = vld [vmem:[%s6379_s17 + $0x44] sm:$0xf0]  ;;  %v6556_v58 = vld [vmem:[%s6379_s17 + $0x48] sm:$0xf0] }
  0x38   : > { %9178 = vst [vmem:[#allocation35_spill] sm:$0xff] %v6535_v51  ;;  %v6559_v59 = vld [vmem:[%s6379_s17 + $0x44] sm:$0xf0]  ;;  %v6562_v60 = vld [vmem:[%s6379_s17 + $0x54] sm:$0xf] }
  0x39   : > { %9179 = vst [vmem:[#allocation36_spill] sm:$0xff] %v6544_v54  ;;  %v6565_v61 = vld [vmem:[%s6379_s17 + $0x50] sm:$0xf]  ;;  %v6568_v62 = vld [vmem:[%s6379_s17 + $0x54] sm:$0xf] }
  0x3a   : > { %9180 = vst [vmem:[#allocation37_spill] sm:$0xff] %v6547_v55  ;;  %v6571_v63 = vld [vmem:[%s6379_s17 + $0x50] sm:$0xf]  ;;  %v6574_v48 = vld [vmem:[%s6379_s17 + $0x54] sm:$0xf] }
  0x3b   : > { %9181 = vst [vmem:[#allocation38_spill] sm:$0xff] %v6550_v56  ;;  %v6577_v54 = vld [vmem:[%s6379_s17 + $0x50] sm:$0xf]  ;;  %v6580_v55 = vld [vmem:[%s6379_s17 + $0x58] sm:$0xf0] }
  0x3c   : > { %9182 = vst [vmem:[#allocation39_spill] sm:$0xff] %v6553_v57  ;;  %v6589_v49 = vld [vmem:[%s6379_s17 + $0x54] sm:$0xf0]  ;;  %v6592_v36 = vld [vmem:[%s6379_s17 + $0x58] sm:$0xf0] }
  0x3d   : > { %9183 = vst [vmem:[#allocation40_spill] sm:$0xff] %v6562_v60  ;;  %v6583_v60 = vld [vmem:[%s6379_s17 + $0x54] sm:$0xf0]  ;;  %v6598_v43 = vld [vmem:[%s6379_s17 + $0x64] sm:$0xf] }
  0x3e   : > { %9184 = vst [vmem:[#allocation41_spill] sm:$0xff] %v6565_v61  ;;  %v6586_v61 = vld [vmem:[%s6379_s17 + $0x58] sm:$0xf0]  ;;  %v6595_v42 = vld [vmem:[%s6379_s17 + $0x54] sm:$0xf0] }
  0x3f   : > { %9185 = vst [vmem:[#allocation42_spill] sm:$0xff] %v6568_v62  ;;  %v6607_v37 = vld [vmem:[%s6379_s17 + $0x60] sm:$0xf]  ;;  %v6610_v24 = vld [vmem:[%s6379_s17 + $0x64] sm:$0xf] }
  0x40   : > { %9186 = vst [vmem:[#allocation43_spill] sm:$0xff] %v6571_v63  ;;  %v6613_v30 = vld [vmem:[%s6379_s17 + $0x60] sm:$0xf]  ;;  %v6616_v31 = vld [vmem:[%s6379_s17 + $0x68] sm:$0xf0] }
  0x41   : > { %9187 = vst [vmem:[#allocation44_spill] sm:$0xff] %v6580_v55  ;;  %v6601_v55 = vld [vmem:[%s6379_s17 + $0x60] sm:$0xf]  ;;  %v6625_v25 = vld [vmem:[%s6379_s17 + $0x64] sm:$0xf0] }
  0x42   : > { %9188 = vst [vmem:[#allocation45_spill] sm:$0xff] %v6583_v60  ;;  %v6604_v60 = vld [vmem:[%s6379_s17 + $0x64] sm:$0xf]  ;;  %v6628_v12 = vld [vmem:[%s6379_s17 + $0x68] sm:$0xf0] }
  0x43   : > { %9189 = vst [vmem:[#allocation46_spill] sm:$0xff] %v6586_v61  ;;  %v6631_v18 = vld [vmem:[%s6379_s17 + $0x64] sm:$0xf0]  ;;  %v6634_v19 = vld [vmem:[%s6379_s17 + $0x74] sm:$0xf] }
  0x44   : > { %9190 = vst [vmem:[#allocation47_spill] sm:$0xff] %v6589_v49  ;;  %v6637_v13 = vld [vmem:[%s6379_s17 + $0x70] sm:$0xf]  ;;  %v6640_v0 = vld [vmem:[%s6379_s17 + $0x74] sm:$0xf] }
  0x45   : > { %9191 = vst [vmem:[#allocation48_spill] sm:$0xff] %v6598_v43  ;;  %v6619_v43 = vld [vmem:[%s6379_s17 + $0x64] sm:$0xf0]  ;;  %v6643_v6 = vld [vmem:[%s6379_s17 + $0x70] sm:$0xf] }
  0x46   : > { %9192 = vst [vmem:[#allocation49_spill] sm:$0xff] %v6601_v55  ;;  %v6622_v55 = vld [vmem:[%s6379_s17 + $0x68] sm:$0xf0]  ;;  %v6652_v7 = vld [vmem:[%s6379_s17 + $0x78] sm:$0xf0] }
  0x47   : > { %9193 = vst [vmem:[#allocation50_spill] sm:$0xff] %v6604_v60  ;;  %v6655_v1 = vld [vmem:[%s6379_s17 + $0x74] sm:$0xf0]  ;;  %v6658_v60 = vld [vmem:[%s6379_s17 + $0x78] sm:$0xf0] }
  0x48   : > { %9194 = vst [vmem:[#allocation51_spill] sm:$0xff] %v6607_v37 }
  0x49   : > { %9195 = vst [vmem:[#allocation52_spill] sm:$0xff] %v6616_v31  ;;  %v6646_v31 = vld [vmem:[%s6379_s17 + $0x74] sm:$0xf] }
  0x4a   : > { %9196 = vst [vmem:[#allocation53_spill] sm:$0xff] %v6619_v43  ;;  %v6649_v43 = vld [vmem:[%s6379_s17 + $0x70] sm:$0xf] }
  0x4b   : > { %9197 = vst [vmem:[#allocation54_spill] sm:$0xff] %v6622_v55  ;;  %v6661_v55 = vld [vmem:[%s6379_s17 + $0x74] sm:$0xf0] }
  0x4c   : > { %9198 = vst [vmem:[#allocation55_spill] sm:$0xff] %v6625_v25  ;;  %v6664_v25 = vld [vmem:[%s6379_s17 + $0x78] sm:$0xf0] }
  0x4d   : > { %9199 = vst [vmem:[#allocation56_spill] sm:$0xff] %v6634_v19  ;;  %v6667_v19 = vld [vmem:[%s6379_s17 + $0x74] sm:$0xf0] }
  0x4e   : > { %9200 = vst [vmem:[#allocation57_spill] sm:$0xff] %v6637_v13 }
  0x4f   : > { %9201 = vst [vmem:[#allocation58_spill] sm:$0xff] %v6640_v0 }
  0x50   : > { %9202 = vst [vmem:[#allocation59_spill] sm:$0xff] %v6643_v6  ;;  %371 = sbr.rel (%p4699_p8) target bundleno = 381 (0x17d), region = 68 }
  0x51   : > { %9203 = vst [vmem:[#allocation60_spill] sm:$0xff] %v6652_v7 }
  0x52   : > { %9204 = vst [vmem:[#allocation61_spill] sm:$0xff] %v6655_v1 }
  0x53   : > { %9205 = vst [vmem:[#allocation62_spill] sm:$0xff] %v6658_v60 }
  0x54   : > { %9206 = vst [vmem:[#allocation63_spill] sm:$0xff] %v6661_v55 }
  0x55   : > { %v4822_v13 = vld [vmem:[%s9088_s0 + $0x70] sm:$0xf]  ;;  %v5632_v7 = vld [vmem:[%s9088_s0 + $0x74] sm:$0xf0]  ;;  %v5631_v55 = vld [vmem:[%s9088_s0 + $0x74] sm:$0xf] }
  0x56   : > { %v4886_v1 = vld [vmem:[%s9088_s0 + $0xf0] sm:$0xf]  ;;  %v4823_v0 = vor.u32 %v5632_v7, %v4822_v13  ;;  %v5648_v60 = vld [vmem:[%s9088_s0 + $0xf4] sm:$0xf0]  ;;  %v4824_v6 = vld [vmem:[%s9088_s0 + $0x78] sm:$0xf0] }
  0x57   : > { %v4887_v37 = vor.u32 %v5648_v60, %v4886_v1  ;;  %v4827_v62 = vor.u32 %v5631_v55, %v4824_v6  ;;  %v5647_v61 = vld [vmem:[%s9088_s0 + $0xf4] sm:$0xf]  ;;  %v4888_v7 = vld [vmem:[%s9088_s0 + $0xf8] sm:$0xf0]  ;;  %v4814_v13 = vld [vmem:[%s9088_s0 + $0x60] sm:$0xf] }
  0x58   : > { %650 = vmatpush.bf16.msra.mxu0 %v4823_v0  ;;  %v4891_v49 = vor.u32 %v5647_v61, %v4888_v7  ;;  %v5630_v63 = vld [vmem:[%s9088_s0 + $0x64] sm:$0xf0]  ;;  %v4878_v1 = vld [vmem:[%s9088_s0 + $0xe0] sm:$0xf]  ;;  %v5629_v0 = vld [vmem:[%s9088_s0 + $0x64] sm:$0xf] }
  0x59   : > { %v5646_v6 = vld [vmem:[%s9088_s0 + $0xe4] sm:$0xf0]  ;;  %699 = vmatpush.bf16.msra.mxu1 %v4887_v37  ;;  %748 = vmatpush.bf16.msra.mxu2 %v4827_v62  ;;  %v4815_v55 = vor.u32 %v5630_v63, %v4814_v13  ;;  %v4816_v61 = vld [vmem:[%s9088_s0 + $0x68] sm:$0xf0]  ;;  %v5645_v7 = vld [vmem:[%s9088_s0 + $0xe4] sm:$0xf] }
  0x5a   : > { %v4879_v60 = vor.u32 %v5646_v6, %v4878_v1  ;;  %797 = vmatpush.bf16.msra.mxu3 %v4891_v49  ;;  %v4819_v50 = vor.u32 %v5629_v0, %v4816_v61  ;;  %v4880_v37 = vld [vmem:[%s9088_s0 + $0xe8] sm:$0xf0]  ;;  %v4806_v62 = vld [vmem:[%s9088_s0 + $0x50] sm:$0xf]  ;;  %v5628_v63 = vld [vmem:[%s9088_s0 + $0x54] sm:$0xf0] }
  0x5b   : > { %v4883_v13 = vor.u32 %v5645_v7, %v4880_v37  ;;  %v4870_v1 = vld [vmem:[%s9088_s0 + $0xd0] sm:$0xf]  ;;  %v5644_v49 = vld [vmem:[%s9088_s0 + $0xd4] sm:$0xf0]  ;;  %v5627_v6 = vld [vmem:[%s9088_s0 + $0x54] sm:$0xf]  ;;  %v4807_v0 = vor.u32 %v5628_v63, %v4806_v62 }
  0x5c   : > { %651 = vmatpush.bf16.msra.mxu0 %v4815_v55  ;;  %v4808_v61 = vld [vmem:[%s9088_s0 + $0x58] sm:$0xf0]  ;;  %v5643_v7 = vld [vmem:[%s9088_s0 + $0xd4] sm:$0xf]  ;;  %v4871_v56 = vor.u32 %v5644_v49, %v4870_v1  ;;  %v4798_v55 = vld [vmem:[%s9088_s0 + $0x40] sm:$0xf] }
  0x5d   : > { %v4872_v37 = vld [vmem:[%s9088_s0 + $0xd8] sm:$0xf0]  ;;  %700 = vmatpush.bf16.msra.mxu1 %v4879_v60  ;;  %749 = vmatpush.bf16.msra.mxu2 %v4819_v50  ;;  %v4811_v57 = vor.u32 %v5627_v6, %v4808_v61  ;;  %v5626_v62 = vld [vmem:[%s9088_s0 + $0x44] sm:$0xf0]  ;;  %v4862_v63 = vld [vmem:[%s9088_s0 + $0xc0] sm:$0xf] }
  0x5e   : > { %798 = vmatpush.bf16.msra.mxu3 %v4883_v13  ;;  %v4875_v51 = vor.u32 %v5643_v7, %v4872_v37  ;;  %v5642_v50 = vld [vmem:[%s9088_s0 + $0xc4] sm:$0xf0]  ;;  %v5625_v60 = vld [vmem:[%s9088_s0 + $0x44] sm:$0xf]  ;;  %v4800_v1 = vld [vmem:[%s9088_s0 + $0x48] sm:$0xf0]  ;;  %v4799_v6 = vor.u32 %v5626_v62, %v4798_v55 }
  0x5f   : > { %v5641_v49 = vld [vmem:[%s9088_s0 + $0xc4] sm:$0xf]  ;;  %v4864_v13 = vld [vmem:[%s9088_s0 + $0xc8] sm:$0xf0]  ;;  %v4863_v61 = vor.u32 %v5642_v50, %v4862_v63  ;;  %v4803_v7 = vor.u32 %v5625_v60, %v4800_v1  ;;  %v4790_v37 = vld [vmem:[%s9088_s0 + $0x30] sm:$0xf] }
  0x60   : > { %652 = vmatpush.bf16.msra.mxu0 %v4807_v0  ;;  %v5624_v38 = vld [vmem:[%s9088_s0 + $0x34] sm:$0xf0]  ;;  %v4854_v44 = vld [vmem:[%s9088_s0 + $0xb0] sm:$0xf]  ;;  %v4867_v45 = vor.u32 %v5641_v49, %v4864_v13  ;;  %v4792_v0 = vld [vmem:[%s9088_s0 + $0x38] sm:$0xf0] }
  0x61   : > { %701 = vmatpush.bf16.msra.mxu1 %v4871_v56  ;;  %750 = vmatpush.bf16.msra.mxu2 %v4811_v57  ;;  %v5640_v56 = vld [vmem:[%s9088_s0 + $0xb4] sm:$0xf0]  ;;  %v5623_v57 = vld [vmem:[%s9088_s0 + $0x34] sm:$0xf]  ;;  %v4791_v62 = vor.u32 %v5624_v38, %v4790_v37  ;;  %v4782_v60 = vld [vmem:[%s9088_s0 + $0x20] sm:$0xf] }
  0x62   : > { %799 = vmatpush.bf16.msra.mxu3 %v4875_v51  ;;  %v5639_v55 = vld [vmem:[%s9088_s0 + $0xb4] sm:$0xf]  ;;  %v4856_v51 = vld [vmem:[%s9088_s0 + $0xb8] sm:$0xf0]  ;;  %v4855_v63 = vor.u32 %v5640_v56, %v4854_v44  ;;  %v4795_v50 = vor.u32 %v5623_v57, %v4792_v0  ;;  %v5622_v1 = vld [vmem:[%s9088_s0 + $0x24] sm:$0xf0] }
  0x63   : > { %v4846_v49 = vld [vmem:[%s9088_s0 + $0xa0] sm:$0xf]  ;;  %v4859_v13 = vor.u32 %v5639_v55, %v4856_v51  ;;  %v5638_v38 = vld [vmem:[%s9088_s0 + $0xa4] sm:$0xf0]  ;;  %v5621_v44 = vld [vmem:[%s9088_s0 + $0x24] sm:$0xf] }
  0x64   : > { %653 = vmatpush.bf16.msra.mxu0 %v4799_v6  ;;  %v4784_v6 = vld [vmem:[%s9088_s0 + $0x28] sm:$0xf0]  ;;  %v4847_v37 = vor.u32 %v5638_v38, %v4846_v49  ;;  %v4774_v57 = vld [vmem:[%s9088_s0 + $0x10] sm:$0xf]  ;;  %v5620_v0 = vld [vmem:[%s9088_s0 + $0x14] sm:$0xf0] }
  0x65   : > { %702 = vmatpush.bf16.msra.mxu1 %v4863_v61  ;;  %751 = vmatpush.bf16.msra.mxu2 %v4803_v7  ;;  %v5637_v61 = vld [vmem:[%s9088_s0 + $0xa4] sm:$0xf]  ;;  %v4783_v7 = vor.u32 %v5622_v1, %v4782_v60  ;;  %v4787_v56 = vor.u32 %v5621_v44, %v4784_v6  ;;  %v4838_v55 = vld [vmem:[%s9088_s0 + $0x90] sm:$0xf]  ;;  %v5635_v60 = vld [vmem:[%s9088_s0 + $0x94] sm:$0xf]  ;;  %v4775_v49 = vor.u32 %v5620_v0, %v4774_v57 }
  0x66   : > { %800 = vmatpush.bf16.msra.mxu3 %v4867_v45  ;;  %v4848_v45 = vld [vmem:[%s9088_s0 + $0xa8] sm:$0xf0]  ;;  %v4840_v1 = vld [vmem:[%s9088_s0 + $0x98] sm:$0xf0]  ;;  %v4766_v44 = vld [vmem:[%s9088_s0] sm:$0xf] }
  0x67   : > { %v4851_v51 = vor.u32 %v5637_v61, %v4848_v45  ;;  %v5618_v6 = vld [vmem:[%s9088_s0 + $0x4] sm:$0xf0]  ;;  %v4830_v61 = vld [vmem:[%s9088_s0 + $0x80] sm:$0xf]  ;;  %v4843_v45 = vor.u32 %v5635_v60, %v4840_v1  ;;  %v5633_v57 = vld [vmem:[%s9088_s0 + $0x84] sm:$0xf]  ;;  %v4707_v60 = vor.u32 %v6394_v4, %v6412_v10  ;;  %v4711_v1 = vor.u32 %v6451_v23, %v6433_v17 }
  0x68   : > { %654 = vmatpush.bf16.msra.mxu0 %v4791_v62  ;;  %v5636_v62 = vld [vmem:[%s9088_s0 + $0x94] sm:$0xf0]  ;;  %v4832_v0 = vld [vmem:[%s9088_s0 + $0x88] sm:$0xf0]  ;;  %v4719_v4 = vor.u32 %v6487_v35, %v6469_v29  ;;  %v4727_v10 = vor.u32 %v6523_v47, %v6505_v41  ;;  %v4739_v17 = vor.u32 %v6538_v52, %v6556_v58  ;;  %v4747_v23 = vor.u32 %v6574_v48, %v6592_v36 }
  0x69   : > { %703 = vmatpush.bf16.msra.mxu1 %v4855_v63  ;;  %752 = vmatpush.bf16.msra.mxu2 %v4795_v50  ;;  %v5619_v63 = vld [vmem:[%s9088_s0 + $0x14] sm:$0xf]  ;;  %v4776_v50 = vld [vmem:[%s9088_s0 + $0x18] sm:$0xf0]  ;;  %v4755_v29 = vor.u32 %v6610_v24, %v6628_v12  ;;  %v4763_v35 = vor.u32 %v6646_v31, %v6664_v25  ;;  %vm896_vm0 = vcmask 1043456   ;;  %vm897_vm1 = vcmask 523268  }
  0x6a   : > { %801 = vmatpush.bf16.msra.mxu3 %v4859_v13  ;;  %v4839_v13 = vor.u32 %v5636_v62, %v4838_v55  ;;  %v4779_v38 = vor.u32 %v5619_v63, %v4776_v50  ;;  %v4767_v55 = vor.u32 %v5618_v6, %v4766_v44  ;;  %v4835_v63 = vor.u32 %v5633_v57, %v4832_v0  ;;  %vm6904_vm2 = vmor %vm897_vm1, %vm896_vm0 }
  0x6b   : > { %v4703_v50 = vor.u32 %v6415_v11, %v6397_v5  ;;  %v4723_v5 = vor.u32 %v6466_v28, %v6484_v34  ;;  %v4731_v11 = vor.u32 %v6502_v40, %v6520_v46  ;;  %v4751_v28 = vor.u32 %v6631_v18, %v6613_v30  ;;  %v404_v18 = vld [vmem:[%s9092_s4] sm:$0x3] }
  0x6c   : > { %655 = vmatpush.bf16.msra.mxu0 %v4783_v7  ;;  %v5634_v7 = vld [vmem:[%s9088_s0 + $0x84] sm:$0xf0]  ;;  %v4759_v34 = vor.u32 %v6667_v19, %v6649_v43  ;;  %v6897_v30 = vperm.slane %v404_v18, 0  ;;  %v6900_v40 = vperm.slane %v404_v18, 1 }
  0x6d   : > { %704 = vmatpush.bf16.msra.mxu1 %v4847_v37  ;;  %753 = vmatpush.bf16.msra.mxu2 %v4787_v56  ;;  %v5617_v37 = vld [vmem:[%s9088_s0 + $0x4] sm:$0xf]  ;;  %v4768_v56 = vld [vmem:[%s9088_s0 + $0x8] sm:$0xf0] }
  0x6e   : > { %802 = vmatpush.bf16.msra.mxu3 %v4851_v51  ;;  %v4831_v51 = vor.u32 %v5634_v7, %v4830_v61  ;;  %v4771_v62 = vor.u32 %v5617_v37, %v4768_v56 }
  0x70   : > { %656 = vmatpush.bf16.msra.mxu0 %v4775_v49  ;;  %v4715_v49 = vor.u32 %v6430_v16, %v6448_v22  ;;  %v4735_v16 = vor.u32 %v6559_v59, %v6541_v53  ;;  %v4743_v22 = vor.u32 %v6595_v42, %v6577_v54 }
  0x71   : > { %705 = vmatpush.bf16.msra.mxu1 %v4839_v13  ;;  %754 = vmatpush.bf16.msra.mxu2 %v4779_v38 }
  0x72   : > { %803 = vmatpush.bf16.msra.mxu3 %v4843_v45 }
  0x74   : > { %657 = vmatpush.bf16.msra.mxu0 %v4767_v55 }
  0x75   : > { %706 = vmatpush.bf16.msra.mxu1 %v4831_v51  ;;  %755 = vmatpush.bf16.msra.mxu2 %v4771_v62 }
  0x76   : > { %804 = vmatpush.bf16.msra.mxu3 %v4835_v63 }
  0x77   : > { %658 = vmatmul.bf16.vlgmr.msra.gmra.mxu0 %v4703_v50 }
  0x78   : > { %707 = vmatmul.bf16.vlgmr.msra.gmra.mxu1 %v4707_v60  ;;  %756 = vmatmul.bf16.vlgmr.msra.gmra.mxu2 %v4703_v50 }
  0x79   : > { %805 = vmatmul.bf16.vlgmr.msra.gmra.mxu3 %v4707_v60 }
  0x87   : > { %663 = vmatmul.bf16.gmra.mxu0 %v4711_v1 }
  0x88   : > { %712 = vmatmul.bf16.gmra.mxu1 %v4715_v49  ;;  %761 = vmatmul.bf16.gmra.mxu2 %v4711_v1 }
  0x89   : > { %810 = vmatmul.bf16.gmra.mxu3 %v4715_v49 }
  0x97   : > { %668 = vmatmul.bf16.gmra.mxu0 %v4719_v4 }
  0x98   : > { %717 = vmatmul.bf16.gmra.mxu1 %v4723_v5  ;;  %766 = vmatmul.bf16.gmra.mxu2 %v4719_v4 }
  0x99   : > { %815 = vmatmul.bf16.gmra.mxu3 %v4723_v5 }
  0xa7   : > { %673 = vmatmul.bf16.gmra.mxu0 %v4727_v10 }
  0xa8   : > { %722 = vmatmul.bf16.gmra.mxu1 %v4731_v11  ;;  %771 = vmatmul.bf16.gmra.mxu2 %v4727_v10 }
  0xa9   : > { %820 = vmatmul.bf16.gmra.mxu3 %v4731_v11 }
  0xb7   : > { %678 = vmatmul.bf16.gmra.mxu0 %v4735_v16 }
  0xb8   : > { %727 = vmatmul.bf16.gmra.mxu1 %v4739_v17  ;;  %776 = vmatmul.bf16.gmra.mxu2 %v4735_v16 }
  0xb9   : > { %825 = vmatmul.bf16.gmra.mxu3 %v4739_v17 }
  0xc7   : > { %683 = vmatmul.bf16.gmra.mxu0 %v4743_v22 }
  0xc8   : > { %732 = vmatmul.bf16.gmra.mxu1 %v4747_v23  ;;  %781 = vmatmul.bf16.gmra.mxu2 %v4743_v22 }
  0xc9   : > { %830 = vmatmul.bf16.gmra.mxu3 %v4747_v23 }
  0xd7   : > { %688 = vmatmul.bf16.gmra.mxu0 %v4751_v28 }
  0xd8   : > { %737 = vmatmul.bf16.gmra.mxu1 %v4755_v29  ;;  %786 = vmatmul.bf16.gmra.mxu2 %v4751_v28 }
  0xd9   : > { %835 = vmatmul.bf16.gmra.mxu3 %v4755_v29 }
  0xe7   : > { %693 = vmatmul.bf16.gmra.mxu0 %v4759_v34 }
  0xe8   : > { %742 = vmatmul.bf16.gmra.mxu1 %v4763_v35  ;;  %791 = vmatmul.bf16.gmra.mxu2 %v4759_v34 }
  0xe9   : > { %840 = vmatmul.bf16.gmra.mxu3 %v4763_v35 }
  0xf4   : > { %v659_v12 = vpop.f32.mrf.mxu0 }
  0xf5   : > { %v708_v24 = vpop.f32.mrf.mxu1  ;;  %v660_v36 = vadd.f32 %v659_v12, %v6897_v30 }
  0xf7   : > { %v709_v19 = vadd.f32 %v708_v24, %v660_v36 }
  0xf9   : > { %v846_v46 = vmax.f32 %v709_v19, 0.0 }
  0xfb   : > { %v757_v41 = vpop.f32.mrf.mxu2 }
  0xfc   : > { %v758_v25 = vadd.f32 %v757_v41, %v6900_v40  ;;  %v806_v31 = vpop.f32.mrf.mxu3  ;;  %v661_v42 = vpop.f32.mrf.mxu0 }
  0xfd   : > { %v710_v43 = vpop.f32.mrf.mxu1  ;;  %v662_v52 = vadd.f32 %v661_v42, %v6897_v30 }
  0xfe   : > { %v807_v47 = vadd.f32 %v806_v31, %v758_v25 }
  0xff   : > { %v711_v59 = vadd.f32 %v710_v43, %v662_v52 }
 0x100   : > { %v847_v48 = vmax.f32 %v807_v47, 0.0 }
 0x101   : > { %v848_v7 = vmax.f32 %v711_v59, 0.0 }
 0x102   : > { %v878_v54 = vpack.c.bf16 %v847_v48, %v846_v46 }
 0x103   : > { %v759_v58 = vpop.f32.mrf.mxu2 }
 0x104   : > { %899 = vst.msk [vmem:[%s6909_s18] sm:$0xff] %vm6904_vm2, %v878_v54  ;;  %v760_v13 = vadd.f32 %v759_v58, %v6900_v40  ;;  %v808_v38 = vpop.f32.mrf.mxu3  ;;  %v664_v44 = vpop.f32.mrf.mxu0 }
 0x105   : > { %v713_v6 = vpop.f32.mrf.mxu1  ;;  %v665_v45 = vadd.f32 %v664_v44, %v6897_v30 }
 0x106   : > { %v809_v61 = vadd.f32 %v808_v38, %v760_v13 }
 0x107   : > { %v714_v57 = vadd.f32 %v713_v6, %v665_v45 }
 0x108   : > { %v849_v37 = vmax.f32 %v809_v61, 0.0 }
 0x109   : > { %v850_v50 = vmax.f32 %v714_v57, 0.0 }
 0x10a   : > { %v879_v56 = vpack.c.bf16 %v849_v37, %v848_v7 }
 0x10b   : > { %v762_v0 = vpop.f32.mrf.mxu2 }
 0x10c   : > { %900 = vst.msk [vmem:[%s6909_s18 + $0x8] sm:$0xff] %vm6904_vm2, %v879_v56  ;;  %v763_v55 = vadd.f32 %v762_v0, %v6900_v40  ;;  %v811_v51 = vpop.f32.mrf.mxu3  ;;  %v666_v62 = vpop.f32.mrf.mxu0 }
 0x10d   : > { %v715_v63 = vpop.f32.mrf.mxu1  ;;  %v667_v49 = vadd.f32 %v666_v62, %v6897_v30 }
 0x10e   : > { %v812_v60 = vadd.f32 %v811_v51, %v763_v55 }
 0x10f   : > { %v716_v10 = vadd.f32 %v715_v63, %v667_v49 }
 0x110   : > { %v851_v1 = vmax.f32 %v812_v60, 0.0 }
 0x111   : > { %v852_v29 = vmax.f32 %v716_v10, 0.0 }
 0x112   : > { %v880_v4 = vpack.c.bf16 %v851_v1, %v850_v50 }
 0x113   : > { %v764_v5 = vpop.f32.mrf.mxu2 }
 0x114   : > { %901 = vst.msk [vmem:[%s6909_s18 + $0x10] sm:$0xff] %vm6904_vm2, %v880_v4  ;;  %v765_v11 = vadd.f32 %v764_v5, %v6900_v40  ;;  %v813_v16 = vpop.f32.mrf.mxu3  ;;  %v669_v17 = vpop.f32.mrf.mxu0 }
 0x115   : > { %v718_v22 = vpop.f32.mrf.mxu1  ;;  %v670_v28 = vadd.f32 %v669_v17, %v6897_v30 }
 0x116   : > { %v814_v23 = vadd.f32 %v813_v16, %v765_v11 }
 0x117   : > { %v719_v18 = vadd.f32 %v718_v22, %v670_v28 }
 0x118   : > { %v853_v34 = vmax.f32 %v814_v23, 0.0 }
 0x119   : > { %v854_v25 = vmax.f32 %v719_v18, 0.0 }
 0x11a   : > { %v881_v35 = vpack.c.bf16 %v853_v34, %v852_v29 }
 0x11b   : > { %v767_v12 = vpop.f32.mrf.mxu2 }
 0x11c   : > { %902 = vst.msk [vmem:[%s6909_s18 + $0x18] sm:$0xff] %vm6904_vm2, %v881_v35  ;;  %v768_v24 = vadd.f32 %v767_v12, %v6900_v40  ;;  %v816_v36 = vpop.f32.mrf.mxu3  ;;  %v671_v19 = vpop.f32.mrf.mxu0 }
 0x11d   : > { %v720_v41 = vpop.f32.mrf.mxu1  ;;  %v672_v43 = vadd.f32 %v671_v19, %v6897_v30 }
 0x11e   : > { %v817_v31 = vadd.f32 %v816_v36, %v768_v24 }
 0x11f   : > { %v721_v48 = vadd.f32 %v720_v41, %v672_v43 }
 0x120   : > { %v855_v42 = vmax.f32 %v817_v31, 0.0 }
 0x121   : > { %v856_v44 = vmax.f32 %v721_v48, 0.0 }
 0x122   : > { %v882_v46 = vpack.c.bf16 %v855_v42, %v854_v25 }
 0x123   : > { %v769_v47 = vpop.f32.mrf.mxu2 }
 0x124   : > { %903 = vst.msk [vmem:[%s6909_s18 + $0x20] sm:$0xff] %vm6904_vm2, %v882_v46  ;;  %v770_v52 = vadd.f32 %v769_v47, %v6900_v40  ;;  %v818_v54 = vpop.f32.mrf.mxu3  ;;  %v674_v58 = vpop.f32.mrf.mxu0 }
 0x125   : > { %v723_v59 = vpop.f32.mrf.mxu1  ;;  %v675_v38 = vadd.f32 %v674_v58, %v6897_v30 }
 0x126   : > { %v819_v13 = vadd.f32 %v818_v54, %v770_v52 }
 0x127   : > { %v724_v45 = vadd.f32 %v723_v59, %v675_v38 }
 0x128   : > { %v857_v6 = vmax.f32 %v819_v13, 0.0 }
 0x129   : > { %v858_v55 = vmax.f32 %v724_v45, 0.0 }
 0x12a   : > { %v883_v61 = vpack.c.bf16 %v857_v6, %v856_v44 }
 0x12b   : > { %v772_v7 = vpop.f32.mrf.mxu2 }
 0x12c   : > { %904 = vst.msk [vmem:[%s6909_s18 + $0x28] sm:$0xff] %vm6904_vm2, %v883_v61  ;;  %v773_v37 = vadd.f32 %v772_v7, %v6900_v40  ;;  %v821_v56 = vpop.f32.mrf.mxu3  ;;  %v676_v57 = vpop.f32.mrf.mxu0 }
 0x12d   : > { %v725_v0 = vpop.f32.mrf.mxu1  ;;  %v677_v63 = vadd.f32 %v676_v57, %v6897_v30 }
 0x12e   : > { %v822_v51 = vadd.f32 %v821_v56, %v773_v37 }
 0x12f   : > { %v726_v1 = vadd.f32 %v725_v0, %v677_v63 }
 0x130   : > { %v859_v62 = vmax.f32 %v822_v51, 0.0 }
 0x131   : > { %v860_v17 = vmax.f32 %v726_v1, 0.0 }
 0x132   : > { %v884_v50 = vpack.c.bf16 %v859_v62, %v858_v55 }
 0x133   : > { %v774_v60 = vpop.f32.mrf.mxu2 }
 0x134   : > { %905 = vst.msk [vmem:[%s6909_s18 + $0x30] sm:$0xff] %vm6904_vm2, %v884_v50  ;;  %v775_v49 = vadd.f32 %v774_v60, %v6900_v40  ;;  %v823_v4 = vpop.f32.mrf.mxu3  ;;  %v679_v5 = vpop.f32.mrf.mxu0 }
 0x135   : > { %v728_v10 = vpop.f32.mrf.mxu1  ;;  %v680_v16 = vadd.f32 %v679_v5, %v6897_v30 }
 0x136   : > { %v824_v11 = vadd.f32 %v823_v4, %v775_v49 }
 0x137   : > { %v729_v28 = vadd.f32 %v728_v10, %v680_v16 }
 0x138   : > { %v861_v22 = vmax.f32 %v824_v11, 0.0 }
 0x139   : > { %v862_v24 = vmax.f32 %v729_v28, 0.0 }
 0x13a   : > { %v885_v23 = vpack.c.bf16 %v861_v22, %v860_v17 }
 0x13b   : > { %v777_v29 = vpop.f32.mrf.mxu2 }
 0x13c   : > { %906 = vst.msk [vmem:[%s6909_s18 + $0x38] sm:$0xff] %vm6904_vm2, %v885_v23  ;;  %v778_v34 = vadd.f32 %v777_v29, %v6900_v40  ;;  %v826_v35 = vpop.f32.mrf.mxu3  ;;  %v681_v18 = vpop.f32.mrf.mxu0 }
 0x13d   : > { %v730_v12 = vpop.f32.mrf.mxu1  ;;  %v682_v41 = vadd.f32 %v681_v18, %v6897_v30 }
 0x13e   : > { %v827_v36 = vadd.f32 %v826_v35, %v778_v34 }
 0x13f   : > { %v731_v42 = vadd.f32 %v730_v12, %v682_v41 }
 0x140   : > { %v863_v19 = vmax.f32 %v827_v36, 0.0 }
 0x141   : > { %v864_v58 = vmax.f32 %v731_v42, 0.0 }
 0x142   : > { %v886_v25 = vpack.c.bf16 %v863_v19, %v862_v24 }
 0x143   : > { %v779_v31 = vpop.f32.mrf.mxu2 }
 0x144   : > { %907 = vst.msk [vmem:[%s6909_s18 + $0x40] sm:$0xff] %vm6904_vm2, %v886_v25  ;;  %v780_v43 = vadd.f32 %v779_v31, %v6900_v40  ;;  %v828_v46 = vpop.f32.mrf.mxu3  ;;  %v684_v47 = vpop.f32.mrf.mxu0 }
 0x145   : > { %v733_v48 = vpop.f32.mrf.mxu1  ;;  %v685_v54 = vadd.f32 %v684_v47, %v6897_v30 }
 0x146   : > { %v829_v52 = vadd.f32 %v828_v46, %v780_v43 }
 0x147   : > { %v734_v38 = vadd.f32 %v733_v48, %v685_v54 }
 0x148   : > { %v865_v59 = vmax.f32 %v829_v52, 0.0 }
 0x149   : > { %v866_v37 = vmax.f32 %v734_v38, 0.0 }
 0x14a   : > { %v887_v13 = vpack.c.bf16 %v865_v59, %v864_v58 }
 0x14b   : > { %v782_v44 = vpop.f32.mrf.mxu2 }
 0x14c   : > { %908 = vst.msk [vmem:[%s6909_s18 + $0x48] sm:$0xff] %vm6904_vm2, %v887_v13  ;;  %v783_v6 = vadd.f32 %v782_v44, %v6900_v40  ;;  %v831_v61 = vpop.f32.mrf.mxu3  ;;  %v686_v45 = vpop.f32.mrf.mxu0 }
 0x14d   : > { %v735_v7 = vpop.f32.mrf.mxu1  ;;  %v687_v0 = vadd.f32 %v686_v45, %v6897_v30 }
 0x14e   : > { %v832_v56 = vadd.f32 %v831_v61, %v783_v6 }
 0x14f   : > { %v736_v62 = vadd.f32 %v735_v7, %v687_v0 }
 0x150   : > { %v867_v57 = vmax.f32 %v832_v56, 0.0 }
 0x151   : > { %v868_v5 = vmax.f32 %v736_v62, 0.0 }
 0x152   : > { %v888_v55 = vpack.c.bf16 %v867_v57, %v866_v37 }
 0x153   : > { %v784_v51 = vpop.f32.mrf.mxu2 }
 0x154   : > { %909 = vst.msk [vmem:[%s6909_s18 + $0x50] sm:$0xff] %vm6904_vm2, %v888_v55  ;;  %v785_v63 = vadd.f32 %v784_v51, %v6900_v40  ;;  %v833_v50 = vpop.f32.mrf.mxu3  ;;  %v689_v60 = vpop.f32.mrf.mxu0 }
 0x155   : > { %v738_v1 = vpop.f32.mrf.mxu1  ;;  %v690_v4 = vadd.f32 %v689_v60, %v6897_v30 }
 0x156   : > { %v834_v49 = vadd.f32 %v833_v50, %v785_v63 }
 0x157   : > { %v739_v16 = vadd.f32 %v738_v1, %v690_v4 }
 0x158   : > { %v869_v10 = vmax.f32 %v834_v49, 0.0 }
 0x159   : > { %v870_v29 = vmax.f32 %v739_v16, 0.0 }
 0x15a   : > { %v889_v11 = vpack.c.bf16 %v869_v10, %v868_v5 }
 0x15b   : > { %v787_v17 = vpop.f32.mrf.mxu2 }
 0x15c   : > { %910 = vst.msk [vmem:[%s6909_s18 + $0x58] sm:$0xff] %vm6904_vm2, %v889_v11  ;;  %v788_v22 = vadd.f32 %v787_v17, %v6900_v40  ;;  %v836_v23 = vpop.f32.mrf.mxu3  ;;  %v691_v28 = vpop.f32.mrf.mxu0 }
 0x15d   : > { %v740_v35 = vpop.f32.mrf.mxu1  ;;  %v692_v12 = vadd.f32 %v691_v28, %v6897_v30 }
 0x15e   : > { %v837_v34 = vadd.f32 %v836_v23, %v788_v22 }
 0x15f   : > { %v741_v19 = vadd.f32 %v740_v35, %v692_v12 }
 0x160   : > { %v871_v18 = vmax.f32 %v837_v34, 0.0 }
 0x161   : > { %v872_v46 = vmax.f32 %v741_v19, 0.0 }
 0x162   : > { %v890_v24 = vpack.c.bf16 %v871_v18, %v870_v29 }
 0x163   : > { %v789_v36 = vpop.f32.mrf.mxu2 }
 0x164   : > { %911 = vst.msk [vmem:[%s6909_s18 + $0x60] sm:$0xff] %vm6904_vm2, %v890_v24  ;;  %v790_v41 = vadd.f32 %v789_v36, %v6900_v40  ;;  %v838_v25 = vpop.f32.mrf.mxu3  ;;  %v694_v31 = vpop.f32.mrf.mxu0 }
 0x165   : > { %v695_v43 = vadd.f32 %v694_v31, %v6897_v30  ;;  %v743_v48 = vpop.f32.mrf.mxu1 }
 0x166   : > { %v839_v42 = vadd.f32 %v838_v25, %v790_v41 }
 0x167   : > { %v744_v54 = vadd.f32 %v743_v48, %v695_v43 }
 0x168   : > { %v873_v47 = vmax.f32 %v839_v42, 0.0 }
 0x169   : > { %v874_v44 = vmax.f32 %v744_v54, 0.0 }
 0x16a   : > { %v891_v52 = vpack.c.bf16 %v873_v47, %v872_v46 }
 0x16b   : > { %v792_v58 = vpop.f32.mrf.mxu2 }
 0x16c   : > { %912 = vst.msk [vmem:[%s6909_s18 + $0x68] sm:$0xff] %vm6904_vm2, %v891_v52  ;;  %v793_v59 = vadd.f32 %v792_v58, %v6900_v40  ;;  %v841_v13 = vpop.f32.mrf.mxu3  ;;  %v696_v38 = vpop.f32.mrf.mxu0 }
 0x16d   : > { %v697_v45 = vadd.f32 %v696_v38, %v6897_v30  ;;  %v745_v37 = vpop.f32.mrf.mxu1 }
 0x16e   : > { %v842_v6 = vadd.f32 %v841_v13, %v793_v59 }
 0x16f   : > { %v746_v57 = vadd.f32 %v745_v37, %v697_v45 }
 0x170   : > { %v875_v61 = vmax.f32 %v842_v6, 0.0 }
 0x171   : > { %v876_v62 = vmax.f32 %v746_v57, 0.0 }
 0x172   : > { %v892_v7 = vpack.c.bf16 %v875_v61, %v874_v44 }
 0x173   : > { %v794_v56 = vpop.f32.mrf.mxu2 }
 0x174   : > { %913 = vst.msk [vmem:[%s6909_s18 + $0x70] sm:$0xff] %vm6904_vm2, %v892_v7  ;;  %v795_v0 = vadd.f32 %v794_v56, %v6900_v40  ;;  %v843_v55 = vpop.f32.mrf.mxu3 }
 0x176   : > { %v844_v51 = vadd.f32 %v843_v55, %v795_v0 }
 0x178   : > { %v877_v63 = vmax.f32 %v844_v51, 0.0 }
 0x17a   : > { %v893_v50 = vpack.c.bf16 %v877_v63, %v876_v62 }
 0x17c   : > { %914 = vst.msk [vmem:[%s6909_s18 + $0x78] sm:$0xff] %vm6904_vm2, %v893_v50 }
 0x17d PF: > { %p4893_p9 = scmp.ne.s32.totalorder %s6235_s10, 1 }
 0x17e   : > { %s7196_s19 = scalar_lea.vmem (!%p4893_p9), [#allocation3], %s6373_s21 }
 0x17f   : > { %918 = sbr.rel (%p4893_p9) target bundleno = 827 (0x33b), region = 72 }
 0x184   : > { %v5016_v30 = vld [vmem:[#allocation2 + $0x70] sm:$0xf]  ;;  %v5665_v60 = vld [vmem:[#allocation2 + $0x74] sm:$0xf0]  ;;  %v5664_v5 = vld [vmem:[#allocation2 + $0x74] sm:$0xf] }
 0x185   : > { %v5080_v1 = vld [vmem:[#allocation2 + $0xf0] sm:$0xf]  ;;  %v5017_v49 = vor.u32 %v5665_v60, %v5016_v30  ;;  %v5681_v4 = vld [vmem:[#allocation2 + $0xf4] sm:$0xf0]  ;;  %v5018_v10 = vld [vmem:[#allocation2 + $0x78] sm:$0xf0] }
 0x186   : > { %v5081_v40 = vor.u32 %v5681_v4, %v5080_v1  ;;  %v5021_v11 = vor.u32 %v5664_v5, %v5018_v10  ;;  %v5680_v16 = vld [vmem:[#allocation2 + $0xf4] sm:$0xf]  ;;  %v5082_v17 = vld [vmem:[#allocation2 + $0xf8] sm:$0xf0]  ;;  %v5008_v22 = vld [vmem:[#allocation2 + $0x60] sm:$0xf] }
 0x187   : > { %1191 = vmatpush.bf16.msra.mxu0 %v5017_v49  ;;  %v5085_v23 = vor.u32 %v5680_v16, %v5082_v17  ;;  %v5663_v53 = vld [vmem:[#allocation2 + $0x64] sm:$0xf0]  ;;  %v5072_v28 = vld [vmem:[#allocation2 + $0xe0] sm:$0xf]  ;;  %v5662_v18 = vld [vmem:[#allocation2 + $0x64] sm:$0xf] }
 0x188   : > { %v5679_v29 = vld [vmem:[#allocation2 + $0xe4] sm:$0xf0]  ;;  %1240 = vmatpush.bf16.msra.mxu1 %v5081_v40  ;;  %1289 = vmatpush.bf16.msra.mxu2 %v5021_v11  ;;  %v5009_v34 = vor.u32 %v5663_v53, %v5008_v22  ;;  %v5010_v12 = vld [vmem:[#allocation2 + $0x68] sm:$0xf0]  ;;  %v5678_v24 = vld [vmem:[#allocation2 + $0xe4] sm:$0xf] }
 0x189   : > { %v5073_v35 = vor.u32 %v5679_v29, %v5072_v28  ;;  %1338 = vmatpush.bf16.msra.mxu3 %v5085_v23  ;;  %v5013_v36 = vor.u32 %v5662_v18, %v5010_v12  ;;  %v5074_v19 = vld [vmem:[#allocation2 + $0xe8] sm:$0xf0]  ;;  %v5000_v41 = vld [vmem:[#allocation2 + $0x50] sm:$0xf]  ;;  %v5661_v25 = vld [vmem:[#allocation2 + $0x54] sm:$0xf0] }
 0x18a   : > { %v5077_v31 = vor.u32 %v5678_v24, %v5074_v19  ;;  %v5064_v42 = vld [vmem:[#allocation2 + $0xd0] sm:$0xf]  ;;  %v5677_v43 = vld [vmem:[#allocation2 + $0xd4] sm:$0xf0]  ;;  %v5660_v46 = vld [vmem:[#allocation2 + $0x54] sm:$0xf]  ;;  %v5001_v47 = vor.u32 %v5661_v25, %v5000_v41 }
 0x18b   : > { %1192 = vmatpush.bf16.msra.mxu0 %v5009_v34  ;;  %v5002_v48 = vld [vmem:[#allocation2 + $0x58] sm:$0xf0]  ;;  %v5676_v52 = vld [vmem:[#allocation2 + $0xd4] sm:$0xf]  ;;  %v5065_v58 = vor.u32 %v5677_v43, %v5064_v42  ;;  %v4992_v13 = vld [vmem:[#allocation2 + $0x40] sm:$0xf] }
 0x18c   : > { %v5066_v54 = vld [vmem:[#allocation2 + $0xd8] sm:$0xf0]  ;;  %1241 = vmatpush.bf16.msra.mxu1 %v5073_v35  ;;  %1290 = vmatpush.bf16.msra.mxu2 %v5013_v36  ;;  %v5005_v59 = vor.u32 %v5660_v46, %v5002_v48  ;;  %v5659_v38 = vld [vmem:[#allocation2 + $0x44] sm:$0xf0]  ;;  %v5056_v44 = vld [vmem:[#allocation2 + $0xc0] sm:$0xf] }
 0x18d   : > { %1339 = vmatpush.bf16.msra.mxu3 %v5077_v31  ;;  %v5069_v6 = vor.u32 %v5676_v52, %v5066_v54  ;;  %v5675_v61 = vld [vmem:[#allocation2 + $0xc4] sm:$0xf0]  ;;  %v5658_v45 = vld [vmem:[#allocation2 + $0x44] sm:$0xf]  ;;  %v4994_v7 = vld [vmem:[#allocation2 + $0x48] sm:$0xf0]  ;;  %v4993_v57 = vor.u32 %v5659_v38, %v4992_v13 }
 0x18e   : > { %v5674_v37 = vld [vmem:[#allocation2 + $0xc4] sm:$0xf]  ;;  %v5058_v56 = vld [vmem:[#allocation2 + $0xc8] sm:$0xf0]  ;;  %v5057_v0 = vor.u32 %v5675_v61, %v5056_v44  ;;  %v4997_v55 = vor.u32 %v5658_v45, %v4994_v7  ;;  %v4984_v51 = vld [vmem:[#allocation2 + $0x30] sm:$0xf] }
 0x18f   : > { %1193 = vmatpush.bf16.msra.mxu0 %v5001_v47  ;;  %v5657_v62 = vld [vmem:[#allocation2 + $0x34] sm:$0xf0]  ;;  %v5048_v63 = vld [vmem:[#allocation2 + $0xb0] sm:$0xf]  ;;  %v5061_v50 = vor.u32 %v5674_v37, %v5058_v56  ;;  %v5656_v60 = vld [vmem:[#allocation2 + $0x34] sm:$0xf] }
 0x190   : > { %1242 = vmatpush.bf16.msra.mxu1 %v5065_v58  ;;  %1291 = vmatpush.bf16.msra.mxu2 %v5005_v59  ;;  %v5673_v30 = vld [vmem:[#allocation2 + $0xb4] sm:$0xf0]  ;;  %v4986_v1 = vld [vmem:[#allocation2 + $0x38] sm:$0xf0]  ;;  %v5672_v49 = vld [vmem:[#allocation2 + $0xb4] sm:$0xf]  ;;  %v4985_v5 = vor.u32 %v5657_v62, %v4984_v51 }
 0x191   : > { %1340 = vmatpush.bf16.msra.mxu3 %v5069_v6  ;;  %v5050_v4 = vld [vmem:[#allocation2 + $0xb8] sm:$0xf0]  ;;  %v5049_v10 = vor.u32 %v5673_v30, %v5048_v63  ;;  %v4989_v40 = vor.u32 %v5656_v60, %v4986_v1  ;;  %v4976_v11 = vld [vmem:[#allocation2 + $0x20] sm:$0xf]  ;;  %v5655_v16 = vld [vmem:[#allocation2 + $0x24] sm:$0xf0]  ;;  %v4897_v1 = vor.u32 %v6409_v9, %v6391_v3 }
 0x192   : > { %v5040_v17 = vld [vmem:[#allocation2 + $0xa0] sm:$0xf]  ;;  %v5053_v22 = vor.u32 %v5672_v49, %v5050_v4  ;;  %v5671_v23 = vld [vmem:[#allocation2 + $0xa4] sm:$0xf0]  ;;  %v5654_v53 = vld [vmem:[#allocation2 + $0x24] sm:$0xf]  ;;  %v4977_v35 = vor.u32 %v5655_v16, %v4976_v11 }
 0x193   : > { %1194 = vmatpush.bf16.msra.mxu0 %v4993_v57  ;;  %v4978_v28 = vld [vmem:[#allocation2 + $0x28] sm:$0xf0]  ;;  %v5670_v29 = vld [vmem:[#allocation2 + $0xa4] sm:$0xf]  ;;  %v5041_v18 = vor.u32 %v5671_v23, %v5040_v17  ;;  %v4968_v24 = vld [vmem:[#allocation2 + $0x10] sm:$0xf] }
 0x194   : > { %1243 = vmatpush.bf16.msra.mxu1 %v5057_v0  ;;  %1292 = vmatpush.bf16.msra.mxu2 %v4997_v55  ;;  %v5042_v34 = vld [vmem:[#allocation2 + $0xa8] sm:$0xf0]  ;;  %v4981_v12 = vor.u32 %v5654_v53, %v4978_v28  ;;  %v5653_v36 = vld [vmem:[#allocation2 + $0x14] sm:$0xf0]  ;;  %v5032_v19 = vld [vmem:[#allocation2 + $0x90] sm:$0xf]  ;;  %v4905_v53 = vor.u32 %v6445_v21, %v6427_v15  ;;  %v4909_v28 = vor.u32 %v6424_v14, %v6442_v20 }
 0x195   : > { %1341 = vmatpush.bf16.msra.mxu3 %v5061_v50  ;;  %v5045_v41 = vor.u32 %v5670_v29, %v5042_v34  ;;  %v5669_v25 = vld [vmem:[#allocation2 + $0x94] sm:$0xf0]  ;;  %v5652_v31 = vld [vmem:[#allocation2 + $0x14] sm:$0xf]  ;;  %v4970_v42 = vld [vmem:[#allocation2 + $0x18] sm:$0xf0]  ;;  %v4969_v47 = vor.u32 %v5653_v36, %v4968_v24 }
 0x196   : > { %v5668_v43 = vld [vmem:[#allocation2 + $0x94] sm:$0xf]  ;;  %v5034_v46 = vld [vmem:[#allocation2 + $0x98] sm:$0xf0]  ;;  %v4960_v48 = vld [vmem:[#allocation2] sm:$0xf]  ;;  %v5033_v52 = vor.u32 %v5669_v25, %v5032_v19  ;;  %v4973_v54 = vor.u32 %v5652_v31, %v4970_v42  ;;  %v4917_v25 = vor.u32 %v6460_v26, %v6478_v32 }
 0x197   : > { %1195 = vmatpush.bf16.msra.mxu0 %v4985_v5  ;;  %v5651_v58 = vld [vmem:[#allocation2 + $0x4] sm:$0xf0]  ;;  %v5024_v59 = vld [vmem:[#allocation2 + $0x80] sm:$0xf]  ;;  %v5037_v38 = vor.u32 %v5668_v43, %v5034_v46  ;;  %v5650_v44 = vld [vmem:[#allocation2 + $0x4] sm:$0xf] }
 0x198   : > { %1244 = vmatpush.bf16.msra.mxu1 %v5049_v10  ;;  %1293 = vmatpush.bf16.msra.mxu2 %v4989_v40  ;;  %v5667_v13 = vld [vmem:[#allocation2 + $0x84] sm:$0xf0]  ;;  %v4962_v6 = vld [vmem:[#allocation2 + $0x8] sm:$0xf0]  ;;  %v5666_v61 = vld [vmem:[#allocation2 + $0x84] sm:$0xf]  ;;  %v4961_v56 = vor.u32 %v5651_v58, %v4960_v48  ;;  %v4901_v40 = vor.u32 %v6388_v2, %v6406_v8 }
 0x199   : > { %1342 = vmatpush.bf16.msra.mxu3 %v5053_v22  ;;  %v5026_v45 = vld [vmem:[#allocation2 + $0x88] sm:$0xf0]  ;;  %v5696_v7 = vld [vmem:[%s9091_s3 + $0x74] sm:$0xf]  ;;  %v5147_v37 = vld [vmem:[%s9091_s3 + $0x78] sm:$0xf0]  ;;  %v5025_v55 = vor.u32 %v5667_v13, %v5024_v59  ;;  %v4965_v51 = vor.u32 %v5650_v44, %v4962_v6 }
 0x19a   : > { %v5704_v57 = vld [vmem:[%s9091_s3 + $0xb4] sm:$0xf]  ;;  %v5179_v0 = vld [vmem:[%s9091_s3 + $0xb8] sm:$0xf0]  ;;  %v5029_v62 = vor.u32 %v5666_v61, %v5026_v45  ;;  %v5150_v63 = vor.u32 %v5696_v7, %v5147_v37  ;;  %v5145_v50 = vld [vmem:[%s9091_s3 + $0x70] sm:$0xf] }
 0x19b   : > { %1196 = vmatpush.bf16.msra.mxu0 %v4977_v35  ;;  %v5697_v30 = vld [vmem:[%s9091_s3 + $0x74] sm:$0xf0]  ;;  %v5177_v60 = vld [vmem:[%s9091_s3 + $0xb0] sm:$0xf]  ;;  %v5182_v49 = vor.u32 %v5704_v57, %v5179_v0  ;;  %v5694_v5 = vld [vmem:[%s9091_s3 + $0x64] sm:$0xf] }
 0x19c   : > { %1245 = vmatpush.bf16.msra.mxu1 %v5041_v18  ;;  %1294 = vmatpush.bf16.msra.mxu2 %v4981_v12  ;;  %v5705_v4 = vld [vmem:[%s9091_s3 + $0xb4] sm:$0xf0]  ;;  %v5139_v10 = vld [vmem:[%s9091_s3 + $0x68] sm:$0xf0]  ;;  %v5146_v3 = vor.u32 %v5697_v30, %v5145_v50  ;;  %v5137_v16 = vld [vmem:[%s9091_s3 + $0x60] sm:$0xf] }
 0x19d   : > { %1343 = vmatpush.bf16.msra.mxu3 %v5045_v41  ;;  %v5178_v9 = vor.u32 %v5705_v4, %v5177_v60  ;;  %v5142_v11 = vor.u32 %v5694_v5, %v5139_v10  ;;  %v5695_v2 = vld [vmem:[%s9091_s3 + $0x64] sm:$0xf0]  ;;  %v5692_v8 = vld [vmem:[%s9091_s3 + $0x54] sm:$0xf]  ;;  %v5131_v22 = vld [vmem:[%s9091_s3 + $0x58] sm:$0xf0]  ;;  %v4913_v41 = vor.u32 %v6481_v33, %v6463_v27 }
 0x19e   : > { %v5138_v17 = vor.u32 %v5695_v2, %v5137_v16  ;;  %v5134_v23 = vor.u32 %v5692_v8, %v5131_v22  ;;  %v5702_v29 = vld [vmem:[%s9091_s3 + $0xa4] sm:$0xf]  ;;  %v5171_v34 = vld [vmem:[%s9091_s3 + $0xa8] sm:$0xf0]  ;;  %v5129_v35 = vld [vmem:[%s9091_s3 + $0x50] sm:$0xf] }
 0x19f   : > { %1197 = vmatpush.bf16.msra.mxu0 %v4969_v47  ;;  %v5174_v15 = vor.u32 %v5702_v29, %v5171_v34  ;;  %v5693_v14 = vld [vmem:[%s9091_s3 + $0x54] sm:$0xf0]  ;;  %v5169_v20 = vld [vmem:[%s9091_s3 + $0xa0] sm:$0xf]  ;;  %v5703_v21 = vld [vmem:[%s9091_s3 + $0xa4] sm:$0xf0] }
 0x1a0   : > { %1246 = vmatpush.bf16.msra.mxu1 %v5033_v52  ;;  %1295 = vmatpush.bf16.msra.mxu2 %v4973_v54  ;;  %v5130_v18 = vor.u32 %v5693_v14, %v5129_v35  ;;  %v5170_v12 = vor.u32 %v5703_v21, %v5169_v20  ;;  %v5690_v24 = vld [vmem:[%s9091_s3 + $0x44] sm:$0xf]  ;;  %v5123_v36 = vld [vmem:[%s9091_s3 + $0x48] sm:$0xf0]  ;;  %v5121_v31 = vld [vmem:[%s9091_s3 + $0x40] sm:$0xf] }
 0x1a1   : > { %1344 = vmatpush.bf16.msra.mxu3 %v5037_v38  ;;  %v5126_v19 = vor.u32 %v5690_v24, %v5123_v36  ;;  %v5691_v42 = vld [vmem:[%s9091_s3 + $0x44] sm:$0xf0]  ;;  %v5688_v43 = vld [vmem:[%s9091_s3 + $0x34] sm:$0xf]  ;;  %v5115_v26 = vld [vmem:[%s9091_s3 + $0x38] sm:$0xf0] }
 0x1a2   : > { %v5122_v27 = vor.u32 %v5691_v42, %v5121_v31  ;;  %v5118_v32 = vor.u32 %v5688_v43, %v5115_v26  ;;  %v9209_v33 = vld [vmem:[#allocation31_spill] sm:$0xff]  ;;  %v9210_v47 = vld [vmem:[#allocation30_spill] sm:$0xff]  ;;  %v5163_v58 = vld [vmem:[%s9091_s3 + $0x98] sm:$0xf0]  ;;  %vm1554_vm3 = vcmask 523264   ;;  %vm1825_vm4 = vcmask 1043456  }
 0x1a3   : > { %1198 = vmatpush.bf16.msra.mxu0 %v4961_v56  ;;  %v4921_v46 = vor.u32 %v9209_v33, %v6499_v39  ;;  %v9211_v48 = vld [vmem:[#allocation27_spill] sm:$0xff]  ;;  %v5113_v59 = vld [vmem:[%s9091_s3 + $0x30] sm:$0xf]  ;;  %v5686_v45 = vld [vmem:[%s9091_s3 + $0x24] sm:$0xf]  ;;  %vm1826_vm5 = vcmask 523268  }
 0x1a4   : > { %1247 = vmatpush.bf16.msra.mxu1 %v5025_v55  ;;  %1296 = vmatpush.bf16.msra.mxu2 %v4965_v51  ;;  %v4925_v52 = vor.u32 %v9211_v48, %v9210_v47  ;;  %v5700_v54 = vld [vmem:[%s9091_s3 + $0x94] sm:$0xf]  ;;  %v5689_v13 = vld [vmem:[%s9091_s3 + $0x34] sm:$0xf0]  ;;  %v5161_v38 = vld [vmem:[%s9091_s3 + $0x90] sm:$0xf] }
 0x1a5   : > { %1345 = vmatpush.bf16.msra.mxu3 %v5029_v62  ;;  %v5166_v39 = vor.u32 %v5700_v54, %v5163_v58  ;;  %v5701_v44 = vld [vmem:[%s9091_s3 + $0x94] sm:$0xf0]  ;;  %v5114_v6 = vor.u32 %v5689_v13, %v5113_v59  ;;  %v5107_v7 = vld [vmem:[%s9091_s3 + $0x28] sm:$0xf0]  ;;  %v5687_v50 = vld [vmem:[%s9091_s3 + $0x24] sm:$0xf0] }
 0x1a6   : > { %1199 = vmatmul.bf16.vlgmr.msra.gmra.mxu0 %v4897_v1  ;;  %v5162_v61 = vor.u32 %v5701_v44, %v5161_v38  ;;  %v5110_v37 = vor.u32 %v5686_v45, %v5107_v7  ;;  %v9212_v56 = vld [vmem:[#allocation35_spill] sm:$0xff]  ;;  %v9214_v55 = vld [vmem:[#allocation38_spill] sm:$0xff]  ;;  %v5153_v22 = vld [vmem:[%s9091_s3 + $0x80] sm:$0xf] }
 0x1a7   : > { %1248 = vmatmul.bf16.vlgmr.msra.gmra.mxu1 %v4901_v40  ;;  %1297 = vmatmul.bf16.vlgmr.msra.gmra.mxu2 %v4897_v1  ;;  %v9213_v57 = vld [vmem:[#allocation39_spill] sm:$0xff]  ;;  %v9215_v51 = vld [vmem:[#allocation34_spill] sm:$0xff]  ;;  %v5099_v1 = vld [vmem:[%s9091_s3 + $0x18] sm:$0xf0] }
 0x1a8   : > { %1677 = vmatpush.bf16.msrb.mxu2 %v5150_v63  ;;  %1346 = vmatmul.bf16.vlgmr.msra.gmra.mxu3 %v4901_v40  ;;  %v4929_v0 = vor.u32 %v9213_v57, %v9212_v56  ;;  %v4933_v62 = vor.u32 %v9215_v51, %v9214_v55  ;;  %v5105_v63 = vld [vmem:[%s9091_s3 + $0x20] sm:$0xf]  ;;  %v5684_v30 = vld [vmem:[%s9091_s3 + $0x14] sm:$0xf]  ;;  %v9218_v40 = vld [vmem:[#allocation46_spill] sm:$0xff] }
 0x1a9   : > { %1730 = vmatpush.bf16.msrb.mxu3 %v5182_v49  ;;  %1579 = vmatpush.bf16.msrb.mxu0 %v5146_v3  ;;  %v5106_v60 = vor.u32 %v5687_v50, %v5105_v63  ;;  %v5102_v49 = vor.u32 %v5684_v30, %v5099_v1  ;;  %v9216_v4 = vld [vmem:[#allocation43_spill] sm:$0xff]  ;;  %v9219_v3 = vld [vmem:[#allocation42_spill] sm:$0xff]  ;;  %v5682_v21 = vld [vmem:[%s9091_s3 + $0x4] sm:$0xf] }
 0x1aa   : > { %1632 = vmatpush.bf16.msrb.mxu1 %v5178_v9  ;;  %v9217_v5 = vld [vmem:[#allocation47_spill] sm:$0xff]  ;;  %v4941_v9 = vor.u32 %v9219_v3, %v9218_v40  ;;  %v5155_v16 = vld [vmem:[%s9091_s3 + $0x88] sm:$0xf0]  ;;  %v5097_v2 = vld [vmem:[%s9091_s3 + $0x10] sm:$0xf] }
 0x1ab   : > { %v4937_v10 = vor.u32 %v9217_v5, %v9216_v4  ;;  %v9220_v29 = vld [vmem:[#allocation51_spill] sm:$0xff]  ;;  %v9223_v14 = vld [vmem:[#allocation50_spill] sm:$0xff]  ;;  %v5089_v24 = vld [vmem:[%s9091_s3] sm:$0xf] }
 0x1ac   : > { %1678 = vmatpush.bf16.msrb.mxu2 %v5142_v11  ;;  %v5698_v11 = vld [vmem:[%s9091_s3 + $0x84] sm:$0xf]  ;;  %v9221_v34 = vld [vmem:[#allocation55_spill] sm:$0xff]  ;;  %v5683_v36 = vld [vmem:[%s9091_s3 + $0x4] sm:$0xf0] }
 0x1ad   : > { %1580 = vmatpush.bf16.msrb.mxu0 %v5138_v17  ;;  %1731 = vmatpush.bf16.msrb.mxu3 %v5174_v15  ;;  %v5158_v8 = vor.u32 %v5698_v11, %v5155_v16  ;;  %v5685_v17 = vld [vmem:[%s9091_s3 + $0x14] sm:$0xf0]  ;;  %v4945_v35 = vor.u32 %v9221_v34, %v9220_v29  ;;  %v9222_v15 = vld [vmem:[#allocation54_spill] sm:$0xff]  ;;  %vm7190_vm6 = vmor %vm1826_vm5, %vm1825_vm4 }
 0x1ae   : > { %1633 = vmatpush.bf16.msrb.mxu1 %v5170_v12  ;;  %v4949_v20 = vor.u32 %v9223_v14, %v9222_v15  ;;  %v9226_v42 = vld [vmem:[#allocation62_spill] sm:$0xff] }
 0x1af   : > { %v9227_v43 = vld [vmem:[#allocation58_spill] sm:$0xff] }
 0x1b0   : > { %1679 = vmatpush.bf16.msrb.mxu2 %v5134_v23  ;;  %v5699_v23 = vld [vmem:[%s9091_s3 + $0x84] sm:$0xf0] }
 0x1b1   : > { %1581 = vmatpush.bf16.msrb.mxu0 %v5130_v18  ;;  %1732 = vmatpush.bf16.msrb.mxu3 %v5166_v39  ;;  %v5091_v18 = vld [vmem:[%s9091_s3 + $0x8] sm:$0xf0] }
 0x1b2   : > { %1634 = vmatpush.bf16.msrb.mxu1 %v5162_v61  ;;  %v5094_v12 = vor.u32 %v5682_v21, %v5091_v18 }
 0x1b4   : > { %1680 = vmatpush.bf16.msrb.mxu2 %v5126_v19  ;;  %v5090_v19 = vor.u32 %v5683_v36, %v5089_v24 }
 0x1b5   : > { %1582 = vmatpush.bf16.msrb.mxu0 %v5122_v27  ;;  %1733 = vmatpush.bf16.msrb.mxu3 %v5158_v8  ;;  %v4957_v27 = vor.u32 %v9227_v43, %v9226_v42 }
 0x1b6   : > { %1204 = vmatmul.bf16.gmra.mxu0 %v4905_v53 }
 0x1b7   : > { %1253 = vmatmul.bf16.gmra.mxu1 %v4909_v28  ;;  %1302 = vmatmul.bf16.gmra.mxu2 %v4905_v53  ;;  %v5098_v53 = vor.u32 %v5685_v17, %v5097_v2 }
 0x1b8   : > { %1351 = vmatmul.bf16.gmra.mxu3 %v4909_v28  ;;  %1681 = vmatpush.bf16.msrb.mxu2 %v5118_v32  ;;  %v5154_v28 = vor.u32 %v5699_v23, %v5153_v22 }
 0x1b9   : > { %1583 = vmatpush.bf16.msrb.mxu0 %v5114_v6 }
 0x1ba   : > { %1635 = vmatpush.bf16.msrb.mxu1 %v5154_v28 }
 0x1bc   : > { %1682 = vmatpush.bf16.msrb.mxu2 %v5110_v37 }
 0x1bd   : > { %1584 = vmatpush.bf16.msrb.mxu0 %v5106_v60 }
 0x1c0   : > { %1683 = vmatpush.bf16.msrb.mxu2 %v5102_v49 }
 0x1c1   : > { %1585 = vmatpush.bf16.msrb.mxu0 %v5098_v53 }
 0x1c4   : > { %1684 = vmatpush.bf16.msrb.mxu2 %v5094_v12 }
 0x1c5   : > { %1586 = vmatpush.bf16.msrb.mxu0 %v5090_v19 }
 0x1c6   : > { %1209 = vmatmul.bf16.gmra.mxu0 %v4913_v41 }
 0x1c7   : > { %1258 = vmatmul.bf16.gmra.mxu1 %v4917_v25  ;;  %1307 = vmatmul.bf16.gmra.mxu2 %v4913_v41  ;;  %v9224_v41 = vld [vmem:[#allocation59_spill] sm:$0xff] }
 0x1c8   : > { %1356 = vmatmul.bf16.gmra.mxu3 %v4917_v25  ;;  %v9225_v25 = vld [vmem:[#allocation63_spill] sm:$0xff] }
 0x1c9   : > { %v4953_v31 = vor.u32 %v9225_v25, %v9224_v41 }
 0x1d6   : > { %1214 = vmatmul.bf16.gmra.mxu0 %v4921_v46 }
 0x1d7   : > { %1263 = vmatmul.bf16.gmra.mxu1 %v4925_v52  ;;  %1312 = vmatmul.bf16.gmra.mxu2 %v4921_v46 }
 0x1d8   : > { %1361 = vmatmul.bf16.gmra.mxu3 %v4925_v52 }
 0x1e6   : > { %1219 = vmatmul.bf16.gmra.mxu0 %v4929_v0 }
 0x1e7   : > { %1268 = vmatmul.bf16.gmra.mxu1 %v4933_v62  ;;  %1317 = vmatmul.bf16.gmra.mxu2 %v4929_v0 }
 0x1e8   : > { %1366 = vmatmul.bf16.gmra.mxu3 %v4933_v62 }
 0x1f6   : > { %1224 = vmatmul.bf16.gmra.mxu0 %v4937_v10 }
 0x1f7   : > { %1273 = vmatmul.bf16.gmra.mxu1 %v4941_v9  ;;  %1322 = vmatmul.bf16.gmra.mxu2 %v4937_v10 }
 0x1f8   : > { %1371 = vmatmul.bf16.gmra.mxu3 %v4941_v9 }
 0x206   : > { %1229 = vmatmul.bf16.gmra.mxu0 %v4945_v35 }
 0x207   : > { %1278 = vmatmul.bf16.gmra.mxu1 %v4949_v20  ;;  %1327 = vmatmul.bf16.gmra.mxu2 %v4945_v35 }
 0x208   : > { %1376 = vmatmul.bf16.gmra.mxu3 %v4949_v20 }
 0x216   : > { %1234 = vmatmul.bf16.gmra.mxu0 %v4953_v31 }
 0x217   : > { %1283 = vmatmul.bf16.gmra.mxu1 %v4957_v27  ;;  %1332 = vmatmul.bf16.gmra.mxu2 %v4953_v31 }
 0x218   : > { %1381 = vmatmul.bf16.gmra.mxu3 %v4957_v27 }
 0x223   : > { %v1200_v26 = vpop.f32.mrf.mxu0 }
 0x224   : > { %v1249_v32 = vpop.f32.mrf.mxu1 }
 0x225   : > { %v1250_v52 = vadd.f32 %v1249_v32, %v1200_v26 }
 0x22a   : > { %v1298_v33 = vpop.f32.mrf.mxu2 }
 0x22b   : > { %v1347_v46 = vpop.f32.mrf.mxu3  ;;  %v1202_v47 = vpop.f32.mrf.mxu0 }
 0x22c   : > { %v1251_v48 = vpop.f32.mrf.mxu1  ;;  %v1348_v38 = vadd.f32 %v1347_v46, %v1298_v33 }
 0x22d   : > { %v1252_v54 = vadd.f32 %v1251_v48, %v1202_v47 }
 0x22f   : > { %v1387_v58 = vpack.c.bf16 %v1252_v54, %v1250_v52 }
 0x231   : > { %1587 = vmatmul.bf16.vlgmr.msrb.gmra.mxu0 %v1387_v58  ;;  %1685 = vmatmul.bf16.vlgmr.msrb.gmra.mxu2 %v1387_v58 }
 0x232   : > { %v1300_v59 = vpop.f32.mrf.mxu2 }
 0x233   : > { %v1349_v39 = vpop.f32.mrf.mxu3  ;;  %v1205_v13 = vpop.f32.mrf.mxu0 }
 0x234   : > { %v1350_v44 = vadd.f32 %v1349_v39, %v1300_v59  ;;  %v1254_v6 = vpop.f32.mrf.mxu1 }
 0x235   : > { %v1255_v57 = vadd.f32 %v1254_v6, %v1205_v13 }
 0x236   : > { %v1388_v61 = vpack.c.bf16 %v1350_v44, %v1348_v38 }
 0x238   : > { %5183 = vmatmul.msk.bf16.vlgmr.msrb.gmra.mxu1 %vm1554_vm3, %v1388_v61  ;;  %5191 = vmatmul.msk.bf16.vlgmr.msrb.gmra.mxu3 %vm1554_vm3, %v1388_v61 }
 0x23a   : > { %v1303_v45 = vpop.f32.mrf.mxu2 }
 0x23b   : > { %v1352_v7 = vpop.f32.mrf.mxu3  ;;  %v1207_v37 = vpop.f32.mrf.mxu0 }
 0x23c   : > { %v1256_v56 = vpop.f32.mrf.mxu1  ;;  %v1353_v50 = vadd.f32 %v1352_v7, %v1303_v45 }
 0x23d   : > { %v1257_v0 = vadd.f32 %v1256_v56, %v1207_v37 }
 0x23f   : > { %v1389_v55 = vpack.c.bf16 %v1257_v0, %v1255_v57 }
 0x241   : > { %1592 = vmatmul.bf16.gmra.mxu0 %v1389_v55  ;;  %1690 = vmatmul.bf16.gmra.mxu2 %v1389_v55 }
 0x242   : > { %v1305_v51 = vpop.f32.mrf.mxu2 }
 0x243   : > { %v1354_v62 = vpop.f32.mrf.mxu3  ;;  %v1210_v63 = vpop.f32.mrf.mxu0 }
 0x244   : > { %v1355_v30 = vadd.f32 %v1354_v62, %v1305_v51  ;;  %v1259_v60 = vpop.f32.mrf.mxu1 }
 0x245   : > { %v1260_v40 = vadd.f32 %v1259_v60, %v1210_v63 }
 0x246   : > { %v1390_v1 = vpack.c.bf16 %v1355_v30, %v1353_v50 }
 0x248   : > { %5184 = vmatmul.msk.bf16.gmra.mxu1 %vm1554_vm3, %v1390_v1  ;;  %5192 = vmatmul.msk.bf16.gmra.mxu3 %vm1554_vm3, %v1390_v1 }
 0x24a   : > { %v1308_v49 = vpop.f32.mrf.mxu2 }
 0x24b   : > { %v1357_v4 = vpop.f32.mrf.mxu3  ;;  %v1212_v5 = vpop.f32.mrf.mxu0 }
 0x24c   : > { %v1261_v10 = vpop.f32.mrf.mxu1  ;;  %v1358_v8 = vadd.f32 %v1357_v4, %v1308_v49 }
 0x24d   : > { %v1262_v3 = vadd.f32 %v1261_v10, %v1212_v5 }
 0x24f   : > { %v1391_v9 = vpack.c.bf16 %v1262_v3, %v1260_v40 }
 0x251   : > { %1597 = vmatmul.bf16.gmra.mxu0 %v1391_v9  ;;  %1695 = vmatmul.bf16.gmra.mxu2 %v1391_v9 }
 0x252   : > { %v1310_v11 = vpop.f32.mrf.mxu2 }
 0x253   : > { %v1359_v16 = vpop.f32.mrf.mxu3  ;;  %v1215_v2 = vpop.f32.mrf.mxu0 }
 0x254   : > { %v1360_v17 = vadd.f32 %v1359_v16, %v1310_v11  ;;  %v1264_v22 = vpop.f32.mrf.mxu1 }
 0x255   : > { %v1265_v35 = vadd.f32 %v1264_v22, %v1215_v2 }
 0x256   : > { %v1392_v23 = vpack.c.bf16 %v1360_v17, %v1358_v8 }
 0x258   : > { %5185 = vmatmul.msk.bf16.gmra.mxu1 %vm1554_vm3, %v1392_v23  ;;  %5193 = vmatmul.msk.bf16.gmra.mxu3 %vm1554_vm3, %v1392_v23 }
 0x25a   : > { %v1313_v53 = vpop.f32.mrf.mxu2 }
 0x25b   : > { %v1362_v28 = vpop.f32.mrf.mxu3  ;;  %v1217_v29 = vpop.f32.mrf.mxu0 }
 0x25c   : > { %v1266_v34 = vpop.f32.mrf.mxu1  ;;  %v1363_v12 = vadd.f32 %v1362_v28, %v1313_v53 }
 0x25d   : > { %v1267_v15 = vadd.f32 %v1266_v34, %v1217_v29 }
 0x25f   : > { %v1393_v14 = vpack.c.bf16 %v1267_v15, %v1265_v35  ;;  %v5086_v15 = vld [vmem:[%s9092_s4 + $0x2] sm:$0x3] }
 0x261   : > { %1602 = vmatmul.bf16.gmra.mxu0 %v1393_v14  ;;  %1700 = vmatmul.bf16.gmra.mxu2 %v1393_v14  ;;  %v7184_v14 = vperm.slane %v5086_v15, 0 }
 0x262   : > { %v1315_v20 = vpop.f32.mrf.mxu2 }
 0x263   : > { %v1364_v21 = vpop.f32.mrf.mxu3  ;;  %v1220_v18 = vpop.f32.mrf.mxu0 }
 0x264   : > { %v1365_v24 = vadd.f32 %v1364_v21, %v1315_v20  ;;  %v1269_v36 = vpop.f32.mrf.mxu1 }
 0x265   : > { %v1270_v43 = vadd.f32 %v1269_v36, %v1220_v18  ;;  %v7186_v18 = vperm.slane %v5086_v15, 1 }
 0x266   : > { %v1394_v19 = vpack.c.bf16 %v1365_v24, %v1363_v12 }
 0x268   : > { %5186 = vmatmul.msk.bf16.gmra.mxu1 %vm1554_vm3, %v1394_v19  ;;  %5194 = vmatmul.msk.bf16.gmra.mxu3 %vm1554_vm3, %v1394_v19 }
 0x26a   : > { %v1318_v41 = vpop.f32.mrf.mxu2 }
 0x26b   : > { %v1367_v25 = vpop.f32.mrf.mxu3  ;;  %v1222_v31 = vpop.f32.mrf.mxu0 }
 0x26c   : > { %v1271_v42 = vpop.f32.mrf.mxu1  ;;  %v1368_v47 = vadd.f32 %v1367_v25, %v1318_v41 }
 0x26d   : > { %v1272_v27 = vadd.f32 %v1271_v42, %v1222_v31 }
 0x26f   : > { %v1395_v26 = vpack.c.bf16 %v1272_v27, %v1270_v43 }
 0x271   : > { %1607 = vmatmul.bf16.gmra.mxu0 %v1395_v26  ;;  %1705 = vmatmul.bf16.gmra.mxu2 %v1395_v26 }
 0x272   : > { %v1320_v32 = vpop.f32.mrf.mxu2 }
 0x273   : > { %v1369_v33 = vpop.f32.mrf.mxu3  ;;  %v1225_v46 = vpop.f32.mrf.mxu0 }
 0x274   : > { %v1370_v48 = vadd.f32 %v1369_v33, %v1320_v32  ;;  %v1274_v52 = vpop.f32.mrf.mxu1 }
 0x275   : > { %v1275_v38 = vadd.f32 %v1274_v52, %v1225_v46 }
 0x276   : > { %v1396_v54 = vpack.c.bf16 %v1370_v48, %v1368_v47 }
 0x278   : > { %5187 = vmatmul.msk.bf16.gmra.mxu1 %vm1554_vm3, %v1396_v54  ;;  %5195 = vmatmul.msk.bf16.gmra.mxu3 %vm1554_vm3, %v1396_v54 }
 0x27a   : > { %v1323_v58 = vpop.f32.mrf.mxu2 }
 0x27b   : > { %v1372_v59 = vpop.f32.mrf.mxu3  ;;  %v1227_v39 = vpop.f32.mrf.mxu0 }
 0x27c   : > { %v1276_v13 = vpop.f32.mrf.mxu1  ;;  %v1373_v37 = vadd.f32 %v1372_v59, %v1323_v58 }
 0x27d   : > { %v1277_v44 = vadd.f32 %v1276_v13, %v1227_v39 }
 0x27f   : > { %v1397_v6 = vpack.c.bf16 %v1277_v44, %v1275_v38 }
 0x281   : > { %1612 = vmatmul.bf16.gmra.mxu0 %v1397_v6  ;;  %1710 = vmatmul.bf16.gmra.mxu2 %v1397_v6 }
 0x282   : > { %v1325_v61 = vpop.f32.mrf.mxu2 }
 0x283   : > { %v1374_v45 = vpop.f32.mrf.mxu3  ;;  %v1230_v7 = vpop.f32.mrf.mxu0 }
 0x284   : > { %v1375_v56 = vadd.f32 %v1374_v45, %v1325_v61  ;;  %v1279_v57 = vpop.f32.mrf.mxu1 }
 0x285   : > { %v1280_v50 = vadd.f32 %v1279_v57, %v1230_v7 }
 0x286   : > { %v1398_v0 = vpack.c.bf16 %v1375_v56, %v1373_v37 }
 0x288   : > { %5188 = vmatmul.msk.bf16.gmra.mxu1 %vm1554_vm3, %v1398_v0  ;;  %5196 = vmatmul.msk.bf16.gmra.mxu3 %vm1554_vm3, %v1398_v0 }
 0x28a   : > { %v1328_v55 = vpop.f32.mrf.mxu2 }
 0x28b   : > { %v1377_v51 = vpop.f32.mrf.mxu3  ;;  %v1232_v62 = vpop.f32.mrf.mxu0 }
 0x28c   : > { %v1281_v63 = vpop.f32.mrf.mxu1  ;;  %v1378_v5 = vadd.f32 %v1377_v51, %v1328_v55 }
 0x28d   : > { %v1282_v30 = vadd.f32 %v1281_v63, %v1232_v62 }
 0x28f   : > { %v1399_v60 = vpack.c.bf16 %v1282_v30, %v1280_v50 }
 0x291   : > { %1617 = vmatmul.bf16.gmra.mxu0 %v1399_v60  ;;  %1715 = vmatmul.bf16.gmra.mxu2 %v1399_v60 }
 0x292   : > { %v1330_v1 = vpop.f32.mrf.mxu2 }
 0x293   : > { %v1379_v49 = vpop.f32.mrf.mxu3  ;;  %v1235_v4 = vpop.f32.mrf.mxu0 }
 0x294   : > { %v1380_v10 = vadd.f32 %v1379_v49, %v1330_v1  ;;  %v1284_v40 = vpop.f32.mrf.mxu1 }
 0x295   : > { %v1285_v8 = vadd.f32 %v1284_v40, %v1235_v4 }
 0x296   : > { %v1400_v3 = vpack.c.bf16 %v1380_v10, %v1378_v5 }
 0x298   : > { %5189 = vmatmul.msk.bf16.gmra.mxu1 %vm1554_vm3, %v1400_v3  ;;  %5197 = vmatmul.msk.bf16.gmra.mxu3 %vm1554_vm3, %v1400_v3 }
 0x29a   : > { %v1333_v9 = vpop.f32.mrf.mxu2 }
 0x29b   : > { %v1382_v11 = vpop.f32.mrf.mxu3  ;;  %v1237_v16 = vpop.f32.mrf.mxu0 }
 0x29c   : > { %v1286_v2 = vpop.f32.mrf.mxu1  ;;  %v1383_v28 = vadd.f32 %v1382_v11, %v1333_v9 }
 0x29d   : > { %v1287_v17 = vadd.f32 %v1286_v2, %v1237_v16 }
 0x29f   : > { %v1401_v22 = vpack.c.bf16 %v1287_v17, %v1285_v8 }
 0x2a1   : > { %1622 = vmatmul.bf16.gmra.mxu0 %v1401_v22  ;;  %1720 = vmatmul.bf16.gmra.mxu2 %v1401_v22 }
 0x2a2   : > { %v1335_v23 = vpop.f32.mrf.mxu2 }
 0x2a3   : > { %v1384_v53 = vpop.f32.mrf.mxu3 }
 0x2a4   : > { %v1385_v29 = vadd.f32 %v1384_v53, %v1335_v23 }
 0x2a6   : > { %v1402_v34 = vpack.c.bf16 %v1385_v29, %v1383_v28 }
 0x2a8   : > { %5190 = vmatmul.msk.bf16.gmra.mxu1 %vm1554_vm3, %v1402_v34  ;;  %5198 = vmatmul.msk.bf16.gmra.mxu3 %vm1554_vm3, %v1402_v34 }
 0x2ae   : > { %v1588_v35 = vpop.f32.mrf.mxu0 }
 0x2af   : > { %v1589_v24 = vadd.f32 %v1588_v35, %v7184_v14 }
 0x2b4   : > { %v1686_v20 = vpop.f32.mrf.mxu2 }
 0x2b5   : > { %v1637_v21 = vpop.f32.mrf.mxu1  ;;  %v1687_v19 = vadd.f32 %v1686_v20, %v7186_v18 }
 0x2b6   : > { %v1590_v12 = vpop.f32.mrf.mxu0  ;;  %v1638_v36 = vadd.f32 %v1637_v21, %v1589_v24 }
 0x2b7   : > { %v1591_v33 = vadd.f32 %v1590_v12, %v7184_v14 }
 0x2b8   : > { %v1775_v43 = vmax.f32 %v1638_v36, 0.0 }
 0x2bb   : > { %v1735_v41 = vpop.f32.mrf.mxu3 }
 0x2bc   : > { %v1736_v25 = vadd.f32 %v1735_v41, %v1687_v19  ;;  %v1688_v31 = vpop.f32.mrf.mxu2 }
 0x2bd   : > { %v1639_v42 = vpop.f32.mrf.mxu1  ;;  %v1689_v48 = vadd.f32 %v1688_v31, %v7186_v18 }
 0x2be   : > { %v1776_v27 = vmax.f32 %v1736_v25, 0.0  ;;  %v1593_v26 = vpop.f32.mrf.mxu0  ;;  %v1640_v47 = vadd.f32 %v1639_v42, %v1591_v33 }
 0x2bf   : > { %v1594_v44 = vadd.f32 %v1593_v26, %v7184_v14 }
 0x2c0   : > { %v1807_v46 = vpack.c.bf16 %v1776_v27, %v1775_v43  ;;  %v1777_v39 = vmax.f32 %v1640_v47, 0.0 }
 0x2c2   : > { %1828 = vst.msk [vmem:[%s7196_s19] sm:$0xff] %vm7190_vm6, %v1807_v46 }
 0x2c3   : > { %v1737_v52 = vpop.f32.mrf.mxu3 }
 0x2c4   : > { %v1738_v54 = vadd.f32 %v1737_v52, %v1689_v48  ;;  %v1691_v58 = vpop.f32.mrf.mxu2 }
 0x2c5   : > { %v1642_v59 = vpop.f32.mrf.mxu1  ;;  %v1692_v45 = vadd.f32 %v1691_v58, %v7186_v18 }
 0x2c6   : > { %v1778_v13 = vmax.f32 %v1738_v54, 0.0  ;;  %v1595_v38 = vpop.f32.mrf.mxu0  ;;  %v1643_v61 = vadd.f32 %v1642_v59, %v1594_v44 }
 0x2c7   : > { %v1596_v62 = vadd.f32 %v1595_v38, %v7184_v14 }
 0x2c8   : > { %v1808_v6 = vpack.c.bf16 %v1778_v13, %v1777_v39  ;;  %v1779_v0 = vmax.f32 %v1643_v61, 0.0 }
 0x2ca   : > { %1829 = vst.msk [vmem:[%s7196_s19 + $0x8] sm:$0xff] %vm7190_vm6, %v1808_v6 }
 0x2cb   : > { %v1740_v7 = vpop.f32.mrf.mxu3 }
 0x2cc   : > { %v1741_v37 = vadd.f32 %v1740_v7, %v1692_v45  ;;  %v1693_v56 = vpop.f32.mrf.mxu2 }
 0x2cd   : > { %v1644_v57 = vpop.f32.mrf.mxu1  ;;  %v1694_v30 = vadd.f32 %v1693_v56, %v7186_v18 }
 0x2ce   : > { %v1780_v55 = vmax.f32 %v1741_v37, 0.0  ;;  %v1598_v51 = vpop.f32.mrf.mxu0  ;;  %v1645_v50 = vadd.f32 %v1644_v57, %v1596_v62 }
 0x2cf   : > { %v1599_v3 = vadd.f32 %v1598_v51, %v7184_v14 }
 0x2d0   : > { %v1809_v63 = vpack.c.bf16 %v1780_v55, %v1779_v0  ;;  %v1781_v5 = vmax.f32 %v1645_v50, 0.0 }
 0x2d2   : > { %1830 = vst.msk [vmem:[%s7196_s19 + $0x10] sm:$0xff] %vm7190_vm6, %v1809_v63 }
 0x2d3   : > { %v1742_v60 = vpop.f32.mrf.mxu3 }
 0x2d4   : > { %v1743_v1 = vadd.f32 %v1742_v60, %v1694_v30  ;;  %v1696_v49 = vpop.f32.mrf.mxu2 }
 0x2d5   : > { %v1647_v4 = vpop.f32.mrf.mxu1  ;;  %v1697_v16 = vadd.f32 %v1696_v49, %v7186_v18 }
 0x2d6   : > { %v1782_v10 = vmax.f32 %v1743_v1, 0.0  ;;  %v1600_v40 = vpop.f32.mrf.mxu0  ;;  %v1648_v11 = vadd.f32 %v1647_v4, %v1599_v3 }
 0x2d7   : > { %v1601_v29 = vadd.f32 %v1600_v40, %v7184_v14 }
 0x2d8   : > { %v1810_v9 = vpack.c.bf16 %v1782_v10, %v1781_v5  ;;  %v1783_v23 = vmax.f32 %v1648_v11, 0.0 }
 0x2da   : > { %1831 = vst.msk [vmem:[%s7196_s19 + $0x18] sm:$0xff] %vm7190_vm6, %v1810_v9 }
 0x2db   : > { %v1745_v2 = vpop.f32.mrf.mxu3 }
 0x2dc   : > { %v1746_v8 = vadd.f32 %v1745_v2, %v1697_v16  ;;  %v1698_v17 = vpop.f32.mrf.mxu2 }
 0x2dd   : > { %v1649_v22 = vpop.f32.mrf.mxu1  ;;  %v1699_v15 = vadd.f32 %v1698_v17, %v7186_v18 }
 0x2de   : > { %v1784_v53 = vmax.f32 %v1746_v8, 0.0  ;;  %v1603_v28 = vpop.f32.mrf.mxu0  ;;  %v1650_v35 = vadd.f32 %v1649_v22, %v1601_v29 }
 0x2df   : > { %v1604_v25 = vadd.f32 %v1603_v28, %v7184_v14 }
 0x2e0   : > { %v1811_v34 = vpack.c.bf16 %v1784_v53, %v1783_v23  ;;  %v1785_v36 = vmax.f32 %v1650_v35, 0.0 }
 0x2e2   : > { %1832 = vst.msk [vmem:[%s7196_s19 + $0x20] sm:$0xff] %vm7190_vm6, %v1811_v34 }
 0x2e3   : > { %v1747_v20 = vpop.f32.mrf.mxu3 }
 0x2e4   : > { %v1748_v21 = vadd.f32 %v1747_v20, %v1699_v15  ;;  %v1701_v12 = vpop.f32.mrf.mxu2 }
 0x2e5   : > { %v1652_v24 = vpop.f32.mrf.mxu1  ;;  %v1702_v43 = vadd.f32 %v1701_v12, %v7186_v18 }
 0x2e6   : > { %v1786_v19 = vmax.f32 %v1748_v21, 0.0  ;;  %v1605_v41 = vpop.f32.mrf.mxu0  ;;  %v1653_v42 = vadd.f32 %v1652_v24, %v1604_v25 }
 0x2e7   : > { %v1606_v54 = vadd.f32 %v1605_v41, %v7184_v14 }
 0x2e8   : > { %v1812_v31 = vpack.c.bf16 %v1786_v19, %v1785_v36  ;;  %v1787_v47 = vmax.f32 %v1653_v42, 0.0 }
 0x2ea   : > { %1833 = vst.msk [vmem:[%s7196_s19 + $0x28] sm:$0xff] %vm7190_vm6, %v1812_v31 }
 0x2eb   : > { %v1750_v27 = vpop.f32.mrf.mxu3 }
 0x2ec   : > { %v1751_v26 = vadd.f32 %v1750_v27, %v1702_v43  ;;  %v1703_v33 = vpop.f32.mrf.mxu2 }
 0x2ed   : > { %v1654_v46 = vpop.f32.mrf.mxu1  ;;  %v1704_v39 = vadd.f32 %v1703_v33, %v7186_v18 }
 0x2ee   : > { %v1788_v48 = vmax.f32 %v1751_v26, 0.0  ;;  %v1608_v52 = vpop.f32.mrf.mxu0  ;;  %v1655_v59 = vadd.f32 %v1654_v46, %v1606_v54 }
 0x2ef   : > { %v1609_v37 = vadd.f32 %v1608_v52, %v7184_v14 }
 0x2f0   : > { %v1813_v58 = vpack.c.bf16 %v1788_v48, %v1787_v47  ;;  %v1789_v61 = vmax.f32 %v1655_v59, 0.0 }
 0x2f2   : > { %1834 = vst.msk [vmem:[%s7196_s19 + $0x30] sm:$0xff] %vm7190_vm6, %v1813_v58 }
 0x2f3   : > { %v1752_v13 = vpop.f32.mrf.mxu3 }
 0x2f4   : > { %v1753_v38 = vadd.f32 %v1752_v13, %v1704_v39  ;;  %v1706_v44 = vpop.f32.mrf.mxu2 }
 0x2f5   : > { %v1657_v6 = vpop.f32.mrf.mxu1  ;;  %v1707_v0 = vadd.f32 %v1706_v44, %v7186_v18 }
 0x2f6   : > { %v1790_v45 = vmax.f32 %v1753_v38, 0.0  ;;  %v1610_v7 = vpop.f32.mrf.mxu0  ;;  %v1658_v57 = vadd.f32 %v1657_v6, %v1609_v37 }
 0x2f7   : > { %v1611_v1 = vadd.f32 %v1610_v7, %v7184_v14 }
 0x2f8   : > { %v1814_v56 = vpack.c.bf16 %v1790_v45, %v1789_v61  ;;  %v1791_v50 = vmax.f32 %v1658_v57, 0.0 }
 0x2fa   : > { %1835 = vst.msk [vmem:[%s7196_s19 + $0x38] sm:$0xff] %vm7190_vm6, %v1814_v56 }
 0x2fb   : > { %v1755_v55 = vpop.f32.mrf.mxu3 }
 0x2fc   : > { %v1756_v51 = vadd.f32 %v1755_v55, %v1707_v0  ;;  %v1708_v62 = vpop.f32.mrf.mxu2 }
 0x2fd   : > { %v1659_v63 = vpop.f32.mrf.mxu1  ;;  %v1709_v5 = vadd.f32 %v1708_v62, %v7186_v18 }
 0x2fe   : > { %v1792_v30 = vmax.f32 %v1756_v51, 0.0  ;;  %v1613_v60 = vpop.f32.mrf.mxu0  ;;  %v1660_v4 = vadd.f32 %v1659_v63, %v1611_v1 }
 0x2ff   : > { %v1614_v8 = vadd.f32 %v1613_v60, %v7184_v14 }
 0x300   : > { %v1815_v49 = vpack.c.bf16 %v1792_v30, %v1791_v50  ;;  %v1793_v11 = vmax.f32 %v1660_v4, 0.0 }
 0x302   : > { %1836 = vst.msk [vmem:[%s7196_s19 + $0x40] sm:$0xff] %vm7190_vm6, %v1815_v49 }
 0x303   : > { %v1757_v10 = vpop.f32.mrf.mxu3 }
 0x304   : > { %v1758_v40 = vadd.f32 %v1757_v10, %v1709_v5  ;;  %v1711_v3 = vpop.f32.mrf.mxu2 }
 0x305   : > { %v1662_v9 = vpop.f32.mrf.mxu1  ;;  %v1712_v23 = vadd.f32 %v1711_v3, %v7186_v18 }
 0x306   : > { %v1794_v16 = vmax.f32 %v1758_v40, 0.0  ;;  %v1615_v2 = vpop.f32.mrf.mxu0  ;;  %v1663_v22 = vadd.f32 %v1662_v9, %v1614_v8 }
 0x307   : > { %v1616_v21 = vadd.f32 %v1615_v2, %v7184_v14 }
 0x308   : > { %v1816_v17 = vpack.c.bf16 %v1794_v16, %v1793_v11  ;;  %v1795_v35 = vmax.f32 %v1663_v22, 0.0 }
 0x30a   : > { %1837 = vst.msk [vmem:[%s7196_s19 + $0x48] sm:$0xff] %vm7190_vm6, %v1816_v17 }
 0x30b   : > { %v1760_v53 = vpop.f32.mrf.mxu3 }
 0x30c   : > { %v1761_v28 = vadd.f32 %v1760_v53, %v1712_v23  ;;  %v1713_v29 = vpop.f32.mrf.mxu2 }
 0x30d   : > { %v1664_v34 = vpop.f32.mrf.mxu1  ;;  %v1714_v36 = vadd.f32 %v1713_v29, %v7186_v18 }
 0x30e   : > { %v1796_v15 = vmax.f32 %v1761_v28, 0.0  ;;  %v1618_v20 = vpop.f32.mrf.mxu0  ;;  %v1665_v24 = vadd.f32 %v1664_v34, %v1616_v21 }
 0x30f   : > { %v1619_v27 = vadd.f32 %v1618_v20, %v7184_v14 }
 0x310   : > { %v1817_v12 = vpack.c.bf16 %v1796_v15, %v1795_v35  ;;  %v1797_v42 = vmax.f32 %v1665_v24, 0.0 }
 0x312   : > { %1838 = vst.msk [vmem:[%s7196_s19 + $0x50] sm:$0xff] %vm7190_vm6, %v1817_v12 }
 0x313   : > { %v1762_v19 = vpop.f32.mrf.mxu3 }
 0x314   : > { %v1763_v41 = vadd.f32 %v1762_v19, %v1714_v36  ;;  %v1716_v25 = vpop.f32.mrf.mxu2 }
 0x315   : > { %v1667_v31 = vpop.f32.mrf.mxu1  ;;  %v1717_v47 = vadd.f32 %v1716_v25, %v7186_v18 }
 0x316   : > { %v1798_v43 = vmax.f32 %v1763_v41, 0.0  ;;  %v1620_v33 = vpop.f32.mrf.mxu0  ;;  %v1668_v46 = vadd.f32 %v1667_v31, %v1619_v27 }
 0x317   : > { %v1621_v13 = vadd.f32 %v1620_v33, %v7184_v14 }
 0x318   : > { %v1818_v26 = vpack.c.bf16 %v1798_v43, %v1797_v42  ;;  %v1799_v59 = vmax.f32 %v1668_v46, 0.0 }
 0x31a   : > { %1839 = vst.msk [vmem:[%s7196_s19 + $0x58] sm:$0xff] %vm7190_vm6, %v1818_v26 }
 0x31b   : > { %v1765_v48 = vpop.f32.mrf.mxu3 }
 0x31c   : > { %v1766_v52 = vadd.f32 %v1765_v48, %v1717_v47  ;;  %v1718_v54 = vpop.f32.mrf.mxu2 }
 0x31d   : > { %v1669_v58 = vpop.f32.mrf.mxu1  ;;  %v1719_v6 = vadd.f32 %v1718_v54, %v7186_v18 }
 0x31e   : > { %v1800_v39 = vmax.f32 %v1766_v52, 0.0  ;;  %v1670_v44 = vadd.f32 %v1669_v58, %v1621_v13  ;;  %v1623_v61 = vpop.f32.mrf.mxu0 }
 0x31f   : > { %v1624_v55 = vadd.f32 %v1623_v61, %v7184_v14 }
 0x320   : > { %v1819_v38 = vpack.c.bf16 %v1800_v39, %v1799_v59  ;;  %v1801_v57 = vmax.f32 %v1670_v44, 0.0 }
 0x322   : > { %1840 = vst.msk [vmem:[%s7196_s19 + $0x60] sm:$0xff] %vm7190_vm6, %v1819_v38 }
 0x323   : > { %v1767_v45 = vpop.f32.mrf.mxu3 }
 0x324   : > { %v1768_v7 = vadd.f32 %v1767_v45, %v1719_v6  ;;  %v1721_v56 = vpop.f32.mrf.mxu2 }
 0x325   : > { %v1672_v37 = vpop.f32.mrf.mxu1  ;;  %v1722_v63 = vadd.f32 %v1721_v56, %v7186_v18 }
 0x326   : > { %v1802_v0 = vmax.f32 %v1768_v7, 0.0  ;;  %v1673_v62 = vadd.f32 %v1672_v37, %v1624_v55  ;;  %v1625_v60 = vpop.f32.mrf.mxu0 }
 0x327   : > { %v1626_v10 = vadd.f32 %v1625_v60, %v7184_v14 }
 0x328   : > { %v1820_v51 = vpack.c.bf16 %v1802_v0, %v1801_v57  ;;  %v1803_v1 = vmax.f32 %v1673_v62, 0.0 }
 0x32a   : > { %1841 = vst.msk [vmem:[%s7196_s19 + $0x68] sm:$0xff] %vm7190_vm6, %v1820_v51 }
 0x32b   : > { %v1770_v50 = vpop.f32.mrf.mxu3 }
 0x32c   : > { %v1771_v30 = vadd.f32 %v1770_v50, %v1722_v63  ;;  %v1723_v5 = vpop.f32.mrf.mxu2 }
 0x32d   : > { %v1674_v4 = vpop.f32.mrf.mxu1  ;;  %v1724_v9 = vadd.f32 %v1723_v5, %v7186_v18 }
 0x32e   : > { %v1804_v49 = vmax.f32 %v1771_v30, 0.0  ;;  %v1675_v3 = vadd.f32 %v1674_v4, %v1626_v10 }
 0x330   : > { %v1821_v40 = vpack.c.bf16 %v1804_v49, %v1803_v1  ;;  %v1805_v2 = vmax.f32 %v1675_v3, 0.0 }
 0x332   : > { %1842 = vst.msk [vmem:[%s7196_s19 + $0x70] sm:$0xff] %vm7190_vm6, %v1821_v40 }
 0x333   : > { %v1772_v11 = vpop.f32.mrf.mxu3 }
 0x334   : > { %v1773_v16 = vadd.f32 %v1772_v11, %v1724_v9 }
 0x336   : > { %v1806_v8 = vmax.f32 %v1773_v16, 0.0 }
 0x338   : > { %v1822_v17 = vpack.c.bf16 %v1806_v8, %v1805_v2 }
 0x33a   : > { %1843 = vst.msk [vmem:[%s7196_s19 + $0x78] sm:$0xff] %vm7190_vm6, %v1822_v17 }
 0x33b PF: > { %p1844_p10 = scmp.eq.s32.totalorder %s6235_s10, 2  ;;  %p5200_p11 = scmp.ne.s32.totalorder %s6235_s10, 2 }
 0x33c   : > { %s7484_s25 = scalar_lea.vmem (!%p5200_p11), [#allocation2], %s6373_s21 }
 0x33d   : > { %1847 = sbr.rel (%p5200_p11) target bundleno = 1273 (0x4f9), region = 76 }
 0x342   : > { %v5323_v14 = vld [vmem:[#allocation3 + $0x70] sm:$0xf]  ;;  %v5722_v22 = vld [vmem:[#allocation3 + $0x74] sm:$0xf0]  ;;  %v5721_v18 = vld [vmem:[#allocation3 + $0x74] sm:$0xf] }
 0x343   : > { %v5387_v23 = vld [vmem:[#allocation3 + $0xf0] sm:$0xf]  ;;  %v5324_v53 = vor.u32 %v5722_v22, %v5323_v14  ;;  %v5738_v28 = vld [vmem:[#allocation3 + $0xf4] sm:$0xf0]  ;;  %v5325_v29 = vld [vmem:[#allocation3 + $0x78] sm:$0xf0] }
 0x344   : > { %v5388_v34 = vor.u32 %v5738_v28, %v5387_v23  ;;  %v5328_v35 = vor.u32 %v5721_v18, %v5325_v29  ;;  %v5737_v15 = vld [vmem:[#allocation3 + $0xf4] sm:$0xf]  ;;  %v5389_v20 = vld [vmem:[#allocation3 + $0xf8] sm:$0xf0]  ;;  %v5315_v21 = vld [vmem:[#allocation3 + $0x60] sm:$0xf] }
 0x345   : > { %2120 = vmatpush.bf16.msra.mxu0 %v5324_v53  ;;  %v5392_v32 = vor.u32 %v5737_v15, %v5389_v20  ;;  %v5720_v12 = vld [vmem:[#allocation3 + $0x64] sm:$0xf0]  ;;  %v5379_v24 = vld [vmem:[#allocation3 + $0xe0] sm:$0xf]  ;;  %v5719_v25 = vld [vmem:[#allocation3 + $0x64] sm:$0xf] }
 0x346   : > { %v5736_v36 = vld [vmem:[#allocation3 + $0xe4] sm:$0xf0]  ;;  %2169 = vmatpush.bf16.msra.mxu1 %v5388_v34  ;;  %2218 = vmatpush.bf16.msra.mxu2 %v5328_v35  ;;  %v5316_v19 = vor.u32 %v5720_v12, %v5315_v21  ;;  %v5317_v31 = vld [vmem:[#allocation3 + $0x68] sm:$0xf0]  ;;  %v5735_v42 = vld [vmem:[#allocation3 + $0xe4] sm:$0xf] }
 0x347   : > { %v5380_v41 = vor.u32 %v5736_v36, %v5379_v24  ;;  %2267 = vmatpush.bf16.msra.mxu3 %v5392_v32  ;;  %v5320_v43 = vor.u32 %v5719_v25, %v5317_v31  ;;  %v5381_v27 = vld [vmem:[#allocation3 + $0xe8] sm:$0xf0]  ;;  %v5307_v26 = vld [vmem:[#allocation3 + $0x50] sm:$0xf]  ;;  %v5718_v33 = vld [vmem:[#allocation3 + $0x54] sm:$0xf0] }
 0x348   : > { %v5384_v46 = vor.u32 %v5735_v42, %v5381_v27  ;;  %v5371_v47 = vld [vmem:[#allocation3 + $0xd0] sm:$0xf]  ;;  %v5734_v48 = vld [vmem:[#allocation3 + $0xd4] sm:$0xf0]  ;;  %v5717_v52 = vld [vmem:[#allocation3 + $0x54] sm:$0xf]  ;;  %v5308_v54 = vor.u32 %v5718_v33, %v5307_v26 }
 0x349   : > { %2121 = vmatpush.bf16.msra.mxu0 %v5316_v19  ;;  %v5309_v58 = vld [vmem:[#allocation3 + $0x58] sm:$0xf0]  ;;  %v5733_v59 = vld [vmem:[#allocation3 + $0xd4] sm:$0xf]  ;;  %v5372_v13 = vor.u32 %v5734_v48, %v5371_v47  ;;  %v5299_v44 = vld [vmem:[#allocation3 + $0x40] sm:$0xf] }
 0x34a   : > { %v5373_v39 = vld [vmem:[#allocation3 + $0xd8] sm:$0xf0]  ;;  %2170 = vmatpush.bf16.msra.mxu1 %v5380_v41  ;;  %2219 = vmatpush.bf16.msra.mxu2 %v5320_v43  ;;  %v5312_v38 = vor.u32 %v5717_v52, %v5309_v58  ;;  %v5716_v6 = vld [vmem:[#allocation3 + $0x44] sm:$0xf0]  ;;  %v5363_v61 = vld [vmem:[#allocation3 + $0xc0] sm:$0xf] }
 0x34b   : > { %2268 = vmatpush.bf16.msra.mxu3 %v5384_v46  ;;  %v5376_v45 = vor.u32 %v5733_v59, %v5373_v39  ;;  %v5732_v7 = vld [vmem:[#allocation3 + $0xc4] sm:$0xf0]  ;;  %v5715_v37 = vld [vmem:[#allocation3 + $0x44] sm:$0xf]  ;;  %v5301_v56 = vld [vmem:[#allocation3 + $0x48] sm:$0xf0]  ;;  %v5300_v55 = vor.u32 %v5716_v6, %v5299_v44 }
 0x34c   : > { %v5731_v57 = vld [vmem:[#allocation3 + $0xc4] sm:$0xf]  ;;  %v5365_v0 = vld [vmem:[#allocation3 + $0xc8] sm:$0xf0]  ;;  %v5364_v51 = vor.u32 %v5732_v7, %v5363_v61  ;;  %v5304_v62 = vor.u32 %v5715_v37, %v5301_v56  ;;  %v5291_v63 = vld [vmem:[#allocation3 + $0x30] sm:$0xf] }
 0x34d   : > { %2122 = vmatpush.bf16.msra.mxu0 %v5308_v54  ;;  %v5714_v50 = vld [vmem:[#allocation3 + $0x34] sm:$0xf0]  ;;  %v5355_v30 = vld [vmem:[#allocation3 + $0xb0] sm:$0xf]  ;;  %v5368_v60 = vor.u32 %v5731_v57, %v5365_v0  ;;  %v5713_v49 = vld [vmem:[#allocation3 + $0x34] sm:$0xf] }
 0x34e   : > { %2171 = vmatpush.bf16.msra.mxu1 %v5372_v13  ;;  %2220 = vmatpush.bf16.msra.mxu2 %v5312_v38  ;;  %v5730_v1 = vld [vmem:[#allocation3 + $0xb4] sm:$0xf0]  ;;  %v5293_v4 = vld [vmem:[#allocation3 + $0x38] sm:$0xf0]  ;;  %v5729_v5 = vld [vmem:[#allocation3 + $0xb4] sm:$0xf]  ;;  %v5292_v40 = vor.u32 %v5714_v50, %v5291_v63 }
 0x34f   : > { %2269 = vmatpush.bf16.msra.mxu3 %v5376_v45  ;;  %v5357_v10 = vld [vmem:[#allocation3 + $0xb8] sm:$0xf0]  ;;  %v5356_v3 = vor.u32 %v5730_v1, %v5355_v30  ;;  %v5296_v9 = vor.u32 %v5713_v49, %v5293_v4  ;;  %v5283_v11 = vld [vmem:[#allocation3 + $0x20] sm:$0xf]  ;;  %v5712_v16 = vld [vmem:[#allocation3 + $0x24] sm:$0xf0] }
 0x350   : > { %v5347_v2 = vld [vmem:[#allocation3 + $0xa0] sm:$0xf]  ;;  %v5360_v8 = vor.u32 %v5729_v5, %v5357_v10  ;;  %v5728_v17 = vld [vmem:[#allocation3 + $0xa4] sm:$0xf0]  ;;  %v5711_v14 = vld [vmem:[#allocation3 + $0x24] sm:$0xf]  ;;  %v5284_v28 = vor.u32 %v5712_v16, %v5283_v11 }
 0x351   : > { %2123 = vmatpush.bf16.msra.mxu0 %v5300_v55  ;;  %v5285_v22 = vld [vmem:[#allocation3 + $0x28] sm:$0xf0]  ;;  %v5727_v23 = vld [vmem:[#allocation3 + $0xa4] sm:$0xf]  ;;  %v5348_v18 = vor.u32 %v5728_v17, %v5347_v2  ;;  %v5275_v34 = vld [vmem:[#allocation3 + $0x10] sm:$0xf] }
 0x352   : > { %2172 = vmatpush.bf16.msra.mxu1 %v5364_v51  ;;  %2221 = vmatpush.bf16.msra.mxu2 %v5304_v62  ;;  %v5349_v53 = vld [vmem:[#allocation3 + $0xa8] sm:$0xf0]  ;;  %v5288_v29 = vor.u32 %v5711_v14, %v5285_v22  ;;  %v5710_v35 = vld [vmem:[#allocation3 + $0x14] sm:$0xf0]  ;;  %v5339_v15 = vld [vmem:[#allocation3 + $0x90] sm:$0xf] }
 0x353   : > { %2270 = vmatpush.bf16.msra.mxu3 %v5368_v60  ;;  %v5352_v20 = vor.u32 %v5727_v23, %v5349_v53  ;;  %v5726_v21 = vld [vmem:[#allocation3 + $0x94] sm:$0xf0]  ;;  %v5709_v32 = vld [vmem:[#allocation3 + $0x14] sm:$0xf]  ;;  %v5277_v12 = vld [vmem:[#allocation3 + $0x18] sm:$0xf0]  ;;  %v5276_v19 = vor.u32 %v5710_v35, %v5275_v34 }
 0x354   : > { %v5725_v24 = vld [vmem:[#allocation3 + $0x94] sm:$0xf]  ;;  %v5341_v36 = vld [vmem:[#allocation3 + $0x98] sm:$0xf0]  ;;  %v5267_v41 = vld [vmem:[#allocation3] sm:$0xf]  ;;  %v5340_v25 = vor.u32 %v5726_v21, %v5339_v15  ;;  %v5280_v31 = vor.u32 %v5709_v32, %v5277_v12 }
 0x355   : > { %2124 = vmatpush.bf16.msra.mxu0 %v5292_v40  ;;  %v5708_v42 = vld [vmem:[#allocation3 + $0x4] sm:$0xf0]  ;;  %v5331_v43 = vld [vmem:[#allocation3 + $0x80] sm:$0xf]  ;;  %v5344_v26 = vor.u32 %v5725_v24, %v5341_v36  ;;  %v5707_v33 = vld [vmem:[#allocation3 + $0x4] sm:$0xf] }
 0x356   : > { %2173 = vmatpush.bf16.msra.mxu1 %v5356_v3  ;;  %2222 = vmatpush.bf16.msra.mxu2 %v5296_v9  ;;  %v5724_v27 = vld [vmem:[#allocation3 + $0x84] sm:$0xf0]  ;;  %v5269_v46 = vld [vmem:[#allocation3 + $0x8] sm:$0xf0]  ;;  %v5723_v47 = vld [vmem:[#allocation3 + $0x84] sm:$0xf]  ;;  %v5268_v58 = vor.u32 %v5708_v42, %v5267_v41 }
 0x357   : > { %2271 = vmatpush.bf16.msra.mxu3 %v5360_v8  ;;  %v5333_v48 = vld [vmem:[#allocation3 + $0x88] sm:$0xf0]  ;;  %v5753_v52 = vld [vmem:[%s9091_s3 + $0x134] sm:$0xf]  ;;  %v5478_v54 = vld [vmem:[%s9091_s3 + $0x138] sm:$0xf0]  ;;  %v5332_v13 = vor.u32 %v5724_v27, %v5331_v43  ;;  %v5272_v38 = vor.u32 %v5707_v33, %v5269_v46 }
 0x358   : > { %v5761_v59 = vld [vmem:[%s9091_s3 + $0x174] sm:$0xf]  ;;  %v5510_v39 = vld [vmem:[%s9091_s3 + $0x178] sm:$0xf0]  ;;  %v5336_v44 = vor.u32 %v5723_v47, %v5333_v48  ;;  %v5481_v6 = vor.u32 %v5753_v52, %v5478_v54  ;;  %v5476_v61 = vld [vmem:[%s9091_s3 + $0x130] sm:$0xf] }
 0x359   : > { %2125 = vmatpush.bf16.msra.mxu0 %v5284_v28  ;;  %v5754_v45 = vld [vmem:[%s9091_s3 + $0x134] sm:$0xf0]  ;;  %v5508_v7 = vld [vmem:[%s9091_s3 + $0x170] sm:$0xf]  ;;  %v9231_v56 = vld [vmem:[#allocation16_spill] sm:$0xff]  ;;  %v5513_v0 = vor.u32 %v5761_v59, %v5510_v39  ;;  %vm2484_vm7 = vcmask 523264  }
 0x35a   : > { %2174 = vmatpush.bf16.msra.mxu1 %v5348_v18  ;;  %2223 = vmatpush.bf16.msra.mxu2 %v5288_v29  ;;  %v9230_v37 = vld [vmem:[#allocation14_spill] sm:$0xff]  ;;  %v5762_v55 = vld [vmem:[%s9091_s3 + $0x174] sm:$0xf0]  ;;  %v5751_v51 = vld [vmem:[%s9091_s3 + $0x124] sm:$0xf]  ;;  %v5477_v60 = vor.u32 %v5754_v45, %v5476_v61  ;;  %vm2755_vm8 = vcmask 1043456  }
 0x35b   : > { %2272 = vmatpush.bf16.msra.mxu3 %v5352_v20  ;;  %v5204_v57 = vor.u32 %v9231_v56, %v9230_v37  ;;  %v5470_v62 = vld [vmem:[%s9091_s3 + $0x128] sm:$0xf0]  ;;  %v9232_v63 = vld [vmem:[#allocation15_spill] sm:$0xff]  ;;  %v9233_v50 = vld [vmem:[#allocation13_spill] sm:$0xff]  ;;  %v5509_v1 = vor.u32 %v5762_v55, %v5508_v7  ;;  %vm2756_vm9 = vcmask 523268  }
 0x35c   : > { %v5208_v30 = vor.u32 %v9233_v50, %v9232_v63  ;;  %v5473_v49 = vor.u32 %v5751_v51, %v5470_v62  ;;  %v5468_v4 = vld [vmem:[%s9091_s3 + $0x120] sm:$0xf]  ;;  %v5752_v5 = vld [vmem:[%s9091_s3 + $0x124] sm:$0xf0]  ;;  %v5749_v10 = vld [vmem:[%s9091_s3 + $0x114] sm:$0xf] }
 0x35d   : > { %2126 = vmatpush.bf16.msra.mxu0 %v5276_v19  ;;  %v5469_v40 = vor.u32 %v5752_v5, %v5468_v4  ;;  %v5462_v3 = vld [vmem:[%s9091_s3 + $0x118] sm:$0xf0]  ;;  %v9234_v11 = vld [vmem:[#allocation18_spill] sm:$0xff]  ;;  %v9236_v8 = vld [vmem:[#allocation19_spill] sm:$0xff] }
 0x35e   : > { %2175 = vmatpush.bf16.msra.mxu1 %v5340_v25  ;;  %2224 = vmatpush.bf16.msra.mxu2 %v5280_v31  ;;  %v5465_v9 = vor.u32 %v5749_v10, %v5462_v3  ;;  %v9235_v16 = vld [vmem:[#allocation20_spill] sm:$0xff]  ;;  %v9237_v17 = vld [vmem:[#allocation17_spill] sm:$0xff]  ;;  %v5502_v23 = vld [vmem:[%s9091_s3 + $0x168] sm:$0xf0] }
 0x35f   : > { %2273 = vmatpush.bf16.msra.mxu3 %v5344_v26  ;;  %v5212_v2 = vor.u32 %v9235_v16, %v9234_v11  ;;  %v5216_v14 = vor.u32 %v9237_v17, %v9236_v8  ;;  %v5759_v22 = vld [vmem:[%s9091_s3 + $0x164] sm:$0xf]  ;;  %v5460_v53 = vld [vmem:[%s9091_s3 + $0x110] sm:$0xf]  ;;  %v5750_v18 = vld [vmem:[%s9091_s3 + $0x114] sm:$0xf0] }
 0x360   : > { %v5505_v28 = vor.u32 %v5759_v22, %v5502_v23  ;;  %v5500_v29 = vld [vmem:[%s9091_s3 + $0x160] sm:$0xf]  ;;  %v5760_v34 = vld [vmem:[%s9091_s3 + $0x164] sm:$0xf0]  ;;  %v5461_v35 = vor.u32 %v5750_v18, %v5460_v53  ;;  %v5747_v20 = vld [vmem:[%s9091_s3 + $0x104] sm:$0xf] }
 0x361   : > { %2127 = vmatpush.bf16.msra.mxu0 %v5268_v58  ;;  %v5501_v15 = vor.u32 %v5760_v34, %v5500_v29  ;;  %v5454_v21 = vld [vmem:[%s9091_s3 + $0x108] sm:$0xf0]  ;;  %v9239_v24 = vld [vmem:[#allocation24_spill] sm:$0xff]  ;;  %v9240_v19 = vld [vmem:[#allocation23_spill] sm:$0xff] }
 0x362   : > { %2176 = vmatpush.bf16.msra.mxu1 %v5332_v13  ;;  %2225 = vmatpush.bf16.msra.mxu2 %v5272_v38  ;;  %v5457_v32 = vor.u32 %v5747_v20, %v5454_v21  ;;  %v9238_v12 = vld [vmem:[#allocation22_spill] sm:$0xff]  ;;  %v9241_v41 = vld [vmem:[#allocation21_spill] sm:$0xff]  ;;  %v5452_v31 = vld [vmem:[%s9091_s3 + $0x100] sm:$0xf] }
 0x363   : > { %2274 = vmatpush.bf16.msra.mxu3 %v5336_v44  ;;  %v5220_v36 = vor.u32 %v9239_v24, %v9238_v12  ;;  %v5224_v25 = vor.u32 %v9241_v41, %v9240_v19  ;;  %v5748_v42 = vld [vmem:[%s9091_s3 + $0x104] sm:$0xf0]  ;;  %v5745_v43 = vld [vmem:[%s9091_s3 + $0xf4] sm:$0xf]  ;;  %v5446_v26 = vld [vmem:[%s9091_s3 + $0xf8] sm:$0xf0] }
 0x364   : > { %2128 = vmatmul.bf16.vlgmr.msra.gmra.mxu0 %v5204_v57  ;;  %v5453_v27 = vor.u32 %v5748_v42, %v5452_v31  ;;  %v5449_v33 = vor.u32 %v5745_v43, %v5446_v26  ;;  %v9242_v46 = vld [vmem:[#allocation26_spill] sm:$0xff]  ;;  %v9243_v47 = vld [vmem:[#allocation29_spill] sm:$0xff]  ;;  %v9244_v52 = vld [vmem:[#allocation28_spill] sm:$0xff] }
 0x365   : > { %2177 = vmatmul.bf16.vlgmr.msra.gmra.mxu1 %v5208_v30  ;;  %2226 = vmatmul.bf16.vlgmr.msra.gmra.mxu2 %v5204_v57  ;;  %v5228_v48 = vor.u32 %v9243_v47, %v9242_v46  ;;  %v9245_v54 = vld [vmem:[#allocation25_spill] sm:$0xff]  ;;  %v5757_v59 = vld [vmem:[%s9091_s3 + $0x154] sm:$0xf]  ;;  %v5494_v39 = vld [vmem:[%s9091_s3 + $0x158] sm:$0xf0] }
 0x366   : > { %2607 = vmatpush.bf16.msrb.mxu2 %v5481_v6  ;;  %2275 = vmatmul.bf16.vlgmr.msra.gmra.mxu3 %v5208_v30  ;;  %v5232_v58 = vor.u32 %v9245_v54, %v9244_v52  ;;  %v5444_v13 = vld [vmem:[%s9091_s3 + $0xf0] sm:$0xf]  ;;  %v5497_v38 = vor.u32 %v5757_v59, %v5494_v39  ;;  %v5746_v44 = vld [vmem:[%s9091_s3 + $0xf4] sm:$0xf0]  ;;  %v5743_v37 = vld [vmem:[%s9091_s3 + $0xe4] sm:$0xf] }
 0x367   : > { %2660 = vmatpush.bf16.msrb.mxu3 %v5513_v0  ;;  %2509 = vmatpush.bf16.msrb.mxu0 %v5477_v60  ;;  %v5492_v6 = vld [vmem:[%s9091_s3 + $0x150] sm:$0xf]  ;;  %v5758_v61 = vld [vmem:[%s9091_s3 + $0x154] sm:$0xf0]  ;;  %v5445_v45 = vor.u32 %v5746_v44, %v5444_v13  ;;  %v5438_v56 = vld [vmem:[%s9091_s3 + $0xe8] sm:$0xf0] }
 0x368   : > { %2562 = vmatpush.bf16.msrb.mxu1 %v5509_v1  ;;  %v5493_v7 = vor.u32 %v5758_v61, %v5492_v6  ;;  %v5441_v57 = vor.u32 %v5743_v37, %v5438_v56  ;;  %v9246_v0 = vld [vmem:[#allocation33_spill] sm:$0xff]  ;;  %v9248_v62 = vld [vmem:[#allocation36_spill] sm:$0xff]  ;;  %v5741_v1 = vld [vmem:[%s9091_s3 + $0xd4] sm:$0xf] }
 0x369   : > { %v9247_v55 = vld [vmem:[#allocation37_spill] sm:$0xff]  ;;  %v9249_v63 = vld [vmem:[#allocation32_spill] sm:$0xff]  ;;  %v5486_v8 = vld [vmem:[%s9091_s3 + $0x148] sm:$0xf0] }
 0x36a   : > { %2608 = vmatpush.bf16.msrb.mxu2 %v5473_v49  ;;  %v5236_v51 = vor.u32 %v9247_v55, %v9246_v0  ;;  %v5240_v50 = vor.u32 %v9249_v63, %v9248_v62  ;;  %v5436_v30 = vld [vmem:[%s9091_s3 + $0xe0] sm:$0xf]  ;;  %v5744_v60 = vld [vmem:[%s9091_s3 + $0xe4] sm:$0xf0]  ;;  %v5430_v4 = vld [vmem:[%s9091_s3 + $0xd8] sm:$0xf0] }
 0x36b   : > { %2510 = vmatpush.bf16.msrb.mxu0 %v5469_v40  ;;  %2661 = vmatpush.bf16.msrb.mxu3 %v5505_v28  ;;  %v5437_v49 = vor.u32 %v5744_v60, %v5436_v30  ;;  %v5433_v5 = vor.u32 %v5741_v1, %v5430_v4  ;;  %v9250_v10 = vld [vmem:[#allocation41_spill] sm:$0xff]  ;;  %v9253_v11 = vld [vmem:[#allocation40_spill] sm:$0xff]  ;;  %v5428_v17 = vld [vmem:[%s9091_s3 + $0xd0] sm:$0xf] }
 0x36c   : > { %2563 = vmatpush.bf16.msrb.mxu1 %v5501_v15  ;;  %v9251_v40 = vld [vmem:[#allocation45_spill] sm:$0xff]  ;;  %v5742_v22 = vld [vmem:[%s9091_s3 + $0xd4] sm:$0xf0]  ;;  %v5484_v23 = vld [vmem:[%s9091_s3 + $0x140] sm:$0xf] }
 0x36d   : > { %v5244_v3 = vor.u32 %v9251_v40, %v9250_v10  ;;  %v5756_v53 = vld [vmem:[%s9091_s3 + $0x144] sm:$0xf0]  ;;  %v5429_v28 = vor.u32 %v5742_v22, %v5428_v17  ;;  %v9256_v15 = vld [vmem:[#allocation52_spill] sm:$0xff]  ;;  %v5422_v12 = vld [vmem:[%s9091_s3 + $0xc8] sm:$0xf0] }
 0x36e   : > { %2609 = vmatpush.bf16.msrb.mxu2 %v5465_v9  ;;  %v9252_v9 = vld [vmem:[#allocation44_spill] sm:$0xff]  ;;  %v5485_v18 = vor.u32 %v5756_v53, %v5484_v23  ;;  %v9254_v29 = vld [vmem:[#allocation49_spill] sm:$0xff]  ;;  %vm7478_vm10 = vmor %vm2756_vm9, %vm2755_vm8 }
 0x36f   : > { %2511 = vmatpush.bf16.msrb.mxu0 %v5461_v35  ;;  %2662 = vmatpush.bf16.msrb.mxu3 %v5497_v38  ;;  %v5248_v16 = vor.u32 %v9253_v11, %v9252_v9  ;;  %v9255_v34 = vld [vmem:[#allocation53_spill] sm:$0xff]  ;;  %v9257_v20 = vld [vmem:[#allocation48_spill] sm:$0xff] }
 0x370   : > { %2564 = vmatpush.bf16.msrb.mxu1 %v5493_v7  ;;  %v5252_v35 = vor.u32 %v9255_v34, %v9254_v29  ;;  %v5256_v21 = vor.u32 %v9257_v20, %v9256_v15  ;;  %v5740_v19 = vld [vmem:[%s9091_s3 + $0xc4] sm:$0xf0]  ;;  %v9260_v43 = vld [vmem:[#allocation60_spill] sm:$0xff] }
 0x371   : > { %v9259_v31 = vld [vmem:[#allocation61_spill] sm:$0xff] }
 0x372   : > { %2610 = vmatpush.bf16.msrb.mxu2 %v5457_v32  ;;  %v5739_v32 = vld [vmem:[%s9091_s3 + $0xc4] sm:$0xf] }
 0x373   : > { %2512 = vmatpush.bf16.msrb.mxu0 %v5453_v27  ;;  %v5425_v24 = vor.u32 %v5739_v32, %v5422_v12  ;;  %v9261_v27 = vld [vmem:[#allocation56_spill] sm:$0xff] }
 0x374   : > { %2133 = vmatmul.bf16.gmra.mxu0 %v5212_v2  ;;  %2565 = vmatpush.bf16.msrb.mxu1 %v5485_v18  ;;  %v5264_v26 = vor.u32 %v9261_v27, %v9260_v43 }
 0x375   : > { %2182 = vmatmul.bf16.gmra.mxu1 %v5216_v14  ;;  %2231 = vmatmul.bf16.gmra.mxu2 %v5212_v2  ;;  %v5755_v2 = vld [vmem:[%s9091_s3 + $0x144] sm:$0xf] }
 0x376   : > { %2280 = vmatmul.bf16.gmra.mxu3 %v5216_v14  ;;  %2611 = vmatpush.bf16.msrb.mxu2 %v5449_v33  ;;  %v5489_v14 = vor.u32 %v5755_v2, %v5486_v8 }
 0x377   : > { %2513 = vmatpush.bf16.msrb.mxu0 %v5445_v45 }
 0x378   : > { %2663 = vmatpush.bf16.msrb.mxu3 %v5489_v14 }
 0x37a   : > { %2612 = vmatpush.bf16.msrb.mxu2 %v5441_v57 }
 0x37b   : > { %2514 = vmatpush.bf16.msrb.mxu0 %v5437_v49 }
 0x37e   : > { %2613 = vmatpush.bf16.msrb.mxu2 %v5433_v5 }
 0x37f   : > { %2515 = vmatpush.bf16.msrb.mxu0 %v5429_v28 }
 0x382   : > { %2614 = vmatpush.bf16.msrb.mxu2 %v5425_v24 }
 0x384   : > { %2138 = vmatmul.bf16.gmra.mxu0 %v5220_v36 }
 0x385   : > { %2187 = vmatmul.bf16.gmra.mxu1 %v5224_v25  ;;  %2236 = vmatmul.bf16.gmra.mxu2 %v5220_v36  ;;  %v5420_v36 = vld [vmem:[%s9091_s3 + $0xc0] sm:$0xf] }
 0x386   : > { %2285 = vmatmul.bf16.gmra.mxu3 %v5224_v25  ;;  %v5421_v41 = vor.u32 %v5740_v19, %v5420_v36  ;;  %v9258_v25 = vld [vmem:[#allocation57_spill] sm:$0xff] }
 0x387   : > { %v5260_v42 = vor.u32 %v9259_v31, %v9258_v25 }
 0x388   : > { %2516 = vmatpush.bf16.msrb.mxu0 %v5421_v41 }
 0x394   : > { %2143 = vmatmul.bf16.gmra.mxu0 %v5228_v48 }
 0x395   : > { %2192 = vmatmul.bf16.gmra.mxu1 %v5232_v58  ;;  %2241 = vmatmul.bf16.gmra.mxu2 %v5228_v48 }
 0x396   : > { %2290 = vmatmul.bf16.gmra.mxu3 %v5232_v58 }
 0x3a4   : > { %2148 = vmatmul.bf16.gmra.mxu0 %v5236_v51 }
 0x3a5   : > { %2197 = vmatmul.bf16.gmra.mxu1 %v5240_v50  ;;  %2246 = vmatmul.bf16.gmra.mxu2 %v5236_v51 }
 0x3a6   : > { %2295 = vmatmul.bf16.gmra.mxu3 %v5240_v50 }
 0x3b4   : > { %2153 = vmatmul.bf16.gmra.mxu0 %v5244_v3 }
 0x3b5   : > { %2202 = vmatmul.bf16.gmra.mxu1 %v5248_v16  ;;  %2251 = vmatmul.bf16.gmra.mxu2 %v5244_v3 }
 0x3b6   : > { %2300 = vmatmul.bf16.gmra.mxu3 %v5248_v16 }
 0x3c4   : > { %2158 = vmatmul.bf16.gmra.mxu0 %v5252_v35 }
 0x3c5   : > { %2207 = vmatmul.bf16.gmra.mxu1 %v5256_v21  ;;  %2256 = vmatmul.bf16.gmra.mxu2 %v5252_v35 }
 0x3c6   : > { %2305 = vmatmul.bf16.gmra.mxu3 %v5256_v21 }
 0x3d4   : > { %2163 = vmatmul.bf16.gmra.mxu0 %v5260_v42 }
 0x3d5   : > { %2212 = vmatmul.bf16.gmra.mxu1 %v5264_v26  ;;  %2261 = vmatmul.bf16.gmra.mxu2 %v5260_v42 }
 0x3d6   : > { %2310 = vmatmul.bf16.gmra.mxu3 %v5264_v26 }
 0x3e1   : > { %v2129_v33 = vpop.f32.mrf.mxu0 }
 0x3e2   : > { %v2178_v46 = vpop.f32.mrf.mxu1 }
 0x3e3   : > { %v2179_v58 = vadd.f32 %v2178_v46, %v2129_v33 }
 0x3e8   : > { %v2227_v47 = vpop.f32.mrf.mxu2 }
 0x3e9   : > { %v2276_v48 = vpop.f32.mrf.mxu3  ;;  %v2131_v52 = vpop.f32.mrf.mxu0 }
 0x3ea   : > { %v2180_v54 = vpop.f32.mrf.mxu1  ;;  %v2277_v6 = vadd.f32 %v2276_v48, %v2227_v47 }
 0x3eb   : > { %v2181_v59 = vadd.f32 %v2180_v54, %v2131_v52 }
 0x3ed   : > { %v2316_v39 = vpack.c.bf16 %v2181_v59, %v2179_v58 }
 0x3ef   : > { %2517 = vmatmul.bf16.vlgmr.msrb.gmra.mxu0 %v2316_v39  ;;  %2615 = vmatmul.bf16.vlgmr.msrb.gmra.mxu2 %v2316_v39 }
 0x3f0   : > { %v2229_v13 = vpop.f32.mrf.mxu2 }
 0x3f1   : > { %v2278_v38 = vpop.f32.mrf.mxu3  ;;  %v2134_v44 = vpop.f32.mrf.mxu0 }
 0x3f2   : > { %v2279_v61 = vadd.f32 %v2278_v38, %v2229_v13  ;;  %v2183_v45 = vpop.f32.mrf.mxu1 }
 0x3f3   : > { %v2184_v55 = vadd.f32 %v2183_v45, %v2134_v44 }
 0x3f4   : > { %v2317_v7 = vpack.c.bf16 %v2279_v61, %v2277_v6 }
 0x3f6   : > { %5514 = vmatmul.msk.bf16.vlgmr.msrb.gmra.mxu1 %vm2484_vm7, %v2317_v7  ;;  %5522 = vmatmul.msk.bf16.vlgmr.msrb.gmra.mxu3 %vm2484_vm7, %v2317_v7 }
 0x3f8   : > { %v2232_v37 = vpop.f32.mrf.mxu2 }
 0x3f9   : > { %v2281_v56 = vpop.f32.mrf.mxu3  ;;  %v2136_v57 = vpop.f32.mrf.mxu0 }
 0x3fa   : > { %v2185_v0 = vpop.f32.mrf.mxu1  ;;  %v2282_v60 = vadd.f32 %v2281_v56, %v2232_v37 }
 0x3fb   : > { %v2186_v51 = vadd.f32 %v2185_v0, %v2136_v57 }
 0x3fd   : > { %v2318_v62 = vpack.c.bf16 %v2186_v51, %v2184_v55 }
 0x3ff   : > { %2522 = vmatmul.bf16.gmra.mxu0 %v2318_v62  ;;  %2620 = vmatmul.bf16.gmra.mxu2 %v2318_v62 }
 0x400   : > { %v2234_v63 = vpop.f32.mrf.mxu2 }
 0x401   : > { %v2283_v50 = vpop.f32.mrf.mxu3  ;;  %v2139_v30 = vpop.f32.mrf.mxu0 }
 0x402   : > { %v2284_v1 = vadd.f32 %v2283_v50, %v2234_v63  ;;  %v2188_v49 = vpop.f32.mrf.mxu1 }
 0x403   : > { %v2189_v9 = vadd.f32 %v2188_v49, %v2139_v30 }
 0x404   : > { %v2319_v4 = vpack.c.bf16 %v2284_v1, %v2282_v60 }
 0x406   : > { %5515 = vmatmul.msk.bf16.gmra.mxu1 %vm2484_vm7, %v2319_v4  ;;  %5523 = vmatmul.msk.bf16.gmra.mxu3 %vm2484_vm7, %v2319_v4 }
 0x408   : > { %v2237_v5 = vpop.f32.mrf.mxu2 }
 0x409   : > { %v2286_v10 = vpop.f32.mrf.mxu3  ;;  %v2141_v40 = vpop.f32.mrf.mxu0 }
 0x40a   : > { %v2190_v3 = vpop.f32.mrf.mxu1  ;;  %v2287_v14 = vadd.f32 %v2286_v10, %v2237_v5 }
 0x40b   : > { %v2191_v11 = vadd.f32 %v2190_v3, %v2141_v40 }
 0x40d   : > { %v2320_v16 = vpack.c.bf16 %v2191_v11, %v2189_v9 }
 0x40f   : > { %2527 = vmatmul.bf16.gmra.mxu0 %v2320_v16  ;;  %2625 = vmatmul.bf16.gmra.mxu2 %v2320_v16 }
 0x410   : > { %v2239_v2 = vpop.f32.mrf.mxu2 }
 0x411   : > { %v2288_v8 = vpop.f32.mrf.mxu3  ;;  %v2144_v17 = vpop.f32.mrf.mxu0 }
 0x412   : > { %v2289_v22 = vadd.f32 %v2288_v8, %v2239_v2  ;;  %v2193_v23 = vpop.f32.mrf.mxu1 }
 0x413   : > { %v2194_v35 = vadd.f32 %v2193_v23, %v2144_v17 }
 0x414   : > { %v2321_v53 = vpack.c.bf16 %v2289_v22, %v2287_v14 }
 0x416   : > { %5516 = vmatmul.msk.bf16.gmra.mxu1 %vm2484_vm7, %v2321_v53  ;;  %5524 = vmatmul.msk.bf16.gmra.mxu3 %vm2484_vm7, %v2321_v53 }
 0x418   : > { %v2242_v28 = vpop.f32.mrf.mxu2 }
 0x419   : > { %v2291_v18 = vpop.f32.mrf.mxu3  ;;  %v2146_v29 = vpop.f32.mrf.mxu0 }
 0x41a   : > { %v2195_v34 = vpop.f32.mrf.mxu1  ;;  %v2292_v24 = vadd.f32 %v2291_v18, %v2242_v28 }
 0x41b   : > { %v2196_v15 = vadd.f32 %v2195_v34, %v2146_v29 }
 0x41d   : > { %v2322_v20 = vpack.c.bf16 %v2196_v15, %v2194_v35  ;;  %v5417_v15 = vld [vmem:[%s9092_s4 + $0x4] sm:$0x3] }
 0x41f   : > { %2532 = vmatmul.bf16.gmra.mxu0 %v2322_v20  ;;  %2630 = vmatmul.bf16.gmra.mxu2 %v2322_v20  ;;  %v7472_v20 = vperm.slane %v5417_v15, 0 }
 0x420   : > { %v2244_v21 = vpop.f32.mrf.mxu2 }
 0x421   : > { %v2293_v32 = vpop.f32.mrf.mxu3  ;;  %v2149_v12 = vpop.f32.mrf.mxu0 }
 0x422   : > { %v2294_v36 = vadd.f32 %v2293_v32, %v2244_v21  ;;  %v2198_v19 = vpop.f32.mrf.mxu1 }
 0x423   : > { %v2199_v27 = vadd.f32 %v2198_v19, %v2149_v12  ;;  %v7474_v12 = vperm.slane %v5417_v15, 1 }
 0x424   : > { %v2323_v41 = vpack.c.bf16 %v2294_v36, %v2292_v24 }
 0x426   : > { %5517 = vmatmul.msk.bf16.gmra.mxu1 %vm2484_vm7, %v2323_v41  ;;  %5525 = vmatmul.msk.bf16.gmra.mxu3 %vm2484_vm7, %v2323_v41 }
 0x428   : > { %v2247_v25 = vpop.f32.mrf.mxu2 }
 0x429   : > { %v2296_v31 = vpop.f32.mrf.mxu3  ;;  %v2151_v42 = vpop.f32.mrf.mxu0 }
 0x42a   : > { %v2200_v43 = vpop.f32.mrf.mxu1  ;;  %v2297_v52 = vadd.f32 %v2296_v31, %v2247_v25 }
 0x42b   : > { %v2201_v26 = vadd.f32 %v2200_v43, %v2151_v42 }
 0x42d   : > { %v2324_v33 = vpack.c.bf16 %v2201_v26, %v2199_v27 }
 0x42f   : > { %2537 = vmatmul.bf16.gmra.mxu0 %v2324_v33  ;;  %2635 = vmatmul.bf16.gmra.mxu2 %v2324_v33 }
 0x430   : > { %v2249_v46 = vpop.f32.mrf.mxu2 }
 0x431   : > { %v2298_v47 = vpop.f32.mrf.mxu3  ;;  %v2154_v48 = vpop.f32.mrf.mxu0 }
 0x432   : > { %v2299_v54 = vadd.f32 %v2298_v47, %v2249_v46  ;;  %v2203_v58 = vpop.f32.mrf.mxu1 }
 0x433   : > { %v2204_v6 = vadd.f32 %v2203_v58, %v2154_v48 }
 0x434   : > { %v2325_v59 = vpack.c.bf16 %v2299_v54, %v2297_v52 }
 0x436   : > { %5518 = vmatmul.msk.bf16.gmra.mxu1 %vm2484_vm7, %v2325_v59  ;;  %5526 = vmatmul.msk.bf16.gmra.mxu3 %vm2484_vm7, %v2325_v59 }
 0x438   : > { %v2252_v39 = vpop.f32.mrf.mxu2 }
 0x439   : > { %v2301_v13 = vpop.f32.mrf.mxu3  ;;  %v2156_v38 = vpop.f32.mrf.mxu0 }
 0x43a   : > { %v2205_v44 = vpop.f32.mrf.mxu1  ;;  %v2302_v57 = vadd.f32 %v2301_v13, %v2252_v39 }
 0x43b   : > { %v2206_v61 = vadd.f32 %v2205_v44, %v2156_v38 }
 0x43d   : > { %v2326_v45 = vpack.c.bf16 %v2206_v61, %v2204_v6 }
 0x43f   : > { %2542 = vmatmul.bf16.gmra.mxu0 %v2326_v45  ;;  %2640 = vmatmul.bf16.gmra.mxu2 %v2326_v45 }
 0x440   : > { %v2254_v7 = vpop.f32.mrf.mxu2 }
 0x441   : > { %v2303_v37 = vpop.f32.mrf.mxu3  ;;  %v2159_v56 = vpop.f32.mrf.mxu0 }
 0x442   : > { %v2304_v0 = vadd.f32 %v2303_v37, %v2254_v7  ;;  %v2208_v55 = vpop.f32.mrf.mxu1 }
 0x443   : > { %v2209_v60 = vadd.f32 %v2208_v55, %v2159_v56 }
 0x444   : > { %v2327_v51 = vpack.c.bf16 %v2304_v0, %v2302_v57 }
 0x446   : > { %5519 = vmatmul.msk.bf16.gmra.mxu1 %vm2484_vm7, %v2327_v51  ;;  %5527 = vmatmul.msk.bf16.gmra.mxu3 %vm2484_vm7, %v2327_v51 }
 0x448   : > { %v2257_v62 = vpop.f32.mrf.mxu2 }
 0x449   : > { %v2306_v63 = vpop.f32.mrf.mxu3  ;;  %v2161_v50 = vpop.f32.mrf.mxu0 }
 0x44a   : > { %v2210_v30 = vpop.f32.mrf.mxu1  ;;  %v2307_v40 = vadd.f32 %v2306_v63, %v2257_v62 }
 0x44b   : > { %v2211_v1 = vadd.f32 %v2210_v30, %v2161_v50 }
 0x44d   : > { %v2328_v49 = vpack.c.bf16 %v2211_v1, %v2209_v60 }
 0x44f   : > { %2547 = vmatmul.bf16.gmra.mxu0 %v2328_v49  ;;  %2645 = vmatmul.bf16.gmra.mxu2 %v2328_v49 }
 0x450   : > { %v2259_v4 = vpop.f32.mrf.mxu2 }
 0x451   : > { %v2308_v5 = vpop.f32.mrf.mxu3  ;;  %v2164_v10 = vpop.f32.mrf.mxu0 }
 0x452   : > { %v2309_v3 = vadd.f32 %v2308_v5, %v2259_v4  ;;  %v2213_v9 = vpop.f32.mrf.mxu1 }
 0x453   : > { %v2214_v14 = vadd.f32 %v2213_v9, %v2164_v10 }
 0x454   : > { %v2329_v11 = vpack.c.bf16 %v2309_v3, %v2307_v40 }
 0x456   : > { %5520 = vmatmul.msk.bf16.gmra.mxu1 %vm2484_vm7, %v2329_v11  ;;  %5528 = vmatmul.msk.bf16.gmra.mxu3 %vm2484_vm7, %v2329_v11 }
 0x458   : > { %v2262_v16 = vpop.f32.mrf.mxu2 }
 0x459   : > { %v2311_v2 = vpop.f32.mrf.mxu3  ;;  %v2166_v8 = vpop.f32.mrf.mxu0 }
 0x45a   : > { %v2215_v17 = vpop.f32.mrf.mxu1  ;;  %v2312_v18 = vadd.f32 %v2311_v2, %v2262_v16 }
 0x45b   : > { %v2216_v22 = vadd.f32 %v2215_v17, %v2166_v8 }
 0x45d   : > { %v2330_v23 = vpack.c.bf16 %v2216_v22, %v2214_v14 }
 0x45f   : > { %2552 = vmatmul.bf16.gmra.mxu0 %v2330_v23  ;;  %2650 = vmatmul.bf16.gmra.mxu2 %v2330_v23 }
 0x460   : > { %v2264_v53 = vpop.f32.mrf.mxu2 }
 0x461   : > { %v2313_v28 = vpop.f32.mrf.mxu3 }
 0x462   : > { %v2314_v29 = vadd.f32 %v2313_v28, %v2264_v53 }
 0x464   : > { %v2331_v34 = vpack.c.bf16 %v2314_v29, %v2312_v18 }
 0x466   : > { %5521 = vmatmul.msk.bf16.gmra.mxu1 %vm2484_vm7, %v2331_v34  ;;  %5529 = vmatmul.msk.bf16.gmra.mxu3 %vm2484_vm7, %v2331_v34 }
 0x46c   : > { %v2518_v35 = vpop.f32.mrf.mxu0 }
 0x46d   : > { %v2519_v36 = vadd.f32 %v2518_v35, %v7472_v20 }
 0x472   : > { %v2616_v21 = vpop.f32.mrf.mxu2 }
 0x473   : > { %v2567_v32 = vpop.f32.mrf.mxu1  ;;  %v2617_v41 = vadd.f32 %v2616_v21, %v7474_v12 }
 0x474   : > { %v2520_v24 = vpop.f32.mrf.mxu0  ;;  %v2568_v19 = vadd.f32 %v2567_v32, %v2519_v36 }
 0x475   : > { %v2521_v47 = vadd.f32 %v2520_v24, %v7472_v20 }
 0x476   : > { %v2705_v27 = vmax.f32 %v2568_v19, 0.0 }
 0x479   : > { %v2665_v25 = vpop.f32.mrf.mxu3 }
 0x47a   : > { %v2666_v31 = vadd.f32 %v2665_v25, %v2617_v41  ;;  %v2618_v42 = vpop.f32.mrf.mxu2 }
 0x47b   : > { %v2569_v43 = vpop.f32.mrf.mxu1  ;;  %v2619_v54 = vadd.f32 %v2618_v42, %v7474_v12 }
 0x47c   : > { %v2706_v26 = vmax.f32 %v2666_v31, 0.0  ;;  %v2523_v33 = vpop.f32.mrf.mxu0  ;;  %v2570_v52 = vadd.f32 %v2569_v43, %v2521_v47 }
 0x47d   : > { %v2524_v61 = vadd.f32 %v2523_v33, %v7472_v20 }
 0x47e   : > { %v2737_v48 = vpack.c.bf16 %v2706_v26, %v2705_v27  ;;  %v2707_v38 = vmax.f32 %v2570_v52, 0.0 }
 0x480   : > { %2758 = vst.msk [vmem:[%s7484_s25] sm:$0xff] %vm7478_vm10, %v2737_v48 }
 0x481   : > { %v2667_v58 = vpop.f32.mrf.mxu3 }
 0x482   : > { %v2668_v59 = vadd.f32 %v2667_v58, %v2619_v54  ;;  %v2621_v39 = vpop.f32.mrf.mxu2 }
 0x483   : > { %v2572_v13 = vpop.f32.mrf.mxu1  ;;  %v2622_v37 = vadd.f32 %v2621_v39, %v7474_v12 }
 0x484   : > { %v2708_v44 = vmax.f32 %v2668_v59, 0.0  ;;  %v2525_v6 = vpop.f32.mrf.mxu0  ;;  %v2573_v7 = vadd.f32 %v2572_v13, %v2524_v61 }
 0x485   : > { %v2526_v50 = vadd.f32 %v2525_v6, %v7472_v20 }
 0x486   : > { %v2738_v45 = vpack.c.bf16 %v2708_v44, %v2707_v38  ;;  %v2709_v51 = vmax.f32 %v2573_v7, 0.0 }
 0x488   : > { %2759 = vst.msk [vmem:[%s7484_s25 + $0x8] sm:$0xff] %vm7478_vm10, %v2738_v45 }
 0x489   : > { %v2670_v56 = vpop.f32.mrf.mxu3 }
 0x48a   : > { %v2671_v57 = vadd.f32 %v2670_v56, %v2622_v37  ;;  %v2623_v0 = vpop.f32.mrf.mxu2 }
 0x48b   : > { %v2574_v55 = vpop.f32.mrf.mxu1  ;;  %v2624_v1 = vadd.f32 %v2623_v0, %v7474_v12 }
 0x48c   : > { %v2710_v62 = vmax.f32 %v2671_v57, 0.0  ;;  %v2528_v63 = vpop.f32.mrf.mxu0  ;;  %v2575_v60 = vadd.f32 %v2574_v55, %v2526_v50 }
 0x48d   : > { %v2529_v11 = vadd.f32 %v2528_v63, %v7472_v20 }
 0x48e   : > { %v2739_v30 = vpack.c.bf16 %v2710_v62, %v2709_v51  ;;  %v2711_v40 = vmax.f32 %v2575_v60, 0.0 }
 0x490   : > { %2760 = vst.msk [vmem:[%s7484_s25 + $0x10] sm:$0xff] %vm7478_vm10, %v2739_v30 }
 0x491   : > { %v2672_v49 = vpop.f32.mrf.mxu3 }
 0x492   : > { %v2673_v4 = vadd.f32 %v2672_v49, %v2624_v1  ;;  %v2626_v5 = vpop.f32.mrf.mxu2 }
 0x493   : > { %v2577_v10 = vpop.f32.mrf.mxu1  ;;  %v2627_v8 = vadd.f32 %v2626_v5, %v7474_v12 }
 0x494   : > { %v2712_v3 = vmax.f32 %v2673_v4, 0.0  ;;  %v2530_v9 = vpop.f32.mrf.mxu0  ;;  %v2578_v2 = vadd.f32 %v2577_v10, %v2529_v11 }
 0x495   : > { %v2531_v29 = vadd.f32 %v2530_v9, %v7472_v20 }
 0x496   : > { %v2740_v16 = vpack.c.bf16 %v2712_v3, %v2711_v40  ;;  %v2713_v53 = vmax.f32 %v2578_v2, 0.0 }
 0x498   : > { %2761 = vst.msk [vmem:[%s7484_s25 + $0x18] sm:$0xff] %vm7478_vm10, %v2740_v16 }
 0x499   : > { %v2675_v17 = vpop.f32.mrf.mxu3 }
 0x49a   : > { %v2676_v14 = vadd.f32 %v2675_v17, %v2627_v8  ;;  %v2628_v22 = vpop.f32.mrf.mxu2 }
 0x49b   : > { %v2579_v23 = vpop.f32.mrf.mxu1  ;;  %v2629_v15 = vadd.f32 %v2628_v22, %v7474_v12 }
 0x49c   : > { %v2714_v28 = vmax.f32 %v2676_v14, 0.0  ;;  %v2533_v18 = vpop.f32.mrf.mxu0  ;;  %v2580_v35 = vadd.f32 %v2579_v23, %v2531_v29 }
 0x49d   : > { %v2534_v31 = vadd.f32 %v2533_v18, %v7472_v20 }
 0x49e   : > { %v2741_v34 = vpack.c.bf16 %v2714_v28, %v2713_v53  ;;  %v2715_v19 = vmax.f32 %v2580_v35, 0.0 }
 0x4a0   : > { %2762 = vst.msk [vmem:[%s7484_s25 + $0x20] sm:$0xff] %vm7478_vm10, %v2741_v34 }
 0x4a1   : > { %v2677_v21 = vpop.f32.mrf.mxu3 }
 0x4a2   : > { %v2678_v32 = vadd.f32 %v2677_v21, %v2629_v15  ;;  %v2631_v24 = vpop.f32.mrf.mxu2 }
 0x4a3   : > { %v2582_v36 = vpop.f32.mrf.mxu1  ;;  %v2632_v27 = vadd.f32 %v2631_v24, %v7474_v12 }
 0x4a4   : > { %v2716_v41 = vmax.f32 %v2678_v32, 0.0  ;;  %v2535_v25 = vpop.f32.mrf.mxu0  ;;  %v2583_v43 = vadd.f32 %v2582_v36, %v2534_v31 }
 0x4a5   : > { %v2536_v59 = vadd.f32 %v2535_v25, %v7472_v20 }
 0x4a6   : > { %v2742_v42 = vpack.c.bf16 %v2716_v41, %v2715_v19  ;;  %v2717_v52 = vmax.f32 %v2583_v43, 0.0 }
 0x4a8   : > { %2763 = vst.msk [vmem:[%s7484_s25 + $0x28] sm:$0xff] %vm7478_vm10, %v2742_v42 }
 0x4a9   : > { %v2680_v26 = vpop.f32.mrf.mxu3 }
 0x4aa   : > { %v2681_v33 = vadd.f32 %v2680_v26, %v2632_v27  ;;  %v2633_v47 = vpop.f32.mrf.mxu2 }
 0x4ab   : > { %v2584_v48 = vpop.f32.mrf.mxu1  ;;  %v2634_v38 = vadd.f32 %v2633_v47, %v7474_v12 }
 0x4ac   : > { %v2718_v54 = vmax.f32 %v2681_v33, 0.0  ;;  %v2538_v58 = vpop.f32.mrf.mxu0  ;;  %v2585_v13 = vadd.f32 %v2584_v48, %v2536_v59 }
 0x4ad   : > { %v2539_v57 = vadd.f32 %v2538_v58, %v7472_v20 }
 0x4ae   : > { %v2743_v39 = vpack.c.bf16 %v2718_v54, %v2717_v52  ;;  %v2719_v7 = vmax.f32 %v2585_v13, 0.0 }
 0x4b0   : > { %2764 = vst.msk [vmem:[%s7484_s25 + $0x30] sm:$0xff] %vm7478_vm10, %v2743_v39 }
 0x4b1   : > { %v2682_v44 = vpop.f32.mrf.mxu3 }
 0x4b2   : > { %v2683_v6 = vadd.f32 %v2682_v44, %v2634_v38  ;;  %v2636_v61 = vpop.f32.mrf.mxu2 }
 0x4b3   : > { %v2587_v45 = vpop.f32.mrf.mxu1  ;;  %v2637_v51 = vadd.f32 %v2636_v61, %v7474_v12 }
 0x4b4   : > { %v2720_v37 = vmax.f32 %v2683_v6, 0.0  ;;  %v2540_v56 = vpop.f32.mrf.mxu0  ;;  %v2588_v55 = vadd.f32 %v2587_v45, %v2539_v57 }
 0x4b5   : > { %v2541_v4 = vadd.f32 %v2540_v56, %v7472_v20 }
 0x4b6   : > { %v2744_v0 = vpack.c.bf16 %v2720_v37, %v2719_v7  ;;  %v2721_v60 = vmax.f32 %v2588_v55, 0.0 }
 0x4b8   : > { %2765 = vst.msk [vmem:[%s7484_s25 + $0x38] sm:$0xff] %vm7478_vm10, %v2744_v0 }
 0x4b9   : > { %v2685_v62 = vpop.f32.mrf.mxu3 }
 0x4ba   : > { %v2686_v63 = vadd.f32 %v2685_v62, %v2637_v51  ;;  %v2638_v50 = vpop.f32.mrf.mxu2 }
 0x4bb   : > { %v2589_v30 = vpop.f32.mrf.mxu1  ;;  %v2639_v40 = vadd.f32 %v2638_v50, %v7474_v12 }
 0x4bc   : > { %v2722_v1 = vmax.f32 %v2686_v63, 0.0  ;;  %v2543_v49 = vpop.f32.mrf.mxu0  ;;  %v2590_v10 = vadd.f32 %v2589_v30, %v2541_v4 }
 0x4bd   : > { %v2544_v14 = vadd.f32 %v2543_v49, %v7472_v20 }
 0x4be   : > { %v2745_v5 = vpack.c.bf16 %v2722_v1, %v2721_v60  ;;  %v2723_v2 = vmax.f32 %v2590_v10, 0.0 }
 0x4c0   : > { %2766 = vst.msk [vmem:[%s7484_s25 + $0x40] sm:$0xff] %vm7478_vm10, %v2745_v5 }
 0x4c1   : > { %v2687_v3 = vpop.f32.mrf.mxu3 }
 0x4c2   : > { %v2688_v9 = vadd.f32 %v2687_v3, %v2639_v40  ;;  %v2641_v11 = vpop.f32.mrf.mxu2 }
 0x4c3   : > { %v2592_v16 = vpop.f32.mrf.mxu1  ;;  %v2642_v53 = vadd.f32 %v2641_v11, %v7474_v12 }
 0x4c4   : > { %v2724_v8 = vmax.f32 %v2688_v9, 0.0  ;;  %v2545_v17 = vpop.f32.mrf.mxu0  ;;  %v2593_v23 = vadd.f32 %v2592_v16, %v2544_v14 }
 0x4c5   : > { %v2546_v32 = vadd.f32 %v2545_v17, %v7472_v20 }
 0x4c6   : > { %v2746_v22 = vpack.c.bf16 %v2724_v8, %v2723_v2  ;;  %v2725_v35 = vmax.f32 %v2593_v23, 0.0 }
 0x4c8   : > { %2767 = vst.msk [vmem:[%s7484_s25 + $0x48] sm:$0xff] %vm7478_vm10, %v2746_v22 }
 0x4c9   : > { %v2690_v28 = vpop.f32.mrf.mxu3 }
 0x4ca   : > { %v2691_v18 = vadd.f32 %v2690_v28, %v2642_v53  ;;  %v2643_v29 = vpop.f32.mrf.mxu2 }
 0x4cb   : > { %v2594_v34 = vpop.f32.mrf.mxu1  ;;  %v2644_v19 = vadd.f32 %v2643_v29, %v7474_v12 }
 0x4cc   : > { %v2726_v15 = vmax.f32 %v2691_v18, 0.0  ;;  %v2548_v21 = vpop.f32.mrf.mxu0  ;;  %v2595_v36 = vadd.f32 %v2594_v34, %v2546_v32 }
 0x4cd   : > { %v2549_v26 = vadd.f32 %v2548_v21, %v7472_v20 }
 0x4ce   : > { %v2747_v24 = vpack.c.bf16 %v2726_v15, %v2725_v35  ;;  %v2727_v43 = vmax.f32 %v2595_v36, 0.0 }
 0x4d0   : > { %2768 = vst.msk [vmem:[%s7484_s25 + $0x50] sm:$0xff] %vm7478_vm10, %v2747_v24 }
 0x4d1   : > { %v2692_v41 = vpop.f32.mrf.mxu3 }
 0x4d2   : > { %v2693_v25 = vadd.f32 %v2692_v41, %v2644_v19  ;;  %v2646_v31 = vpop.f32.mrf.mxu2 }
 0x4d3   : > { %v2597_v42 = vpop.f32.mrf.mxu1  ;;  %v2647_v52 = vadd.f32 %v2646_v31, %v7474_v12 }
 0x4d4   : > { %v2728_v27 = vmax.f32 %v2693_v25, 0.0  ;;  %v2550_v47 = vpop.f32.mrf.mxu0  ;;  %v2598_v48 = vadd.f32 %v2597_v42, %v2549_v26 }
 0x4d5   : > { %v2551_v44 = vadd.f32 %v2550_v47, %v7472_v20 }
 0x4d6   : > { %v2748_v33 = vpack.c.bf16 %v2728_v27, %v2727_v43  ;;  %v2729_v13 = vmax.f32 %v2598_v48, 0.0 }
 0x4d8   : > { %2769 = vst.msk [vmem:[%s7484_s25 + $0x58] sm:$0xff] %vm7478_vm10, %v2748_v33 }
 0x4d9   : > { %v2695_v54 = vpop.f32.mrf.mxu3 }
 0x4da   : > { %v2696_v58 = vadd.f32 %v2695_v54, %v2647_v52  ;;  %v2648_v59 = vpop.f32.mrf.mxu2 }
 0x4db   : > { %v2599_v39 = vpop.f32.mrf.mxu1  ;;  %v2649_v45 = vadd.f32 %v2648_v59, %v7474_v12 }
 0x4dc   : > { %v2730_v38 = vmax.f32 %v2696_v58, 0.0  ;;  %v2600_v61 = vadd.f32 %v2599_v39, %v2551_v44  ;;  %v2553_v7 = vpop.f32.mrf.mxu0 }
 0x4dd   : > { %v2554_v62 = vadd.f32 %v2553_v7, %v7472_v20 }
 0x4de   : > { %v2749_v6 = vpack.c.bf16 %v2730_v38, %v2729_v13  ;;  %v2731_v55 = vmax.f32 %v2600_v61, 0.0 }
 0x4e0   : > { %2770 = vst.msk [vmem:[%s7484_s25 + $0x60] sm:$0xff] %vm7478_vm10, %v2749_v6 }
 0x4e1   : > { %v2697_v37 = vpop.f32.mrf.mxu3 }
 0x4e2   : > { %v2698_v56 = vadd.f32 %v2697_v37, %v2649_v45  ;;  %v2651_v0 = vpop.f32.mrf.mxu2 }
 0x4e3   : > { %v2602_v57 = vpop.f32.mrf.mxu1  ;;  %v2652_v30 = vadd.f32 %v2651_v0, %v7474_v12 }
 0x4e4   : > { %v2732_v51 = vmax.f32 %v2698_v56, 0.0  ;;  %v2603_v50 = vadd.f32 %v2602_v57, %v2554_v62  ;;  %v2555_v49 = vpop.f32.mrf.mxu0 }
 0x4e5   : > { %v2556_v3 = vadd.f32 %v2555_v49, %v7472_v20 }
 0x4e6   : > { %v2750_v63 = vpack.c.bf16 %v2732_v51, %v2731_v55  ;;  %v2733_v4 = vmax.f32 %v2603_v50, 0.0 }
 0x4e8   : > { %2771 = vst.msk [vmem:[%s7484_s25 + $0x68] sm:$0xff] %vm7478_vm10, %v2750_v63 }
 0x4e9   : > { %v2700_v60 = vpop.f32.mrf.mxu3 }
 0x4ea   : > { %v2701_v1 = vadd.f32 %v2700_v60, %v2652_v30  ;;  %v2653_v40 = vpop.f32.mrf.mxu2 }
 0x4eb   : > { %v2604_v10 = vpop.f32.mrf.mxu1  ;;  %v2654_v16 = vadd.f32 %v2653_v40, %v7474_v12 }
 0x4ec   : > { %v2734_v5 = vmax.f32 %v2701_v1, 0.0  ;;  %v2605_v11 = vadd.f32 %v2604_v10, %v2556_v3 }
 0x4ee   : > { %v2751_v9 = vpack.c.bf16 %v2734_v5, %v2733_v4  ;;  %v2735_v17 = vmax.f32 %v2605_v11, 0.0 }
 0x4f0   : > { %2772 = vst.msk [vmem:[%s7484_s25 + $0x70] sm:$0xff] %vm7478_vm10, %v2751_v9 }
 0x4f1   : > { %v2702_v2 = vpop.f32.mrf.mxu3 }
 0x4f2   : > { %v2703_v8 = vadd.f32 %v2702_v2, %v2654_v16 }
 0x4f4   : > { %v2736_v14 = vmax.f32 %v2703_v8, 0.0 }
 0x4f6   : > { %v2752_v22 = vpack.c.bf16 %v2736_v14, %v2735_v17 }
 0x4f8   : > { %2773 = vst.msk [vmem:[%s7484_s25 + $0x78] sm:$0xff] %vm7478_vm10, %v2752_v22 }
 0x4f9 PF: > { %p2774_p12 = scmp.eq.s32.totalorder %s6231_s30, 1 }
 0x4fb   : > { %p2775_p13 = pnand %p2774_p12, %p1844_p10 }
 0x4fd   : > { %2778 = sbr.rel (%p2775_p13) target bundleno = 2669 (0xa6d), region = 80 }
 0x502   : > { %v7566_v20 = vld [vmem:[#allocation2 + $0x44] sm:$0xf]  ;;  %v7568_v23 = vld [vmem:[#allocation2 + $0x4c] sm:$0xf]  ;;  %v6255_v12 = vmov 0   ;;  %vm3163_vm14 = vcmask 15360  }
 0x503   : > { %9264 = vst [vmem:[#allocation64_spill] sm:$0xff] %v7566_v20  ;;  %5867 = vset.pattern.permute.xlu2 %v6255_v12  ;;  %5856 = vset.pattern.permute.xlu1 %v6255_v12  ;;  %v9115_v53 = vunpack.c.l.bf16 %v7566_v20  ;;  %v9119_v28 = vunpack.c.l.bf16 %v7568_v23  ;;  %v7572_v46 = vld [vmem:[#allocation2 + $0x24] sm:$0xf]  ;;  %v7574_v18 = vld [vmem:[#allocation2 + $0x2c] sm:$0xf] }
 0x504   : > { %9265 = vst [vmem:[#allocation65_spill] sm:$0xff] %v7572_v46  ;;  %v7576_v29 = vld [vmem:[#allocation2 + $0x4] sm:$0xf]  ;;  %5845 = vset.pattern.permute.xlu0 %v6255_v12  ;;  %v9108_v34 = vunpack.c.l.bf16 %v7572_v46  ;;  %v9109_v35 = vunpack.c.l.bf16 %v7574_v18  ;;  %v7580_v15 = vld [vmem:[#allocation2 + $0xc] sm:$0xf] }
 0x505   : > { %9266 = vst [vmem:[#allocation66_spill] sm:$0xff] %v7574_v18  ;;  %v9101_v21 = vunpack.c.l.bf16 %v7576_v29  ;;  %v7583_v32 = vld [vmem:[#allocation2 + $0x54] sm:$0xf]  ;;  %v7585_v24 = vld [vmem:[#allocation2 + $0x5c] sm:$0xf]  ;;  %v5868_v36 = vpack.i.bf16 %v9119_v28, %v9115_v53  ;;  %v9102_v19 = vunpack.c.l.bf16 %v7580_v15  ;;  %v7797_v28 = vld [vmem:[%s9090_s2 + $0xe0] sm:$0xff] }
 0x506   : > { %9267 = vst [vmem:[#allocation67_spill] sm:$0xff] %v7576_v29  ;;  %v7592_v41 = vld [vmem:[#allocation2 + $0x34] sm:$0xf]  ;;  %v7594_v25 = vld [vmem:[#allocation2 + $0x3c] sm:$0xf]  ;;  %v5857_v31 = vpack.i.bf16 %v9109_v35, %v9108_v34  ;;  %v9120_v26 = vunpack.c.l.bf16 %v7583_v32  ;;  %v9121_v33 = vunpack.c.l.bf16 %v7585_v24  ;;  %vm2967_vm7 = vcmp.gt.f32.partialorder %v7797_v28, 0.5 }
 0x507   : > { %9268 = vst [vmem:[#allocation68_spill] sm:$0xff] %v7580_v15  ;;  %v7600_v42 = vld [vmem:[#allocation2 + $0x14] sm:$0xf]  ;;  %v7602_v43 = vld [vmem:[#allocation2 + $0x1c] sm:$0xf]  ;;  %5869 = vperm.xlu2 %5867, %v5868_v36   ;;  %v5846_v27 = vpack.i.bf16 %v9102_v19, %v9101_v21  ;;  %v9113_v47 = vunpack.c.l.bf16 %v7592_v41  ;;  %v9114_v48 = vunpack.c.l.bf16 %v7594_v25  ;;  %v7890_v46 = vld [vmem:[%s9090_s2 + $0x68] sm:$0xff] }
 0x508   : > { %9269 = vst [vmem:[#allocation69_spill] sm:$0xff] %v7592_v41  ;;  %5858 = vperm.xlu1 %5856, %v5857_v31   ;;  %v9103_v52 = vunpack.c.l.bf16 %v7600_v42  ;;  %v9107_v54 = vunpack.c.l.bf16 %v7602_v43  ;;  %v5873_v58 = vpack.i.bf16 %v9121_v33, %v9120_v26  ;;  %v7622_v39 = vld [vmem:[#allocation2 + $0x84] sm:$0xf]  ;;  %v7624_v13 = vld [vmem:[#allocation2 + $0x8c] sm:$0xf]  ;;  %v7763_v53 = vld [vmem:[%s9090_s2 + $0xb0] sm:$0xff] }
 0x509   : > { %9270 = vst [vmem:[#allocation70_spill] sm:$0xff] %v7594_v25  ;;  %5847 = vperm.xlu0 %5845, %v5846_v27   ;;  %v5862_v59 = vpack.i.bf16 %v9114_v48, %v9113_v47  ;;  %v7630_v44 = vld [vmem:[#allocation2 + $0x74] sm:$0xf]  ;;  %v7632_v6 = vld [vmem:[#allocation2 + $0x7c] sm:$0xf]  ;;  %v9099_v7 = vunpack.c.l.bf16 %v7622_v39  ;;  %v9100_v37 = vunpack.c.l.bf16 %v7624_v13  ;;  %vm2961_vm1 = vcmp.gt.f32.partialorder %v7763_v53, 0.5 }
 0x50a   : > { %9271 = vst [vmem:[#allocation71_spill] sm:$0xff] %v7600_v42  ;;  %v5851_v38 = vpack.i.bf16 %v9107_v54, %v9103_v52  ;;  %v7634_v61 = vld [vmem:[#allocation2 + $0x64] sm:$0xf]  ;;  %v7636_v45 = vld [vmem:[#allocation2 + $0x6c] sm:$0xf]  ;;  %v9128_v56 = vunpack.c.l.bf16 %v7630_v44  ;;  %v9129_v57 = vunpack.c.l.bf16 %v7632_v6 }
 0x50b   : > { %9272 = vst [vmem:[#allocation72_spill] sm:$0xff] %v7602_v43  ;;  %v9125_v0 = vunpack.c.l.bf16 %v7634_v61  ;;  %v9126_v55 = vunpack.c.l.bf16 %v7636_v45  ;;  %v5888_v51 = vpack.i.bf16 %v9100_v37, %v9099_v7  ;;  %v7652_v63 = vld [vmem:[#allocation2 + $0xb4] sm:$0xf]  ;;  %v7654_v50 = vld [vmem:[#allocation2 + $0xbc] sm:$0xf] }
 0x50c   : > { %9273 = vst [vmem:[#allocation73_spill] sm:$0xff] %v7622_v39  ;;  %v5883_v62 = vpack.i.bf16 %v9129_v57, %v9128_v56  ;;  %v7660_v60 = vld [vmem:[#allocation2 + $0xa4] sm:$0xf]  ;;  %v7662_v1 = vld [vmem:[#allocation2 + $0xac] sm:$0xf]  ;;  %v9111_v5 = vunpack.c.l.bf16 %v7652_v63  ;;  %v9112_v10 = vunpack.c.l.bf16 %v7654_v50 }
 0x50d   : > { %9274 = vst [vmem:[#allocation74_spill] sm:$0xff] %v7624_v13  ;;  %v5878_v30 = vpack.i.bf16 %v9126_v55, %v9125_v0  ;;  %v7664_v49 = vld [vmem:[#allocation2 + $0x94] sm:$0xf]  ;;  %v7666_v4 = vld [vmem:[#allocation2 + $0x9c] sm:$0xf]  ;;  %v9106_v40 = vunpack.c.l.bf16 %v7660_v60  ;;  %v9110_v3 = vunpack.c.l.bf16 %v7662_v1  ;;  %v7832_v0 = vld [vmem:[%s9090_s2 + $0x48] sm:$0xff] }
 0x50e   : > { %9275 = vst [vmem:[#allocation75_spill] sm:$0xff] %v7652_v63  ;;  %v9104_v9 = vunpack.c.l.bf16 %v7664_v49  ;;  %v9105_v11 = vunpack.c.l.bf16 %v7666_v4  ;;  %v5903_v16 = vpack.i.bf16 %v9112_v10, %v9111_v5  ;;  %v7682_v8 = vld [vmem:[#allocation2 + $0xe4] sm:$0xf]  ;;  %v7684_v17 = vld [vmem:[#allocation2 + $0xec] sm:$0xf] }
 0x50f   : > { %5874 = vperm.xlu2 %5867, %v5873_v58   ;;  %9276 = vst [vmem:[#allocation76_spill] sm:$0xff] %v7654_v50  ;;  %v5898_v2 = vpack.i.bf16 %v9110_v3, %v9106_v40  ;;  %v7690_v22 = vld [vmem:[#allocation2 + $0xd4] sm:$0xf]  ;;  %v7692_v12 = vld [vmem:[#allocation2 + $0xdc] sm:$0xf]  ;;  %v9123_v27 = vunpack.c.l.bf16 %v7682_v8  ;;  %v9124_v58 = vunpack.c.l.bf16 %v7684_v17 }
 0x510   : > { %5863 = vperm.xlu1 %5856, %v5862_v59   ;;  %9277 = vst [vmem:[#allocation77_spill] sm:$0xff] %v7660_v60  ;;  %v5893_v14 = vpack.i.bf16 %v9105_v11, %v9104_v9  ;;  %v7694_v36 = vld [vmem:[#allocation2 + $0xc4] sm:$0xf]  ;;  %v7696_v31 = vld [vmem:[#allocation2 + $0xcc] sm:$0xf]  ;;  %v9118_v59 = vunpack.c.l.bf16 %v7690_v22  ;;  %v7731_v11 = vld [vmem:[%s9090_s2 + $0x50] sm:$0xff] }
 0x511   : > { %5852 = vperm.xlu0 %5845, %v5851_v38   ;;  %9278 = vst [vmem:[#allocation78_spill] sm:$0xff] %v7662_v1  ;;  %v9122_v38 = vunpack.c.l.bf16 %v7692_v12  ;;  %v7718_v7 = vld [vmem:[#allocation2 + $0xfc] sm:$0xf]  ;;  %vm2949_vm11 = vcmp.gt.f32.partialorder %v7731_v11, 0.5 }
 0x512   : > { %9279 = vst [vmem:[#allocation79_spill] sm:$0xff] %v7664_v49  ;;  %v9130_v21 = vunpack.c.l.bf16 %v7718_v7 }
 0x513   : > { %9280 = vst [vmem:[#allocation80_spill] sm:$0xff] %v7666_v4 }
 0x514   : > { %9281 = vst [vmem:[#allocation81_spill] sm:$0xff] %v7694_v36 }
 0x515   : > { %9282 = vst [vmem:[#allocation82_spill] sm:$0xff] %v7696_v31 }
 0x517   : > { %5889 = vperm.xlu2 %5867, %v5888_v51   ;;  %v9116_v51 = vunpack.c.l.bf16 %v7694_v36 }
 0x518   : > { %5884 = vperm.xlu1 %5856, %v5883_v62   ;;  %v9117_v62 = vunpack.c.l.bf16 %v7696_v31 }
 0x519   : > { %5879 = vperm.xlu0 %5845, %v5878_v30   ;;  %v5918_v30 = vpack.i.bf16 %v9124_v58, %v9123_v27  ;;  %v7822_v27 = vld [vmem:[%s9090_s2 + $0x10] sm:$0xff]  ;;  %v7827_v58 = vld [vmem:[%s9090_s2 + $0x18] sm:$0xff] }
 0x51f   : > { %5904 = vperm.xlu2 %5867, %v5903_v16   ;;  %v5913_v16 = vpack.i.bf16 %v9122_v38, %v9118_v59  ;;  %v7805_v38 = vld [vmem:[%s9090_s2 + $0xe8] sm:$0xff] }
 0x520   : > { %5899 = vperm.xlu1 %5856, %v5898_v2   ;;  %v5908_v2 = vpack.i.bf16 %v9117_v62, %v9116_v51  ;;  %vm2968_vm8 = vcmp.gt.f32.partialorder %v7805_v38, 0.5 }
 0x521   : > { %5894 = vperm.xlu0 %5845, %v5893_v14   ;;  %v7716_v14 = vld [vmem:[#allocation2 + $0xf4] sm:$0xf] }
 0x522   : > { %v9127_v37 = vunpack.c.l.bf16 %v7716_v14 }
 0x524   : > { %v5923_v19 = vpack.i.bf16 %v9130_v21, %v9127_v37 }
 0x527   : > { %5919 = vperm.xlu2 %5867, %v5918_v30   ;;  %v7736_v30 = vld [vmem:[%s9090_s2 + $0x58] sm:$0xff] }
 0x528   : > { %5914 = vperm.xlu1 %5856, %v5913_v16   ;;  %vm2950_vm12 = vcmp.gt.f32.partialorder %v7736_v30, 0.5 }
 0x529   : > { %5909 = vperm.xlu0 %5845, %v5908_v2  }
 0x531   : > { %5924 = vperm.xlu0 %5845, %v5923_v19   ;;  %v7743_v19 = vld [vmem:[%s9090_s2 + $0x88] sm:$0xff] }
 0x532   : > { %vm2956_vm13 = vcmp.gt.f32.partialorder %v7743_v19, 0.5 }
 0x561   : > { %v7726_v52 = vpop.permute.xlu2 %5869 }
 0x562   : > { %v9283_v63 = vunpack.i.h.bf16 %v7726_v52 }
 0x569   : > { %v5875_v9 = vpop.permute.xlu2 %5874 }
 0x56a   : > { %v5877_v16 = vunpack.i.h.bf16 %v5875_v9  ;;  %v5876_v2 = vunpack.i.l.bf16 %v5875_v9  ;;  %v7749_v9 = vld [vmem:[%s9090_s2 + $0x80] sm:$0xff] }
 0x56b   : > { %vm2955_vm15 = vcmp.gt.f32.partialorder %v7749_v9, 0.5 }
 0x56c   : > { %v3142_v40 = vsel %vm2950_vm12, %v5877_v16, -1e+30  ;;  %v3141_v54 = vsel %vm2949_vm11, %v5876_v2, -1e+30  ;;  %v7758_v2 = vld [vmem:[%s9090_s2 + $0xb8] sm:$0xff]  ;;  %vm2941_vm11 = vcmp.gt.f32.partialorder %v7822_v27, 0.5 }
 0x56d   : > { %v3182_v3 = vsel %vm3163_vm14, %v3142_v40, -inf  ;;  %v3180_v5 = vsel %vm3163_vm14, %v3141_v54, -inf  ;;  %vm2962_vm0 = vcmp.gt.f32.partialorder %v7758_v2, 0.5  ;;  %vm2942_vm12 = vcmp.gt.f32.partialorder %v7827_v58, 0.5 }
 0x56e   : > { %v3181_v48 = vmax.f32 %v3182_v3, %v3180_v5  ;;  %v7774_v5 = vld [vmem:[%s9090_s2 + $0x28] sm:$0xff] }
 0x56f   : > { %vm2944_vm3 = vcmp.gt.f32.partialorder %v7774_v5, 0.5 }
 0x571   : > { %v5890_v34 = vpop.permute.xlu2 %5889 }
 0x572   : > { %v5892_v35 = vunpack.i.h.bf16 %v5890_v34  ;;  %v5891_v47 = vunpack.i.l.bf16 %v5890_v34 }
 0x574   : > { %v3148_v10 = vsel %vm2956_vm13, %v5892_v35, -1e+30  ;;  %v3147_v51 = vsel %vm2955_vm15, %v5891_v47, -1e+30  ;;  %v7769_v35 = vld [vmem:[%s9090_s2 + $0x20] sm:$0xff]  ;;  %vm2948_vm13 = vcmp.gt.f32.partialorder %v7832_v0, 0.5 }
 0x575   : > { %v3194_v16 = vsel %vm3163_vm14, %v3148_v10, -inf  ;;  %v7779_v47 = vld [vmem:[%s9090_s2] sm:$0xff]  ;;  %v3192_v62 = vsel %vm3163_vm14, %v3147_v51, -inf  ;;  %vm2943_vm2 = vcmp.gt.f32.partialorder %v7769_v35, 0.5  ;;  %v7810_v51 = vld [vmem:[%s9090_s2 + $0x30] sm:$0xff] }
 0x576   : > { %v3183_v40 = vmax.f32 %v3194_v16, %v3181_v48  ;;  %v7784_v48 = vld [vmem:[%s9090_s2 + $0x40] sm:$0xff]  ;;  %v7790_v16 = vld [vmem:[%s9090_s2 + $0x8] sm:$0xff]  ;;  %vm2939_vm4 = vcmp.gt.f32.partialorder %v7779_v47, 0.5  ;;  %vm2945_vm9 = vcmp.gt.f32.partialorder %v7810_v51, 0.5  ;;  %v3140_v50 = vsel %vm2948_vm13, %v9283_v63, -1e+30 }
 0x577   : > { %vm2947_vm5 = vcmp.gt.f32.partialorder %v7784_v48, 0.5  ;;  %vm2940_vm6 = vcmp.gt.f32.partialorder %v7790_v16, 0.5  ;;  %v7916_v63 = vld [vmem:[%s9090_s2 + $0xa0] sm:$0xff]  ;;  %vm3657_vm13 = vcmask 1041408  }
 0x578   : > { %v3189_v26 = vmax.f32 %v3192_v62, %v3183_v40  ;;  %v7815_v62 = vld [vmem:[%s9090_s2 + $0x38] sm:$0xff] }
 0x579   : > { %v5905_v34 = vpop.permute.xlu2 %5904  ;;  %vm2946_vm10 = vcmp.gt.f32.partialorder %v7815_v62, 0.5 }
 0x57a   : > { %v5907_v54 = vunpack.i.h.bf16 %v5905_v34  ;;  %v5906_v10 = vunpack.i.l.bf16 %v5905_v34  ;;  %v5859_v3 = vpop.permute.xlu1 %5858 }
 0x57b   : > { %v5848_v34 = vpop.permute.xlu0 %5847  ;;  %v5861_v40 = vunpack.i.h.bf16 %v5859_v3 }
 0x57c   : > { %v3154_v59 = vsel %vm2962_vm0, %v5907_v54, -1e+30  ;;  %v5860_v54 = vunpack.i.l.bf16 %v5859_v3  ;;  %v5871_v3 = vunpack.i.l.bf16 %v7726_v52  ;;  %v5849_v37 = vunpack.i.l.bf16 %v5848_v34 }
 0x57d   : > { %v3206_v33 = vsel %vm3163_vm14, %v3154_v59, -inf  ;;  %v3153_v59 = vsel %vm2961_vm1, %v5906_v10, -1e+30  ;;  %v5850_v57 = vunpack.i.h.bf16 %v5848_v34 }
 0x57e   : > { %v3191_v55 = vmax.f32 %v3206_v33, %v3189_v26  ;;  %v3204_v56 = vsel %vm3163_vm14, %v3153_v59, -inf  ;;  %v3136_v26 = vsel %vm2944_vm3, %v5861_v40, -1e+30  ;;  %v3135_v33 = vsel %vm2943_vm2, %v5860_v54, -1e+30 }
 0x57f   : > { %v3131_v34 = vsel %vm2939_vm4, %v5849_v37, -1e+30  ;;  %v7862_v37 = vld [vmem:[%s9090_s2 + $0x78] sm:$0xff]  ;;  %vm2952_vm2 = vcmp.gt.f32.partialorder %v7890_v46, 0.5  ;;  %vm2959_vm3 = vcmp.gt.f32.partialorder %v7916_v63, 0.5 }
 0x580   : > { %v3193_v29 = vmax.f32 %v3204_v56, %v3191_v55  ;;  %vm2954_vm0 = vcmp.gt.f32.partialorder %v7862_v37, 0.5 }
 0x581   : > { %v5920_v21 = vpop.permute.xlu2 %5919 }
 0x582   : > { %v5922_v10 = vunpack.i.h.bf16 %v5920_v21  ;;  %v5921_v39 = vunpack.i.l.bf16 %v5920_v21  ;;  %v5864_v13 = vpop.permute.xlu1 %5863  ;;  %v7857_v21 = vld [vmem:[%s9090_s2 + $0x70] sm:$0xff] }
 0x583   : > { %v5866_v59 = vunpack.i.h.bf16 %v5864_v13  ;;  %v5865_v15 = vunpack.i.l.bf16 %v5864_v13  ;;  %v5853_v42 = vpop.permute.xlu0 %5852  ;;  %v3168_v13 = vsel %vm3163_vm14, %v3135_v33, -inf  ;;  %v7878_v33 = vld [vmem:[%s9090_s2 + $0x60] sm:$0xff]  ;;  %vm2953_vm15 = vcmp.gt.f32.partialorder %v7857_v21, 0.5 }
 0x584   : > { %v3160_v49 = vsel %vm2968_vm8, %v5922_v10, -1e+30  ;;  %v3159_v4 = vsel %vm2967_vm7, %v5921_v39, -1e+30  ;;  %v5855_v40 = vunpack.i.h.bf16 %v5853_v42  ;;  %v5854_v60 = vunpack.i.l.bf16 %v5853_v42 }
 0x585   : > { %v3218_v56 = vsel %vm3163_vm14, %v3160_v49, -inf  ;;  %v3138_v55 = vsel %vm2946_vm10, %v5866_v59, -1e+30  ;;  %v3137_v42 = vsel %vm2945_vm9, %v5865_v15, -1e+30  ;;  %v3216_v49 = vsel %vm3163_vm14, %v3159_v4, -inf }
 0x586   : > { %v3132_v39 = vsel %vm2940_vm6, %v5850_v57, -1e+30  ;;  %v3195_v54 = vmax.f32 %v3218_v56, %v3193_v29  ;;  %v3174_v10 = vsel %vm3163_vm14, %v3138_v55, -inf  ;;  %v3134_v43 = vsel %vm2942_vm12, %v5855_v40, -1e+30 }
 0x587   : > { %v3172_v59 = vsel %vm3163_vm14, %v3137_v42, -inf  ;;  %v3167_v15 = vsel %vm3163_vm14, %v3134_v43, -inf  ;;  %v3133_v57 = vsel %vm2941_vm11, %v5854_v60, -1e+30  ;;  %v3164_v29 = vsel %vm3163_vm14, %v3131_v34, -inf }
 0x588   : > { %v3201_v56 = vmax.f32 %v3216_v49, %v3195_v54  ;;  %v3175_v55 = vmax.f32 %v3167_v15, %v3174_v10  ;;  %v3166_v40 = vsel %vm3163_vm14, %v3133_v57, -inf  ;;  %v3139_v4 = vsel %vm2947_vm5, %v5871_v3, -1e+30 }
 0x589   : > { %vm2951_vm1 = vcmp.gt.f32.partialorder %v7878_v33, 0.5  ;;  %v3170_v43 = vsel %vm3163_vm14, %v3136_v26, -inf  ;;  %v3165_v60 = vsel %vm3163_vm14, %v3132_v39, -inf  ;;  %v3173_v42 = vmax.f32 %v3166_v40, %v3172_v59 }
 0x58a   : > { %v3203_v34 = vmax.f32 %v3175_v55, %v3201_v56  ;;  %v5885_v54 = vpop.permute.xlu1 %5884  ;;  %v3169_v10 = vmax.f32 %v3164_v29, %v3168_v13  ;;  %v3171_v26 = vmax.f32 %v3165_v60, %v3170_v43  ;;  %v3176_v59 = vsel %vm3163_vm14, %v3139_v4, -inf  ;;  %v7921_v43 = vld [vmem:[%s9090_s2 + $0xa8] sm:$0xff] }
 0x58b   : > { %v5887_v49 = vunpack.i.h.bf16 %v5885_v54  ;;  %v5886_v15 = vunpack.i.l.bf16 %v5885_v54  ;;  %v5880_v57 = vpop.permute.xlu0 %5879  ;;  %v3178_v4 = vsel %vm3163_vm14, %v3140_v50, -inf  ;;  %vm2960_vm4 = vcmp.gt.f32.partialorder %v7921_v43, 0.5 }
 0x58c   : > { %v3197_v3 = vmax.f32 %v3173_v42, %v3203_v34  ;;  %v5882_v18 = vunpack.i.h.bf16 %v5880_v57  ;;  %v5881_v1 = vunpack.i.l.bf16 %v5880_v57  ;;  %v3177_v52 = vmax.f32 %v3169_v10, %v3176_v59  ;;  %v7929_v10 = vld [vmem:[%s9090_s2 + $0x98] sm:$0xff] }
 0x58d   : > { %v3146_v39 = vsel %vm2954_vm0, %v5887_v49, -1e+30  ;;  %v3145_v13 = vsel %vm2953_vm15, %v5886_v15, -1e+30  ;;  %v3179_v42 = vmax.f32 %v3171_v26, %v3178_v4  ;;  %vm2958_vm5 = vcmp.gt.f32.partialorder %v7929_v10, 0.5  ;;  %v7944_v4 = vld [vmem:[%s9090_s2 + $0xd0] sm:$0xff] }
 0x58e   : > { %v3190_v29 = vsel %vm3163_vm14, %v3146_v39, -inf  ;;  %v3144_v56 = vsel %vm2952_vm2, %v5882_v18, -1e+30  ;;  %v3143_v55 = vsel %vm2951_vm1, %v5881_v1, -1e+30  ;;  %v3188_v18 = vsel %vm3163_vm14, %v3145_v13, -inf }
 0x58f   : > { %v3199_v40 = vmax.f32 %v3190_v29, %v3197_v3  ;;  %v3184_v34 = vsel %vm3163_vm14, %v3143_v55, -inf  ;;  %v3186_v1 = vsel %vm3163_vm14, %v3144_v56, -inf  ;;  %v7936_v39 = vld [vmem:[%s9090_s2 + $0x90] sm:$0xff]  ;;  %vm2965_vm7 = vcmp.gt.f32.partialorder %v7944_v4, 0.5 }
 0x590   : > { %v3185_v54 = vmax.f32 %v3177_v52, %v3184_v34  ;;  %v3187_v57 = vmax.f32 %v3179_v42, %v3186_v1  ;;  %vm2957_vm6 = vcmp.gt.f32.partialorder %v7936_v39, 0.5 }
 0x591   : > { %v3205_v60 = vmax.f32 %v3188_v18, %v3199_v40  ;;  %v7949_v18 = vld [vmem:[%s9090_s2 + $0xd8] sm:$0xff] }
 0x592   : > { %v5900_v49 = vpop.permute.xlu1 %5899  ;;  %vm2966_vm8 = vcmp.gt.f32.partialorder %v7949_v18, 0.5 }
 0x593   : > { %v3207_v15 = vmax.f32 %v3185_v54, %v3205_v60  ;;  %v5902_v50 = vunpack.i.h.bf16 %v5900_v49  ;;  %v5901_v3 = vunpack.i.l.bf16 %v5900_v49  ;;  %v5895_v26 = vpop.permute.xlu0 %5894  ;;  %v7955_v54 = vld [vmem:[%s9090_s2 + $0xc8] sm:$0xff] }
 0x594   : > { %v5897_v13 = vunpack.i.h.bf16 %v5895_v26  ;;  %v5896_v55 = vunpack.i.l.bf16 %v5895_v26  ;;  %v7963_v26 = vld [vmem:[%s9090_s2 + $0xc0] sm:$0xff]  ;;  %vm2964_vm9 = vcmp.gt.f32.partialorder %v7955_v54, 0.5 }
 0x595   : > { %v3213_v59 = vmax.f32 %v3187_v57, %v3207_v15  ;;  %v3152_v29 = vsel %vm2960_vm4, %v5902_v50, -1e+30  ;;  %v3151_v56 = vsel %vm2959_vm3, %v5901_v3, -1e+30  ;;  %vm2963_vm10 = vcmp.gt.f32.partialorder %v7963_v26, 0.5 }
 0x596   : > { %v3202_v40 = vsel %vm3163_vm14, %v3152_v29, -inf  ;;  %v3150_v34 = vsel %vm2958_vm5, %v5897_v13, -1e+30  ;;  %v3200_v1 = vsel %vm3163_vm14, %v3151_v56, -inf  ;;  %v3149_v42 = vsel %vm2957_vm6, %v5896_v55, -1e+30 }
 0x597   : > { %v3215_v52 = vmax.f32 %v3202_v40, %v3213_v59  ;;  %v3198_v49 = vsel %vm3163_vm14, %v3150_v34, -inf  ;;  %v3196_v59 = vsel %vm3163_vm14, %v3149_v42, -inf  ;;  %v7978_v42 = vld [vmem:[%s9090_s2 + $0xf8] sm:$0xff] }
 0x598   : > { %vm2970_vm12 = vcmp.gt.f32.partialorder %v7978_v42, 0.5 }
 0x599   : > { %v3209_v60 = vmax.f32 %v3200_v1, %v3215_v52 }
 0x59a   : > { %v5915_v15 = vpop.permute.xlu1 %5914 }
 0x59b   : > { %v3211_v57 = vmax.f32 %v3198_v49, %v3209_v60  ;;  %v5917_v50 = vunpack.i.h.bf16 %v5915_v15  ;;  %v5916_v3 = vunpack.i.l.bf16 %v5915_v15  ;;  %v5910_v13 = vpop.permute.xlu0 %5909  ;;  %v7973_v15 = vld [vmem:[%s9090_s2 + $0xf0] sm:$0xff] }
 0x59c   : > { %v5912_v29 = vunpack.i.h.bf16 %v5910_v13  ;;  %v5911_v52 = vunpack.i.l.bf16 %v5910_v13  ;;  %vm2969_vm11 = vcmp.gt.f32.partialorder %v7973_v15, 0.5 }
 0x59d   : > { %v3217_v56 = vmax.f32 %v3196_v59, %v3211_v57  ;;  %v3158_v55 = vsel %vm2966_vm8, %v5917_v50, -1e+30  ;;  %v3157_v40 = vsel %vm2965_vm7, %v5916_v3, -1e+30 }
 0x59e   : > { %v3214_v34 = vsel %vm3163_vm14, %v3158_v55, -inf  ;;  %v3156_v60 = vsel %vm2964_vm9, %v5912_v29, -1e+30  ;;  %v3212_v49 = vsel %vm3163_vm14, %v3157_v40, -inf  ;;  %v3155_v50 = vsel %vm2963_vm10, %v5911_v52, -1e+30 }
 0x59f   : > { %v3219_v1 = vmax.f32 %v3214_v34, %v3217_v56  ;;  %v3210_v3 = vsel %vm3163_vm14, %v3156_v60, -inf  ;;  %v3208_v29 = vsel %vm3163_vm14, %v3155_v50, -inf }
 0x5a1   : > { %v3224_v57 = vmax.f32 %v3212_v49, %v3219_v1 }
 0x5a3   : > { %v3221_v13 = vmax.f32 %v3210_v3, %v3224_v57  ;;  %v5925_v59 = vpop.permute.xlu0 %5924 }
 0x5a4   : > { %v5927_v56 = vunpack.i.h.bf16 %v5925_v59  ;;  %v5926_v55 = vunpack.i.l.bf16 %v5925_v59 }
 0x5a5   : > { %v3223_v40 = vmax.f32 %v3208_v29, %v3221_v13 }
 0x5a6   : > { %v3162_v34 = vsel %vm2970_vm12, %v5927_v56, -1e+30  ;;  %v3161_v41 = vsel %vm2969_vm11, %v5926_v55, -1e+30 }
 0x5a7   : > { %v3222_v25 = vsel %vm3163_vm14, %v3162_v34, -inf  ;;  %v3220_v52 = vsel %vm3163_vm14, %v3161_v41, -inf }
 0x5a8   : > { %v3225_v20 = vmax.f32 %v3222_v25, %v3223_v40 }
 0x5aa   : > { %v3226_v1 = vmax.f32 %v3220_v52, %v3225_v20 }
 0x5ac   : > { %v3227_v60 = vrot.slane %v3226_v1, 4 }
 0x5ae   : > { %v3228_v49 = vmax.f32 %v3226_v1, %v3227_v60 }
 0x5b0   : > { %v3229_v57 = vrot.slane %v3228_v49, 2 }
 0x5b2   : > { %v3230_v3 = vmax.f32 %v3228_v49, %v3229_v57 }
 0x5b4   : > { %v3231_v36 = vrot.slane %v3230_v3, 1 }
 0x5b6   : > { %v7986_v31 = vmax.f32 %v3230_v3, %v3231_v36 }
 0x5b8   : > { %v3264_v50 = vmul.f32 %v7986_v31, %v7978_v42  ;;  %v3248_v13 = vmul.f32 %v7986_v31, %v7862_v37  ;;  %v3247_v59 = vmul.f32 %v7986_v31, %v7857_v21  ;;  %v3263_v36 = vmul.f32 %v7986_v31, %v7973_v15 }
 0x5b9   : > { %v3246_v29 = vmul.f32 %v7986_v31, %v7890_v46  ;;  %v3245_v56 = vmul.f32 %v7986_v31, %v7878_v33  ;;  %v3262_v52 = vmul.f32 %v7986_v31, %v7805_v38  ;;  %v3261_v1 = vmul.f32 %v7986_v31, %v7797_v28 }
 0x5ba   : > { %v3358_v25 = vsel %vm3163_vm14, %v3264_v50, 0.0  ;;  %v3310_v20 = vsel %vm3163_vm14, %v3248_v13, 0.0  ;;  %v3307_v41 = vsel %vm3163_vm14, %v3247_v59, 0.0  ;;  %v3355_v55 = vsel %vm3163_vm14, %v3263_v36, 0.0 }
 0x5bb   : > { %3359 = vadd.xlane.f32.xlu2 %v3358_v25  ;;  %3311 = vadd.xlane.f32.xlu1 %v3310_v20  ;;  %v3304_v40 = vsel %vm3163_vm14, %v3246_v29, 0.0  ;;  %v3301_v34 = vsel %vm3163_vm14, %v3245_v56, 0.0  ;;  %v3260_v60 = vmul.f32 %v7986_v31, %v7949_v18  ;;  %v3352_v49 = vsel %vm3163_vm14, %v3262_v52, 0.0 }
 0x5bc   : > { %3308 = vadd.xlane.f32.xlu0 %v3307_v41  ;;  %v3349_v57 = vsel %vm3163_vm14, %v3261_v1, 0.0  ;;  %v3244_v50 = vmul.f32 %v7986_v31, %v7736_v30  ;;  %v3243_v13 = vmul.f32 %v7986_v31, %v7731_v11  ;;  %v3242_v59 = vmul.f32 %v7986_v31, %v7832_v0 }
 0x5bd   : > { %v3346_v3 = vsel %vm3163_vm14, %v3260_v60, 0.0  ;;  %v3259_v36 = vmul.f32 %v7986_v31, %v7944_v4  ;;  %v3258_v30 = vmul.f32 %v7986_v31, %v7955_v54  ;;  %v3257_v29 = vmul.f32 %v7986_v31, %v7963_v26 }
 0x5be   : > { %v3298_v25 = vsel %vm3163_vm14, %v3244_v50, 0.0  ;;  %v3295_v20 = vsel %vm3163_vm14, %v3243_v13, 0.0  ;;  %v3292_v41 = vsel %vm3163_vm14, %v3242_v59, 0.0  ;;  %v3240_v52 = vmul.f32 %v7986_v31, %v7815_v62 }
 0x5bf   : > { %v3343_v56 = vsel %vm3163_vm14, %v3259_v36, 0.0  ;;  %v3239_v1 = vmul.f32 %v7986_v31, %v7810_v51  ;;  %v3255_v50 = vmul.f32 %v7986_v31, %v7763_v53  ;;  %v3254_v13 = vmul.f32 %v7986_v31, %v7921_v43 }
 0x5c0   : > { %v3237_v36 = vmul.f32 %v7986_v31, %v7769_v35 }
 0x5c3   : > { %3356 = vadd.xlane.f32.xlu2 %v3355_v55  ;;  %3305 = vadd.xlane.f32.xlu1 %v3304_v40  ;;  %v3340_v55 = vsel %vm3163_vm14, %v3258_v30, 0.0  ;;  %v3337_v40 = vsel %vm3163_vm14, %v3257_v29, 0.0  ;;  %v3236_v30 = vmul.f32 %v7986_v31, %v7827_v58 }
 0x5c4   : > { %3302 = vadd.xlane.f32.xlu0 %v3301_v34  ;;  %v3241_v34 = vmul.f32 %v7986_v31, %v7784_v48 }
 0x5c6   : > { %v3289_v60 = vsel %vm3163_vm14, %v3241_v34, 0.0  ;;  %v3252_v34 = vmul.f32 %v7986_v31, %v7929_v10 }
 0x5cb   : > { %3353 = vadd.xlane.f32.xlu2 %v3352_v49  ;;  %3350 = vadd.xlane.f32.xlu1 %v3349_v57  ;;  %v3286_v49 = vsel %vm3163_vm14, %v3240_v52, 0.0  ;;  %v3283_v57 = vsel %vm3163_vm14, %v3239_v1, 0.0  ;;  %v3251_v52 = vmul.f32 %v7986_v31, %v7936_v39 }
 0x5cc   : > { %3347 = vadd.xlane.f32.xlu0 %v3346_v3  ;;  %v3256_v3 = vmul.f32 %v7986_v31, %v7758_v2 }
 0x5ce   : > { %v3334_v59 = vsel %vm3163_vm14, %v3256_v3, 0.0  ;;  %v3234_v3 = vmul.f32 %v7986_v31, %v7790_v16 }
 0x5d3   : > { %3299 = vadd.xlane.f32.xlu2 %v3298_v25  ;;  %3296 = vadd.xlane.f32.xlu1 %v3295_v20  ;;  %v3331_v25 = vsel %vm3163_vm14, %v3255_v50, 0.0  ;;  %v3328_v20 = vsel %vm3163_vm14, %v3254_v13, 0.0  ;;  %v3233_v50 = vmul.f32 %v7986_v31, %v7779_v47 }
 0x5d4   : > { %3293 = vadd.xlane.f32.xlu0 %v3292_v41  ;;  %v3238_v41 = vmul.f32 %v7986_v31, %v7774_v5 }
 0x5d6   : > { %v3280_v29 = vsel %vm3163_vm14, %v3238_v41, 0.0  ;;  %v3249_v41 = vmul.f32 %v7986_v31, %v7749_v9 }
 0x5db   : > { %3344 = vadd.xlane.f32.xlu2 %v3343_v56  ;;  %3341 = vadd.xlane.f32.xlu1 %v3340_v55  ;;  %v3277_v56 = vsel %vm3163_vm14, %v3237_v36, 0.0  ;;  %v3274_v55 = vsel %vm3163_vm14, %v3236_v30, 0.0  ;;  %v3313_v30 = vsel %vm3163_vm14, %v3249_v41, 0.0  ;;  %v9289_v41 = vunpack.c.l.bf16 %v7634_v61 }
 0x5dc   : > { %3338 = vadd.xlane.f32.xlu0 %v3337_v40  ;;  %v3253_v40 = vmul.f32 %v7986_v31, %v7916_v63 }
 0x5de   : > { %v3325_v1 = vsel %vm3163_vm14, %v3253_v40, 0.0 }
 0x5e3   : > { %3290 = vadd.xlane.f32.xlu2 %v3289_v60  ;;  %3287 = vadd.xlane.f32.xlu1 %v3286_v49  ;;  %v3322_v60 = vsel %vm3163_vm14, %v3252_v34, 0.0  ;;  %v3319_v49 = vsel %vm3163_vm14, %v3251_v52, 0.0  ;;  %v9285_v34 = vunpack.c.l.bf16 %v7632_v6 }
 0x5e4   : > { %3284 = vadd.xlane.f32.xlu0 %v3283_v57  ;;  %v3235_v57 = vmul.f32 %v7986_v31, %v7822_v27 }
 0x5e6   : > { %v3271_v13 = vsel %vm3163_vm14, %v3235_v57, 0.0 }
 0x5eb   : > { %3335 = vadd.xlane.f32.xlu2 %v3334_v59  ;;  %3332 = vadd.xlane.f32.xlu1 %v3331_v25  ;;  %v3268_v59 = vsel %vm3163_vm14, %v3234_v3, 0.0  ;;  %v3265_v25 = vsel %vm3163_vm14, %v3233_v50, 0.0 }
 0x5ec   : > { %3329 = vadd.xlane.f32.xlu0 %v3328_v20  ;;  %v3250_v20 = vmul.f32 %v7986_v31, %v7743_v19  ;;  %v5928_v31 = vpack.i.bf16 %v7749_v9, %v7779_v47  ;;  %v5930_v9 = vpack.i.bf16 %v7743_v19, %v7790_v16  ;;  %v9290_v19 = vunpack.c.l.bf16 %v7684_v17 }
 0x5ee   : > { %v3316_v36 = vsel %vm3163_vm14, %v3250_v20, 0.0 }
 0x5f3   : > { %3281 = vadd.xlane.f32.xlu2 %v3280_v29  ;;  %3278 = vadd.xlane.f32.xlu1 %v3277_v56 }
 0x5f4   : > { %3275 = vadd.xlane.f32.xlu0 %v3274_v55  ;;  %v9284_v55 = vunpack.c.l.bf16 %v7718_v7 }
 0x5fb   : > { %3326 = vadd.xlane.f32.xlu2 %v3325_v1  ;;  %3323 = vadd.xlane.f32.xlu1 %v3322_v60  ;;  %v9286_v60 = vunpack.c.l.bf16 %v7630_v44 }
 0x5fc   : > { %3320 = vadd.xlane.f32.xlu0 %v3319_v49 }
 0x603   : > { %3272 = vadd.xlane.f32.xlu2 %v3271_v13  ;;  %3269 = vadd.xlane.f32.xlu1 %v3268_v59  ;;  %v9287_v59 = vunpack.c.l.bf16 %v7716_v14 }
 0x604   : > { %3266 = vadd.xlane.f32.xlu0 %v3265_v25  ;;  %v9288_v25 = vunpack.c.l.bf16 %v7636_v45 }
 0x60b   : > { %3317 = vadd.xlane.f32.xlu2 %v3316_v36  ;;  %3314 = vadd.xlane.f32.xlu1 %v3313_v30 }
 0x62e   : > { %v3360_v29 = vpop.xlane.xlu2 %3359  ;;  %v3312_v56 = vpop.xlane.xlu1 %3311 }
 0x62f   : > { %v3392_v40 = vsub.f32 %v9284_v55, %v3360_v29  ;;  %v3376_v52 = vsub.f32 %v9285_v34, %v3312_v56  ;;  %v3309_v1 = vpop.xlane.xlu0 %3308 }
 0x630   : > { %v3375_v49 = vsub.f32 %v9286_v60, %v3309_v1  ;;  %v9292_v1 = vunpack.c.l.bf16 %v7692_v12 }
 0x631   : > { %v3455_v57 = vmul.f32 1.442695, %v3392_v40  ;;  %v3423_v3 = vmul.f32 1.442695, %v3376_v52  ;;  %v9291_v40 = vunpack.c.l.bf16 %v7682_v8 }
 0x632   : > { %v3421_v50 = vmul.f32 1.442695, %v3375_v49  ;;  %v5932_v49 = vpack.i.bf16 %v7936_v39, %v7822_v27 }
 0x633   : > { %5966 = vpow2.f32 %v3455_v57 }
 0x634   : > { %5968 = vpow2.f32 %v3423_v3  ;;  %5929 = vxpose.xlu2.b32.start [1/16] (narrow) %v5928_v31, 8 }
 0x635   : > { %5970 = vpow2.f32 %v3421_v50 }
 0x636   : > { %v3357_v13 = vpop.xlane.xlu2 %3356  ;;  %v3306_v7 = vpop.xlane.xlu1 %3305 }
 0x637   : > { %v3391_v6 = vsub.f32 %v9287_v59, %v3357_v13  ;;  %v3374_v20 = vsub.f32 %v9288_v25, %v3306_v7  ;;  %v3303_v44 = vpop.xlane.xlu0 %3302  ;;  %v9293_v7 = vunpack.c.l.bf16 %v7585_v24 }
 0x638   : > { %v3373_v36 = vsub.f32 %v9289_v41, %v3303_v44  ;;  %v9295_v44 = vunpack.c.l.bf16 %v7568_v23 }
 0x639   : > { %v8100_v47 = vpop.eup %5966  ;;  %v3453_v30 = vmul.f32 1.442695, %v3391_v6  ;;  %v3419_v29 = vmul.f32 1.442695, %v3374_v20  ;;  %v9294_v6 = vunpack.c.l.bf16 %v7583_v32 }
 0x63a   : > { %v8102_v56 = vpop.eup %5968  ;;  %v3417_v55 = vmul.f32 1.442695, %v3373_v36  ;;  %3541 = vmatpush.msra.mxu1 %v8100_v47  ;;  %v5934_v36 = vpack.i.bf16 %v7929_v10, %v7827_v58 }
 0x63b   : > { %5972 = vpow2.f32 %v3453_v30  ;;  %3521 = vmatpush.msra.mxu0 %v8102_v56  ;;  %v8106_v45 = vpop.eup %5970 }
 0x63c   : > { %5974 = vpow2.f32 %v3419_v29  ;;  %5931 = vxpose.xlu2.b32.cont [2/16] (narrow) %v5930_v9, 8 }
 0x63d   : > { %3522 = vmatpush.msra.mxu0 %v8106_v45  ;;  %5976 = vpow2.f32 %v3417_v55 }
 0x63e   : > { %v3354_v61 = vpop.xlane.xlu2 %3353  ;;  %v3351_v14 = vpop.xlane.xlu1 %3350 }
 0x63f   : > { %v3390_v16 = vsub.f32 %v9290_v19, %v3354_v61  ;;  %v3389_v34 = vsub.f32 %v9291_v40, %v3351_v14  ;;  %v3348_v52 = vpop.xlane.xlu0 %3347  ;;  %v9296_v14 = vunpack.c.l.bf16 %v7690_v22 }
 0x640   : > { %v3388_v60 = vsub.f32 %v9292_v1, %v3348_v52  ;;  %v9299_v1 = vld [vmem:[#allocation81_spill] sm:$0xff] }
 0x641   : > { %v8117_v31 = vpop.eup %5972  ;;  %v3451_v57 = vmul.f32 1.442695, %v3390_v16  ;;  %v3449_v3 = vmul.f32 1.442695, %v3389_v34  ;;  %v9297_v16 = vld [vmem:[#allocation82_spill] sm:$0xff] }
 0x642   : > { %v8119_v50 = vpop.eup %5974  ;;  %3542 = vmatpush.msra.mxu1 %v8117_v31  ;;  %v3447_v17 = vmul.f32 1.442695, %v3388_v60  ;;  %v9298_v40 = vunpack.c.l.bf16 %v9297_v16  ;;  %v9300_v60 = vunpack.c.l.bf16 %v9299_v1 }
 0x643   : > { %5978 = vpow2.f32 %v3451_v57  ;;  %3523 = vmatpush.msra.mxu0 %v8119_v50  ;;  %v8123_v8 = vpop.eup %5976  ;;  %v5936_v57 = vpack.i.bf16 %v7916_v63, %v7769_v35 }
 0x644   : > { %5933 = vxpose.xlu2.b32.cont [3/16] (narrow) %v5932_v49, 8  ;;  %5980 = vpow2.f32 %v3449_v3 }
 0x645   : > { %3524 = vmatpush.msra.mxu0 %v8123_v8  ;;  %5982 = vpow2.f32 %v3447_v17 }
 0x646   : > { %v3300_v12 = vpop.xlane.xlu2 %3299  ;;  %v3297_v13 = vpop.xlane.xlu1 %3296 }
 0x647   : > { %v3372_v59 = vsub.f32 %v9293_v7, %v3300_v12  ;;  %v3371_v25 = vsub.f32 %v9294_v6, %v3297_v13  ;;  %v3294_v20 = vpop.xlane.xlu0 %3293  ;;  %v9301_v6 = vld [vmem:[#allocation64_spill] sm:$0xff] }
 0x648   : > { %v3370_v41 = vsub.f32 %v9295_v44, %v3294_v20  ;;  %v9303_v44 = vld [vmem:[#allocation70_spill] sm:$0xff] }
 0x649   : > { %v8134_v9 = vpop.eup %5978  ;;  %v3415_v30 = vmul.f32 1.442695, %v3372_v59  ;;  %v3413_v29 = vmul.f32 1.442695, %v3371_v25  ;;  %v9302_v25 = vunpack.c.l.bf16 %v9301_v6 }
 0x64a   : > { %3543 = vmatpush.msra.mxu1 %v8134_v9  ;;  %v8137_v55 = vpop.eup %5980  ;;  %v3411_v24 = vmul.f32 1.442695, %v3370_v41  ;;  %v9304_v41 = vunpack.c.l.bf16 %v9303_v44 }
 0x64b   : > { %5984 = vpow2.f32 %v3415_v30  ;;  %v8140_v32 = vpop.eup %5982 }
 0x64c   : > { %3544 = vmatpush.msra.mxu1 %v8137_v55  ;;  %5935 = vxpose.xlu2.b32.cont [4/16] (narrow) %v5934_v36, 8  ;;  %5986 = vpow2.f32 %v3413_v29  ;;  %v9305_v29 = vld [vmem:[#allocation69_spill] sm:$0xff] }
 0x64d   : > { %5988 = vpow2.f32 %v3411_v24  ;;  %v9306_v24 = vunpack.c.l.bf16 %v9305_v29 }
 0x64e   : > { %3545 = vmatpush.msra.mxu1 %v8140_v32  ;;  %v3345_v23 = vpop.xlane.xlu2 %3344  ;;  %v3342_v61 = vpop.xlane.xlu1 %3341 }
 0x64f   : > { %v3387_v19 = vsub.f32 %v9296_v14, %v3345_v23  ;;  %v3386_v34 = vsub.f32 %v9298_v40, %v3342_v61  ;;  %v3339_v52 = vpop.xlane.xlu0 %3338  ;;  %v5938_v61 = vpack.i.bf16 %v7921_v43, %v7774_v5 }
 0x650   : > { %v3385_v49 = vsub.f32 %v9300_v60, %v3339_v52  ;;  %v9307_v60 = vld [vmem:[#allocation76_spill] sm:$0xff] }
 0x651   : > { %v8151_v3 = vpop.eup %5984  ;;  %v3445_v17 = vmul.f32 1.442695, %v3387_v19  ;;  %v3443_v12 = vmul.f32 1.442695, %v3386_v34 }
 0x652   : > { %3525 = vmatpush.msra.mxu0 %v8151_v3  ;;  %v8154_v13 = vpop.eup %5986  ;;  %v3441_v22 = vmul.f32 1.442695, %v3385_v49  ;;  %v9308_v49 = vunpack.c.l.bf16 %v9307_v60  ;;  %v9317_v60 = vld [vmem:[#allocation72_spill] sm:$0xff] }
 0x653   : > { %5990 = vpow2.f32 %v3445_v17  ;;  %v8157_v7 = vpop.eup %5988  ;;  %v9309_v17 = vld [vmem:[#allocation75_spill] sm:$0xff] }
 0x654   : > { %3526 = vmatpush.msra.mxu0 %v8154_v13  ;;  %5937 = vxpose.xlu2.b32.cont [5/16] (narrow) %v5936_v57, 8  ;;  %5992 = vpow2.f32 %v3443_v12  ;;  %v9310_v12 = vunpack.c.l.bf16 %v9309_v17  ;;  %v5942_v17 = vpack.i.bf16 %v7758_v2, %v7815_v62  ;;  %v9319_v62 = vld [vmem:[#allocation77_spill] sm:$0xff] }
 0x655   : > { %5994 = vpow2.f32 %v3441_v22 }
 0x656   : > { %3527 = vmatpush.msra.mxu0 %v8157_v7  ;;  %v3291_v59 = vpop.xlane.xlu2 %3290  ;;  %v3288_v35 = vpop.xlane.xlu1 %3287 }
 0x657   : > { %v3369_v20 = vsub.f32 %v9302_v25, %v3291_v59  ;;  %v3368_v36 = vsub.f32 %v9304_v41, %v3288_v35  ;;  %v3285_v30 = vpop.xlane.xlu0 %3284  ;;  %v9311_v35 = vld [vmem:[#allocation78_spill] sm:$0xff] }
 0x658   : > { %v3367_v23 = vsub.f32 %v9306_v24, %v3285_v30  ;;  %v9312_v6 = vunpack.c.l.bf16 %v9311_v35 }
 0x659   : > { %v8168_v14 = vpop.eup %5990  ;;  %v3409_v19 = vmul.f32 1.442695, %v3369_v20  ;;  %v3407_v16 = vmul.f32 1.442695, %v3368_v36  ;;  %v5940_v20 = vpack.i.bf16 %v7763_v53, %v7810_v51  ;;  %v9313_v51 = vld [vmem:[#allocation66_spill] sm:$0xff] }
 0x65a   : > { %3546 = vmatpush.msra.mxu1 %v8168_v14  ;;  %v8171_v40 = vpop.eup %5992  ;;  %v3405_v34 = vmul.f32 1.442695, %v3367_v23 }
 0x65b   : > { %5996 = vpow2.f32 %v3409_v19  ;;  %v8174_v52 = vpop.eup %5994 }
 0x65c   : > { %3547 = vmatpush.msra.mxu1 %v8171_v40  ;;  %5939 = vxpose.xlu2.b32.cont [6/16] (narrow) %v5938_v61, 8  ;;  %5998 = vpow2.f32 %v3407_v16  ;;  %v9314_v61 = vunpack.c.l.bf16 %v9313_v51  ;;  %v9315_v16 = vld [vmem:[#allocation65_spill] sm:$0xff] }
 0x65d   : > { %6000 = vpow2.f32 %v3405_v34  ;;  %v9316_v34 = vunpack.c.l.bf16 %v9315_v16 }
 0x65e   : > { %3548 = vmatpush.msra.mxu1 %v8174_v52  ;;  %v3336_v1 = vpop.xlane.xlu2 %3335  ;;  %v3333_v5 = vpop.xlane.xlu1 %3332 }
 0x65f   : > { %v3384_v57 = vsub.f32 %v9308_v49, %v3336_v1  ;;  %v3383_v22 = vsub.f32 %v9310_v12, %v3333_v5  ;;  %v3330_v59 = vpop.xlane.xlu0 %3329  ;;  %v9318_v49 = vunpack.c.l.bf16 %v9317_v60 }
 0x660   : > { %v3382_v25 = vsub.f32 %v9312_v6, %v3330_v59 }
 0x661   : > { %v8185_v44 = vpop.eup %5996  ;;  %v3439_v41 = vmul.f32 1.442695, %v3384_v57  ;;  %v3437_v36 = vmul.f32 1.442695, %v3383_v22 }
 0x662   : > { %3528 = vmatpush.msra.mxu0 %v8185_v44  ;;  %v8188_v30 = vpop.eup %5998  ;;  %v3435_v29 = vmul.f32 1.442695, %v3382_v25 }
 0x663   : > { %6002 = vpow2.f32 %v3439_v41  ;;  %v8191_v24 = vpop.eup %6000  ;;  %v9320_v41 = vunpack.c.l.bf16 %v9319_v62 }
 0x664   : > { %3529 = vmatpush.msra.mxu0 %v8188_v30  ;;  %5941 = vxpose.xlu2.b32.cont [7/16] (narrow) %v5940_v20, 8  ;;  %6004 = vpow2.f32 %v3437_v36 }
 0x665   : > { %6006 = vpow2.f32 %v3435_v29  ;;  %v9321_v29 = vld [vmem:[#allocation80_spill] sm:$0xff] }
 0x666   : > { %3530 = vmatpush.msra.mxu0 %v8191_v24  ;;  %v3282_v23 = vpop.xlane.xlu2 %3281  ;;  %v3279_v53 = vpop.xlane.xlu1 %3278 }
 0x667   : > { %v3366_v19 = vsub.f32 %v9314_v61, %v3282_v23  ;;  %v3365_v1 = vsub.f32 %v9316_v34, %v3279_v53  ;;  %v3276_v5 = vpop.xlane.xlu0 %3275  ;;  %v9322_v23 = vunpack.c.l.bf16 %v9321_v29  ;;  %v9323_v61 = vld [vmem:[#allocation79_spill] sm:$0xff]  ;;  %v5944_v34 = vpack.i.bf16 %v7963_v26, %v7784_v48 }
 0x668   : > { %v3364_v57 = vsub.f32 %v9318_v49, %v3276_v5  ;;  %v9329_v29 = vld [vmem:[#allocation67_spill] sm:$0xff] }
 0x669   : > { %v8202_v12 = vpop.eup %6002  ;;  %v3403_v22 = vmul.f32 1.442695, %v3366_v19  ;;  %v3401_v59 = vmul.f32 1.442695, %v3365_v1  ;;  %v9324_v19 = vunpack.c.l.bf16 %v9323_v61 }
 0x66a   : > { %3549 = vmatpush.msra.mxu1 %v8202_v12  ;;  %v8205_v35 = vpop.eup %6004  ;;  %v3399_v6 = vmul.f32 1.442695, %v3364_v57 }
 0x66b   : > { %6008 = vpow2.f32 %v3403_v22  ;;  %v8208_v25 = vpop.eup %6006 }
 0x66c   : > { %3550 = vmatpush.msra.mxu1 %v8205_v35  ;;  %5943 = vxpose.xlu2.b32.cont [8/16] (narrow) %v5942_v17, 8  ;;  %6010 = vpow2.f32 %v3401_v59  ;;  %v9325_v59 = vld [vmem:[#allocation71_spill] sm:$0xff] }
 0x66d   : > { %6012 = vpow2.f32 %v3399_v6  ;;  %v9326_v6 = vunpack.c.l.bf16 %v9325_v59 }
 0x66e   : > { %3551 = vmatpush.msra.mxu1 %v8208_v25  ;;  %v3327_v20 = vpop.xlane.xlu2 %3326  ;;  %v3324_v2 = vpop.xlane.xlu1 %3323 }
 0x66f   : > { %v3381_v36 = vsub.f32 %v9320_v41, %v3327_v20  ;;  %v3380_v53 = vsub.f32 %v9322_v23, %v3324_v2  ;;  %v3321_v51 = vpop.xlane.xlu0 %3320  ;;  %v9327_v2 = vld [vmem:[#allocation68_spill] sm:$0xff]  ;;  %v9330_v23 = vunpack.c.l.bf16 %v9329_v29 }
 0x670   : > { %v3379_v16 = vsub.f32 %v9324_v19, %v3321_v51  ;;  %v9328_v62 = vunpack.c.l.bf16 %v9327_v2  ;;  %v5946_v51 = vpack.i.bf16 %v7955_v54, %v7832_v0 }
 0x671   : > { %v8219_v1 = vpop.eup %6008  ;;  %v3433_v5 = vmul.f32 1.442695, %v3381_v36  ;;  %v3431_v60 = vmul.f32 1.442695, %v3380_v53 }
 0x672   : > { %3531 = vmatpush.msra.mxu0 %v8219_v1  ;;  %v8222_v49 = vpop.eup %6010  ;;  %v3429_v57 = vmul.f32 1.442695, %v3379_v16 }
 0x673   : > { %6014 = vpow2.f32 %v3433_v5  ;;  %v8225_v17 = vpop.eup %6012 }
 0x674   : > { %3532 = vmatpush.msra.mxu0 %v8222_v49  ;;  %5945 = vxpose.xlu2.b32.cont [9/16] (narrow) %v5944_v34, 8  ;;  %6016 = vpow2.f32 %v3431_v60 }
 0x675   : > { %6018 = vpow2.f32 %v3429_v57 }
 0x676   : > { %3533 = vmatpush.msra.mxu0 %v8225_v17  ;;  %v3273_v22 = vpop.xlane.xlu2 %3272  ;;  %v3270_v48 = vpop.xlane.xlu1 %3269 }
 0x677   : > { %v3363_v20 = vsub.f32 %v9326_v6, %v3273_v22  ;;  %v3362_v41 = vsub.f32 %v9328_v62, %v3270_v48  ;;  %v3267_v36 = vpop.xlane.xlu0 %3266  ;;  %v9331_v48 = vld [vmem:[#allocation74_spill] sm:$0xff] }
 0x678   : > { %v3361_v53 = vsub.f32 %v9330_v23, %v3267_v36  ;;  %v9332_v59 = vunpack.c.l.bf16 %v9331_v48  ;;  %v5956_v48 = vpack.i.bf16 %v7973_v15, %v7857_v21 }
 0x679   : > { %v8236_v61 = vpop.eup %6014  ;;  %v3397_v19 = vmul.f32 1.442695, %v3363_v20  ;;  %v3395_v16 = vmul.f32 1.442695, %v3362_v41  ;;  %v9333_v20 = vld [vmem:[#allocation73_spill] sm:$0xff]  ;;  %v5948_v41 = vpack.i.bf16 %v7944_v4, %v7731_v11  ;;  %v6094_v11 = vld [vmem:[%s9090_s2 + $0x58] sm:$0xff] }
 0x67a   : > { %3552 = vmatpush.msra.mxu1 %v8236_v61  ;;  %v8239_v34 = vpop.eup %6016  ;;  %v3393_v5 = vmul.f32 1.442695, %v3361_v53  ;;  %v9334_v2 = vunpack.c.l.bf16 %v9333_v20 }
 0x67b   : > { %6020 = vpow2.f32 %v3397_v19  ;;  %v8242_v60 = vpop.eup %6018  ;;  %v5950_v19 = vpack.i.bf16 %v7949_v18, %v6094_v11 }
 0x67c   : > { %3553 = vmatpush.msra.mxu1 %v8239_v34  ;;  %5947 = vxpose.xlu2.b32.cont [10/16] (narrow) %v5946_v51, 8  ;;  %6022 = vpow2.f32 %v3395_v16 }
 0x67d   : > { %6024 = vpow2.f32 %v3393_v5 }
 0x67e   : > { %3554 = vmatpush.msra.mxu1 %v8242_v60  ;;  %v3318_v57 = vpop.xlane.xlu2 %3317  ;;  %v3315_v22 = vpop.xlane.xlu1 %3314 }
 0x67f   : > { %v3378_v6 = vsub.f32 %v9332_v59, %v3318_v57  ;;  %v3377_v62 = vsub.f32 %v9334_v2, %v3315_v22  ;;  %v5952_v57 = vpack.i.bf16 %v7797_v28, %v7878_v33  ;;  %v5954_v22 = vpack.i.bf16 %v7805_v38, %v7890_v46 }
 0x680   : > { %v5958_v59 = vpack.i.bf16 %v7978_v42, %v7862_v37 }
 0x681   : > { %v8251_v36 = vpop.eup %6020  ;;  %v3427_v29 = vmul.f32 1.442695, %v3378_v6  ;;  %v3425_v23 = vmul.f32 1.442695, %v3377_v62 }
 0x682   : > { %3534 = vmatpush.msra.mxu0 %v8251_v36  ;;  %v8254_v53 = vpop.eup %6022 }
 0x683   : > { %6026 = vpow2.f32 %v3427_v29  ;;  %v8257_v51 = vpop.eup %6024  ;;  %v6096_v29 = vld [vmem:[%s9090_s2 + $0x8] sm:$0xff] }
 0x684   : > { %5949 = vxpose.xlu2.b32.cont [11/16] (narrow) %v5948_v41, 8  ;;  %3535 = vmatpush.msra.mxu0 %v8254_v53  ;;  %6028 = vpow2.f32 %v3425_v23  ;;  %v6095_v41 = vld [vmem:[%s9090_s2] sm:$0xff]  ;;  %v6097_v23 = vld [vmem:[%s9090_s2 + $0x50] sm:$0xff] }
 0x686   : > { %3536 = vmatpush.msra.mxu0 %v8257_v51 }
 0x689   : > { %v8264_v16 = vpop.eup %6026 }
 0x68a   : > { %3555 = vmatpush.msra.mxu1 %v8264_v16  ;;  %v8267_v5 = vpop.eup %6028 }
 0x68c   : > { %5951 = vxpose.xlu2.b32.cont [12/16] (narrow) %v5950_v19, 8  ;;  %3556 = vmatpush.msra.mxu1 %v8267_v5 }
 0x694   : > { %5953 = vxpose.xlu2.b32.cont [13/16] (narrow) %v5952_v57, 8 }
 0x69c   : > { %5955 = vxpose.xlu2.b32.cont [14/16] (narrow) %v5954_v22, 8 }
 0x6a4   : > { %5957 = vxpose.xlu2.b32.cont [15/16] (narrow) %v5956_v48, 8 }
 0x6ac   : > { %5959 = vxpose.xlu2.b32.end [16/16] (narrow) %v5958_v59, 8 }
 0x6cd   : > { %v8278_v6 = vpop.trf.xlu2 }
 0x6ce   : > { %9335 = vst [vmem:[#allocation82_spill] sm:$0xff] %v8278_v6  ;;  %v9151_v20 = vunpack.i.l.bf16 %v8278_v6  ;;  %v9150_v2 = vunpack.i.h.bf16 %v8278_v6 }
 0x6d0   : > { %3537 = vmatmul.f32.vlgmr.msra.gmra.mxu0 %v9151_v20  ;;  %3557 = vmatmul.f32.vlgmr.msra.gmra.mxu1 %v9150_v2 }
 0x74d   : > { %v3538_v28 = vpop.f32.mrf.mxu0  ;;  %v3558_v38 = vpop.f32.mrf.mxu1 }
 0x74e   : > { %v3559_v62 = vadd.f32 %v3558_v38, %v3538_v28 }
 0x750   : > { %5531 = vmatpush.msk.msrb.mxu1 %vm3657_vm13, %v3559_v62  ;;  %5764 = vmatpush.msk.msra.mxu2 %vm3657_vm13, %v3559_v62 }
 0x751   : > { %5765 = vmatpush.msk.msra.mxu3 %vm3657_vm13, %v3559_v62  ;;  %5532 = vmatmul.msk.f32.vlgmr.msrb.gmra.mxu1 %vm3163_vm14, %v6095_v41 }
 0x752   : > { %5541 = vmatmul.msk.f32.vlgmr.msra.gmra.mxu2 %vm3163_vm14, %v7832_v0  ;;  %5556 = vmatmul.msk.f32.vlgmr.msra.gmra.mxu3 %vm3163_vm14, %v7963_v26  ;;  %v6098_v0 = vld [vmem:[%s9090_s2 + $0x20] sm:$0xff]  ;;  %v6108_v26 = vld [vmem:[%s9090_s2 + $0xb8] sm:$0xff] }
 0x759   : > { %5533 = vmatmul.msk.f32.gmra.mxu1 %vm3163_vm14, %v6096_v29 }
 0x75a   : > { %5542 = vmatmul.msk.f32.gmra.mxu2 %vm3163_vm14, %v6097_v23  ;;  %5557 = vmatmul.msk.f32.gmra.mxu3 %vm3163_vm14, %v7955_v54  ;;  %v6107_v54 = vld [vmem:[%s9090_s2 + $0xb0] sm:$0xff] }
 0x761   : > { %5534 = vmatmul.msk.f32.gmra.mxu1 %vm3163_vm14, %v7822_v27  ;;  %v6099_v27 = vld [vmem:[%s9090_s2 + $0xe0] sm:$0xff] }
 0x762   : > { %5543 = vmatmul.msk.f32.gmra.mxu2 %vm3163_vm14, %v6094_v11  ;;  %5558 = vmatmul.msk.f32.gmra.mxu3 %vm3163_vm14, %v7944_v4  ;;  %v6104_v4 = vld [vmem:[%s9090_s2 + $0x80] sm:$0xff] }
 0x769   : > { %5535 = vmatmul.msk.f32.gmra.mxu1 %vm3163_vm14, %v7827_v58  ;;  %v6100_v58 = vld [vmem:[%s9090_s2 + $0x28] sm:$0xff] }
 0x76a   : > { %5544 = vmatmul.msk.f32.gmra.mxu2 %vm3163_vm14, %v7878_v33  ;;  %5559 = vmatmul.msk.f32.gmra.mxu3 %vm3163_vm14, %v7949_v18  ;;  %v6101_v33 = vld [vmem:[%s9090_s2 + $0xe8] sm:$0xff] }
 0x76b   : > { %v6106_v18 = vld [vmem:[%s9090_s2 + $0x88] sm:$0xff] }
 0x771   : > { %5536 = vmatmul.msk.f32.gmra.mxu1 %vm3163_vm14, %v6098_v0 }
 0x772   : > { %5545 = vmatmul.msk.f32.gmra.mxu2 %vm3163_vm14, %v7890_v46  ;;  %5560 = vmatmul.msk.f32.gmra.mxu3 %vm3163_vm14, %v6099_v27  ;;  %v6102_v46 = vld [vmem:[%s9090_s2 + $0x30] sm:$0xff] }
 0x779   : > { %5537 = vmatmul.msk.f32.gmra.mxu1 %vm3163_vm14, %v6100_v58 }
 0x77a   : > { %5546 = vmatmul.msk.f32.gmra.mxu2 %vm3163_vm14, %v7857_v21  ;;  %5561 = vmatmul.msk.f32.gmra.mxu3 %vm3163_vm14, %v6101_v33  ;;  %v6103_v21 = vld [vmem:[%s9090_s2 + $0x38] sm:$0xff] }
 0x781   : > { %5538 = vmatmul.msk.f32.gmra.mxu1 %vm3163_vm14, %v6102_v46 }
 0x782   : > { %5547 = vmatmul.msk.f32.gmra.mxu2 %vm3163_vm14, %v7862_v37  ;;  %5562 = vmatmul.msk.f32.gmra.mxu3 %vm3163_vm14, %v7973_v15  ;;  %v6105_v37 = vld [vmem:[%s9090_s2 + $0x40] sm:$0xff] }
 0x789   : > { %5539 = vmatmul.msk.f32.gmra.mxu1 %vm3163_vm14, %v6103_v21 }
 0x78a   : > { %5548 = vmatmul.msk.f32.gmra.mxu2 %vm3163_vm14, %v6104_v4  ;;  %5563 = vmatmul.msk.f32.gmra.mxu3 %vm3163_vm14, %v7978_v42 }
 0x791   : > { %5540 = vmatmul.msk.f32.gmra.mxu1 %vm3163_vm14, %v6105_v37 }
 0x792   : > { %5549 = vmatmul.msk.f32.gmra.mxu2 %vm3163_vm14, %v6106_v18 }
 0x79a   : > { %5550 = vmatmul.msk.f32.gmra.mxu2 %vm3163_vm14, %v7936_v39 }
 0x7a2   : > { %5551 = vmatmul.msk.f32.gmra.mxu2 %vm3163_vm14, %v7929_v10 }
 0x7aa   : > { %5552 = vmatmul.msk.f32.gmra.mxu2 %vm3163_vm14, %v7916_v63 }
 0x7b2   : > { %5553 = vmatmul.msk.f32.gmra.mxu2 %vm3163_vm14, %v7921_v43 }
 0x7ba   : > { %5554 = vmatmul.msk.f32.gmra.mxu2 %vm3163_vm14, %v6107_v54 }
 0x7c2   : > { %5555 = vmatmul.msk.f32.gmra.mxu2 %vm3163_vm14, %v6108_v26 }
 0x7ce   : > { %v8380_v39 = vpop.f32.mrf.mxu1 }
 0x7d5   : > { %v3705_v10 = vpop.f32.mrf.mxu2  ;;  %v3750_v15 = vpop.f32.mrf.mxu3 }
 0x7d6   : > { %v3706_v63 = vadd.f32 1e-16, %v3705_v10  ;;  %v3751_v42 = vadd.f32 1e-16, %v3750_v15  ;;  %v3681_v11 = vpop.f32.mrf.mxu1 }
 0x7d7   : > { %v8382_v43 = vadd.f32 1e-16, %v3681_v11 }
 0x7d8   : > { %6030 = vrcp.f32 %v3706_v63  ;;  %v4143_v38 = vand.u32 2147483647, %v3751_v42  ;;  %v4145_v23 = vand.u32 2147483648, %v3751_v42  ;;  %vm4139_vm14 = vweird.f32 %v3751_v42 }
 0x7d9   : > { %6032 = vrcp.f32 %v3751_v42  ;;  %v3918_v58 = vand.u32 2147483647, %v3706_v63  ;;  %v3920_v21 = vand.u32 2147483648, %v3706_v63  ;;  %vm3914_vm0 = vweird.f32 %v3706_v63 }
 0x7da   : > { %6034 = vrcp.f32 %v8382_v43  ;;  %vm8398_vm15 = vcmp.eq.f32.partialorder %v4143_v38, 8.507059e+37  ;;  %v4146_v54 = vor.u32 1.1754944e-38, %v4145_v23  ;;  %vm3794_vm4 = vweird.f32 %v8382_v43 }
 0x7db   : > { %vm8402_vm3 = vcmp.eq.f32.partialorder %v3918_v58, 8.507059e+37 }
 0x7dd   : > { %v3708_v19 = vpop.f32.mrf.mxu2  ;;  %v3753_v57 = vpop.f32.mrf.mxu3 }
 0x7de   : > { %v6031_v22 = vpop.eup %6030  ;;  %v8385_v48 = vadd.f32 1e-16, %v3708_v19  ;;  %v8387_v59 = vadd.f32 1e-16, %v3753_v57  ;;  %v3684_v28 = vpop.f32.mrf.mxu1 }
 0x7df   : > { %v6033_v62 = vpop.eup %6032  ;;  %v3910_v41 = vmul.f32 %v6031_v22, %v3706_v63  ;;  %v8389_v29 = vadd.f32 1e-16, %v3684_v28  ;;  %vm3915_vm1 = vweird.f32 %v6031_v22  ;;  %v3921_v28 = vor.u32 1.1754944e-38, %v3920_v21 }
 0x7e0   : > { %v8391_v0 = vpop.eup %6034  ;;  %v4135_v27 = vmul.f32 %v6033_v62, %v3751_v42  ;;  %6036 = vrcp.f32 %v8385_v48  ;;  %vm4140_vm2 = vweird.f32 %v6033_v62  ;;  %vm3916_vm5 = vmor %vm3914_vm0, %vm3915_vm1  ;;  %vm4154_vm10 = vweird.f32 %v8387_v59 }
 0x7e1   : > { %v3911_v33 = vsub.f32 1.0, %v3910_v41  ;;  %v3790_v46 = vmul.f32 %v8391_v0, %v8382_v43  ;;  %6038 = vrcp.f32 %v8387_v59  ;;  %v3798_v41 = vand.u32 2147483647, %v8382_v43  ;;  %vm4141_vm7 = vmor %vm4139_vm14, %vm4140_vm2 }
 0x7e2   : > { %v4136_v4 = vsub.f32 1.0, %v4135_v27  ;;  %6040 = vrcp.f32 %v8389_v29  ;;  %vm3795_vm6 = vweird.f32 %v8391_v0  ;;  %vm3929_vm14 = vweird.f32 %v8385_v48 }
 0x7e3   : > { %v3791_v18 = vsub.f32 1.0, %v3790_v46  ;;  %v3912_v26 = vmul.f32 %v6031_v22, %v3911_v33  ;;  %vm8438_vm8 = vmor %vm3794_vm4, %vm3795_vm6  ;;  %vm8449_vm9 = vcmp.eq.f32.partialorder %v3798_v41, 8.507059e+37  ;;  %vm3809_vm0 = vweird.f32 %v8389_v29 }
 0x7e4   : > { %v4137_v10 = vmul.f32 %v6033_v62, %v4136_v4 }
 0x7e5   : > { %v3711_v11 = vpop.f32.mrf.mxu2  ;;  %v3756_v19 = vpop.f32.mrf.mxu3  ;;  %v3913_v57 = vadd.f32 %v6031_v22, %v3912_v26  ;;  %v3792_v38 = vmul.f32 %v8391_v0, %v3791_v18  ;;  %v4158_v26 = vand.u32 2147483647, %v8387_v59 }
 0x7e6   : > { %v8409_v27 = vpop.eup %6036  ;;  %v8411_v23 = vadd.f32 1e-16, %v3711_v11  ;;  %v8413_v33 = vadd.f32 1e-16, %v3756_v19  ;;  %v4138_v58 = vadd.f32 %v6033_v62, %v4137_v10  ;;  %v3687_v4 = vpop.f32.mrf.mxu1  ;;  %v3800_v11 = vand.u32 2147483648, %v8382_v43 }
 0x7e7   : > { %v6039_v46 = vpop.eup %6038  ;;  %v3925_v21 = vmul.f32 %v8409_v27, %v8385_v48  ;;  %v3917_v18 = vsel %vm3916_vm5, %v6031_v22, %v3913_v57  ;;  %v3793_v20 = vadd.f32 %v8391_v0, %v3792_v38  ;;  %v4160_v22 = vand.u32 2147483648, %v8387_v59 }
 0x7e8   : > { %v8424_v19 = vpop.eup %6040  ;;  %v4150_v63 = vmul.f32 %v6039_v46, %v8387_v59  ;;  %v4142_v10 = vsel %vm4141_vm7, %v6033_v62, %v4138_v58  ;;  %v3922_v2 = vsel %vm8402_vm3, %v3921_v28, %v3917_v18  ;;  %6042 = vrcp.f32 %v8413_v33 }
 0x7e9   : > { %v3926_v6 = vsub.f32 1.0, %v3925_v21  ;;  %v4147_v42 = vsel %vm8398_vm15, %v4146_v54, %v4142_v10  ;;  %6044 = vrcp.f32 %v8411_v23  ;;  %v3923_v28 = vmul.f32 %v8157_v7, %v3922_v2 }
 0x7ea   : > { %v4151_v62 = vsub.f32 1.0, %v4150_v63  ;;  %v4148_v15 = vmul.f32 %v8174_v52, %v4147_v42  ;;  %v3805_v37 = vmul.f32 %v8424_v19, %v8389_v29  ;;  %v8447_v54 = vadd.f32 1e-16, %v3687_v4 }
 0x7eb   : > { %v3801_v43 = vor.u32 1.1754944e-38, %v3800_v11  ;;  %4301 = vperm.xlu1 %5856, %v3923_v28   ;;  %vm4155_vm11 = vweird.f32 %v6039_v46  ;;  %v3797_v7 = vsel %vm8438_vm8, %v8391_v0, %v3793_v20  ;;  %vm8457_vm12 = vcmp.eq.f32.partialorder %v4158_v26, 8.507059e+37 }
 0x7ec   : > { %4376 = vperm.xlu0 %5845, %v4148_v15   ;;  %v4152_v58 = vmul.f32 %v6039_v46, %v4151_v62  ;;  %v4161_v41 = vor.u32 1.1754944e-38, %v4160_v22  ;;  %v3927_v4 = vmul.f32 %v8409_v27, %v3926_v6  ;;  %v3933_v63 = vand.u32 2147483647, %v8385_v48  ;;  %vm4156_vm15 = vmor %vm4154_vm10, %vm4155_vm11 }
 0x7ed   : > { %v3714_v52 = vpop.f32.mrf.mxu2  ;;  %v3759_v2 = vpop.f32.mrf.mxu3  ;;  %v3935_v10 = vand.u32 2147483648, %v8385_v48  ;;  %v3806_v20 = vsub.f32 1.0, %v3805_v37  ;;  %6046 = vrcp.f32 %v8447_v54  ;;  %v3802_v6 = vsel %vm8449_vm9, %v3801_v43, %v3797_v7 }
 0x7ee   : > { %v8463_v18 = vadd.f32 1e-16, %v3759_v2  ;;  %v4153_v11 = vadd.f32 %v6039_v46, %v4152_v58  ;;  %v6043_v42 = vpop.eup %6042  ;;  %v3928_v57 = vadd.f32 %v8409_v27, %v3927_v4  ;;  %vm3930_vm1 = vweird.f32 %v8409_v27  ;;  %v3690_v62 = vpop.f32.mrf.mxu1 }
 0x7ef   : > { %v8474_v0 = vpop.eup %6044  ;;  %v4165_v26 = vmul.f32 %v6043_v42, %v8413_v33  ;;  %v4173_v15 = vand.u32 2147483647, %v8413_v33  ;;  %v3813_v28 = vand.u32 2147483647, %v8389_v29  ;;  %v3803_v43 = vmul.f32 %v8254_v53, %v3802_v6  ;;  %vm8496_vm4 = vmor %vm3929_vm14, %vm3930_vm1 }
 0x7f0   : > { %v4157_v22 = vsel %vm4156_vm15, %v6039_v46, %v4153_v11  ;;  %6048 = vrcp.f32 %v8463_v18  ;;  %vm8486_vm2 = vcmp.eq.f32.partialorder %v3933_v63, 8.507059e+37  ;;  %v3940_v58 = vmul.f32 %v8474_v0, %v8411_v23 }
 0x7f1   : > { %v4162_v59 = vsel %vm8457_vm12, %v4161_v41, %v4157_v22  ;;  %v4166_v37 = vsub.f32 1.0, %v4165_v26  ;;  %vm4169_vm3 = vweird.f32 %v8413_v33  ;;  %v4175_v7 = vand.u32 2147483648, %v8413_v33 }
 0x7f2   : > { %v4163_v38 = vmul.f32 %v8171_v40, %v4162_v59  ;;  %v3936_v40 = vor.u32 1.1754944e-38, %v3935_v10  ;;  %vm4170_vm5 = vweird.f32 %v6043_v42  ;;  %v3932_v21 = vsel %vm8496_vm4, %v8409_v27, %v3928_v57 }
 0x7f3   : > { %4261 = vperm.xlu1 %5856, %v3803_v43   ;;  %v4167_v53 = vmul.f32 %v6043_v42, %v4166_v37  ;;  %v3807_v41 = vmul.f32 %v8424_v19, %v3806_v20  ;;  %v8504_v4 = vpop.eup %6046  ;;  %v8506_v11 = vadd.f32 1e-16, %v3714_v52  ;;  %v8508_v48 = vadd.f32 1e-16, %v3690_v62  ;;  %vm4171_vm8 = vmor %vm4169_vm3, %vm4170_vm5 }
 0x7f4   : > { %4381 = vperm.xlu0 %5845, %v4163_v38   ;;  %vm8510_vm6 = vcmp.eq.f32.partialorder %v4173_v15, 8.507059e+37  ;;  %vm3810_vm7 = vweird.f32 %v8424_v19  ;;  %v3815_v20 = vand.u32 2147483648, %v8389_v29  ;;  %v3941_v52 = vsub.f32 1.0, %v3940_v58 }
 0x7f5   : > { %v3717_v63 = vpop.f32.mrf.mxu2  ;;  %v3762_v6 = vpop.f32.mrf.mxu3  ;;  %v4168_v27 = vadd.f32 %v6043_v42, %v4167_v53  ;;  %v4176_v62 = vor.u32 1.1754944e-38, %v4175_v7  ;;  %v3937_v59 = vsel %vm8486_vm2, %v3936_v40, %v3932_v21  ;;  %v3808_v15 = vadd.f32 %v8424_v19, %v3807_v41  ;;  %vm8536_vm9 = vmor %vm3809_vm0, %vm3810_vm7 }
 0x7f6   : > { %v8515_v26 = vadd.f32 1e-16, %v3717_v63  ;;  %v8517_v22 = vadd.f32 1e-16, %v3762_v6  ;;  %v6049_v57 = vpop.eup %6048  ;;  %v8528_v37 = vmul.f32 %v8504_v4, %v8447_v54  ;;  %v4188_v58 = vand.u32 2147483647, %v8463_v18  ;;  %v3693_v29 = vpop.f32.mrf.mxu1 }
 0x7f7   : > { %v4180_v38 = vmul.f32 %v6049_v57, %v8463_v18  ;;  %v4172_v43 = vsel %vm4171_vm8, %v6043_v42, %v4168_v27  ;;  %v4190_v7 = vand.u32 2147483648, %v8463_v18  ;;  %v3938_v40 = vmul.f32 %v8154_v13, %v3937_v59 }
 0x7f8   : > { %6050 = vrcp.f32 %v8515_v26  ;;  %v4177_v46 = vsel %vm8510_vm6, %v4176_v62, %v4172_v43  ;;  %v3816_v53 = vor.u32 1.1754944e-38, %v3815_v20  ;;  %v3812_v21 = vsel %vm8536_vm9, %v8424_v19, %v3808_v15 }
 0x7f9   : > { %6052 = vrcp.f32 %v8517_v22  ;;  %v4181_v2 = vsub.f32 1.0, %v4180_v38  ;;  %v4178_v42 = vmul.f32 %v8168_v14, %v4177_v46  ;;  %vm8551_vm10 = vcmp.eq.f32.partialorder %v3813_v28, 8.507059e+37 }
 0x7fa   : > { %6054 = vrcp.f32 %v8506_v11  ;;  %vm4184_vm11 = vweird.f32 %v8463_v18  ;;  %vm4185_vm12 = vweird.f32 %v6049_v57  ;;  %v3942_v13 = vmul.f32 %v8474_v0, %v3941_v52 }
 0x7fb   : > { %4306 = vperm.xlu1 %5856, %v3938_v40   ;;  %v4182_v63 = vmul.f32 %v6049_v57, %v4181_v2  ;;  %v3821_v14 = vsub.f32 1.0, %v8528_v37  ;;  %6056 = vrcp.f32 %v8508_v48  ;;  %vm8561_vm14 = vcmp.eq.f32.partialorder %v4188_v58, 8.507059e+37  ;;  %vm4186_vm15 = vmor %vm4184_vm11, %vm4185_vm12 }
 0x7fc   : > { %4386 = vperm.xlu0 %5845, %v4178_v42   ;;  %v4191_v28 = vor.u32 1.1754944e-38, %v4190_v7  ;;  %v8565_v20 = vadd.f32 1e-16, %v3693_v29  ;;  %v3817_v52 = vsel %vm8551_vm10, %v3816_v53, %v3812_v21  ;;  %vm3974_vm0 = vweird.f32 %v8515_v26 }
 0x7fd   : > { %v8559_v6 = vpop.f32.mrf.mxu2  ;;  %v3765_v10 = vpop.f32.mrf.mxu3  ;;  %v4183_v59 = vadd.f32 %v6049_v57, %v4182_v63  ;;  %v3978_v38 = vand.u32 2147483647, %v8515_v26  ;;  %v3980_v43 = vand.u32 2147483648, %v8515_v26  ;;  %v3943_v58 = vadd.f32 %v8474_v0, %v3942_v13 }
 0x7fe   : > { %v6051_v27 = vpop.eup %6050  ;;  %v8567_v62 = vadd.f32 1e-16, %v3765_v10  ;;  %vm3945_vm1 = vweird.f32 %v8474_v0  ;;  %v3818_v42 = vmul.f32 %v8251_v36, %v3817_v52  ;;  %vm3944_vm2 = vweird.f32 %v8411_v23 }
 0x7ff   : > { %v8571_v15 = vpop.eup %6052  ;;  %v3970_v37 = vmul.f32 %v6051_v27, %v8515_v26  ;;  %v4187_v46 = vsel %vm4186_vm15, %v6049_v57, %v4183_v59  ;;  %v3948_v57 = vand.u32 2147483647, %v8411_v23  ;;  %vm3975_vm3 = vweird.f32 %v6051_v27  ;;  %vm8599_vm5 = vmor %vm3944_vm2, %vm3945_vm1 }
 0x800   : > { %v4195_v33 = vmul.f32 %v8571_v15, %v8517_v22  ;;  %v8584_v7 = vpop.eup %6054  ;;  %6058 = vrcp.f32 %v8567_v62  ;;  %v4192_v18 = vsel %vm8561_vm14, %v4191_v28, %v4187_v46  ;;  %vm8595_vm4 = vcmp.eq.f32.partialorder %v3978_v38, 8.507059e+37  ;;  %vm3976_vm8 = vmor %vm3974_vm0, %vm3975_vm3 }
 0x801   : > { %v3971_v2 = vsub.f32 1.0, %v3970_v37  ;;  %v4193_v53 = vmul.f32 %v8140_v32, %v4192_v18  ;;  %v8593_v29 = vpop.eup %6056  ;;  %v3950_v36 = vand.u32 2147483648, %v8411_v23  ;;  %v3981_v32 = vor.u32 1.1754944e-38, %v3980_v43 }
 0x802   : > { %v4196_v40 = vsub.f32 1.0, %v4195_v33  ;;  %v3947_v13 = vsel %vm8599_vm5, %v8474_v0, %v3943_v58  ;;  %vm4199_vm6 = vweird.f32 %v8517_v22  ;;  %vm4200_vm7 = vweird.f32 %v8571_v15 }
 0x803   : > { %v3972_v21 = vmul.f32 %v6051_v27, %v3971_v2  ;;  %4266 = vperm.xlu1 %5856, %v3818_v42   ;;  %v3951_v52 = vor.u32 1.1754944e-38, %v3950_v36  ;;  %v4203_v37 = vand.u32 2147483647, %v8517_v22  ;;  %vm3949_vm9 = vcmp.eq.f32.partialorder %v3948_v57, 8.507059e+37  ;;  %vm8634_vm10 = vmor %vm4199_vm6, %vm4200_vm7  ;;  %v3696_v36 = vpop.f32.mrf.mxu1 }
 0x804   : > { %4391 = vperm.xlu0 %5845, %v4193_v53   ;;  %v4197_v10 = vmul.f32 %v8571_v15, %v4196_v40  ;;  %v4205_v0 = vand.u32 2147483648, %v8517_v22  ;;  %v3822_v2 = vmul.f32 %v8504_v4, %v3821_v14  ;;  %v3955_v18 = vmul.f32 %v8584_v7, %v8506_v11 }
 0x805   : > { %v3723_v19 = vpop.f32.mrf.mxu2  ;;  %v3768_v28 = vpop.f32.mrf.mxu3  ;;  %v3973_v59 = vadd.f32 %v6051_v27, %v3972_v21  ;;  %v3952_v46 = vsel %vm3949_vm9, %v3951_v52, %v3947_v13  ;;  %vm8640_vm11 = vcmp.eq.f32.partialorder %v4203_v37, 8.507059e+37  ;;  %vm3824_vm12 = vweird.f32 %v8447_v54 }
 0x806   : > { %v8611_v23 = vadd.f32 1e-16, %v3723_v19  ;;  %v8613_v38 = vadd.f32 1e-16, %v3768_v28  ;;  %v8619_v43 = vpop.eup %6058  ;;  %v4198_v58 = vadd.f32 %v8571_v15, %v4197_v10  ;;  %v3953_v57 = vmul.f32 %v8151_v3, %v3952_v46 }
 0x807   : > { %v3977_v33 = vsel %vm3976_vm8, %v6051_v27, %v3973_v59  ;;  %v4210_v42 = vmul.f32 %v8619_v43, %v8567_v62  ;;  %v4206_v22 = vor.u32 1.1754944e-38, %v4205_v0  ;;  %v3823_v41 = vadd.f32 %v8504_v4, %v3822_v2 }
 0x808   : > { %6060 = vrcp.f32 %v8611_v23  ;;  %v3982_v26 = vsel %vm8595_vm4, %v3981_v32, %v3977_v33  ;;  %v4202_v21 = vsel %vm8634_vm10, %v8571_v15, %v4198_v58  ;;  %vm3825_vm14 = vweird.f32 %v8504_v4 }
 0x809   : > { %6062 = vrcp.f32 %v8565_v20  ;;  %v3983_v14 = vmul.f32 %v8119_v50, %v3982_v26  ;;  %v4211_v53 = vsub.f32 1.0, %v4210_v42  ;;  %v3828_v50 = vand.u32 2147483647, %v8447_v54  ;;  %vm8656_vm15 = vmor %vm3824_vm12, %vm3825_vm14 }
 0x80a   : > { %6064 = vrcp.f32 %v8613_v38  ;;  %v8654_v63 = vadd.f32 1e-16, %v8559_v6  ;;  %v3830_v3 = vand.u32 2147483648, %v8447_v54  ;;  %v3827_v19 = vsel %vm8656_vm15, %v8504_v4, %v3823_v41 }
 0x80b   : > { %4311 = vperm.xlu1 %5856, %v3953_v57   ;;  %v4212_v15 = vmul.f32 %v8619_v43, %v4211_v53  ;;  %vm3829_vm0 = vcmp.eq.f32.partialorder %v3828_v50, 8.507059e+37  ;;  %vm4214_vm1 = vweird.f32 %v8567_v62  ;;  %vm4215_vm2 = vweird.f32 %v8619_v43 }
 0x80c   : > { %4321 = vperm.xlu0 %5845, %v3983_v14   ;;  %v3956_v28 = vsub.f32 1.0, %v3955_v18  ;;  %v4207_v54 = vsel %vm8640_vm11, %v4206_v22, %v4202_v21  ;;  %v3831_v52 = vor.u32 1.1754944e-38, %v3830_v3  ;;  %v4218_v33 = vand.u32 2147483647, %v8567_v62  ;;  %vm8687_vm3 = vmor %vm4214_vm1, %vm4215_vm2 }
 0x80d   : > { %v8662_v13 = vpop.f32.mrf.mxu2  ;;  %v3771_v10 = vpop.f32.mrf.mxu3  ;;  %v4213_v4 = vadd.f32 %v8619_v43, %v4212_v15  ;;  %v4220_v46 = vand.u32 2147483648, %v8567_v62  ;;  %6066 = vrcp.f32 %v8654_v63  ;;  %v3835_v42 = vmul.f32 %v8593_v29, %v8508_v48 }
 0x80e   : > { %v8669_v6 = vpop.eup %6060  ;;  %v8671_v59 = vadd.f32 1e-16, %v3771_v10  ;;  %v3832_v2 = vsel %vm3829_vm0, %v3831_v52, %v3827_v19  ;;  %v8693_v26 = vadd.f32 1e-16, %v3696_v36  ;;  %v4208_v40 = vmul.f32 %v8137_v55, %v4207_v54  ;;  %v3699_v10 = vpop.f32.mrf.mxu1 }
 0x80f   : > { %v8675_v37 = vpop.eup %6062  ;;  %v4000_v0 = vmul.f32 %v8669_v6, %v8611_v23  ;;  %v3833_v62 = vmul.f32 %v8225_v17, %v3832_v2  ;;  %v4221_v53 = vor.u32 1.1754944e-38, %v4220_v46  ;;  %v4217_v57 = vsel %vm8687_vm3, %v8619_v43, %v4213_v4 }
 0x810   : > { %v8682_v58 = vpop.eup %6064  ;;  %6068 = vrcp.f32 %v8671_v59  ;;  %v8698_v14 = vmul.f32 %v8675_v37, %v8565_v20  ;;  %vm8705_vm4 = vcmp.eq.f32.partialorder %v4218_v33, 8.507059e+37  ;;  %v3957_v21 = vmul.f32 %v8584_v7, %v3956_v28 }
 0x811   : > { %v4001_v27 = vsub.f32 1.0, %v4000_v0  ;;  %vm3960_vm5 = vweird.f32 %v8584_v7  ;;  %v4225_v41 = vmul.f32 %v8682_v58, %v8613_v38  ;;  %v3963_v55 = vand.u32 2147483647, %v8506_v11 }
 0x812   : > { %v3965_v17 = vand.u32 2147483648, %v8506_v11  ;;  %v3836_v43 = vsub.f32 1.0, %v3835_v42  ;;  %v3958_v32 = vadd.f32 %v8584_v7, %v3957_v21  ;;  %vm3959_vm6 = vweird.f32 %v8506_v11 }
 0x813   : > { %4271 = vperm.xlu1 %5856, %v3833_v62   ;;  %v4002_v50 = vmul.f32 %v8669_v6, %v4001_v27  ;;  %v8720_v3 = vpop.eup %6066  ;;  %v3851_v15 = vsub.f32 1.0, %v8698_v14  ;;  %6070 = vrcp.f32 %v8693_v26  ;;  %v4222_v19 = vsel %vm8705_vm4, %v4221_v53, %v4217_v57  ;;  %vm3961_vm7 = vmor %vm3959_vm6, %vm3960_vm5 }
 0x814   : > { %4396 = vperm.xlu0 %5845, %v4208_v40   ;;  %v3966_v28 = vor.u32 1.1754944e-38, %v3965_v17  ;;  %v3962_v52 = vsel %vm3961_vm7, %v8584_v7, %v3958_v32  ;;  %vm3964_vm8 = vcmp.eq.f32.partialorder %v3963_v55, 8.507059e+37  ;;  %vm4005_vm9 = vweird.f32 %v8669_v6 }
 0x815   : > { %v8716_v36 = vpop.f32.mrf.mxu2  ;;  %v4003_v11 = vadd.f32 %v8669_v6, %v4002_v50  ;;  %v4226_v0 = vsub.f32 1.0, %v4225_v41  ;;  %v4008_v33 = vand.u32 2147483647, %v8611_v23  ;;  %v4010_v46 = vand.u32 2147483648, %v8611_v23 }
 0x816   : > { %v8728_v54 = vpop.eup %6068  ;;  %v3967_v4 = vsel %vm3964_vm8, %v3966_v28, %v3962_v52  ;;  %v3985_v2 = vmul.f32 %v8720_v3, %v8654_v63  ;;  %v8737_v18 = vadd.f32 1e-16, %v3699_v10  ;;  %v4223_v42 = vmul.f32 %v8134_v9, %v4222_v19 }
 0x817   : > { %vm4004_vm10 = vweird.f32 %v8611_v23  ;;  %v4240_v7 = vmul.f32 %v8728_v54, %v8671_v59  ;;  %v3968_v27 = vmul.f32 %v8123_v8, %v3967_v4  ;;  %v3837_v40 = vmul.f32 %v8593_v29, %v3836_v43 }
 0x818   : > { %vm8744_vm11 = vmor %vm4004_vm10, %vm4005_vm9  ;;  %vm3839_vm12 = vweird.f32 %v8508_v48  ;;  %vm3840_vm14 = vweird.f32 %v8593_v29  ;;  %v3843_v9 = vand.u32 2147483647, %v8508_v48  ;;  %v3845_v23 = vand.u32 2147483648, %v8508_v48 }
 0x819   : > { %v4007_v62 = vsel %vm8744_vm11, %v8669_v6, %v4003_v11  ;;  %v8756_v53 = vpop.eup %6070  ;;  %vm4009_vm15 = vcmp.eq.f32.partialorder %v4008_v33, 8.507059e+37  ;;  %v4011_v8 = vor.u32 1.1754944e-38, %v4010_v46  ;;  %v3838_v57 = vadd.f32 %v8593_v29, %v3837_v40  ;;  %vm3841_vm0 = vmor %vm3839_vm12, %vm3840_vm14 }
 0x81a   : > { %v4227_v22 = vmul.f32 %v8682_v58, %v4226_v0  ;;  %vm3844_vm1 = vcmp.eq.f32.partialorder %v3843_v9, 8.507059e+37  ;;  %v3846_v6 = vor.u32 1.1754944e-38, %v3845_v23  ;;  %vm4229_vm2 = vweird.f32 %v8613_v38 }
 0x81b   : > { %4316 = vperm.xlu1 %5856, %v3968_v27   ;;  %vm4230_vm3 = vweird.f32 %v8682_v58  ;;  %v4012_v48 = vsel %vm4009_vm15, %v4011_v8, %v4007_v62  ;;  %v3842_v41 = vsel %vm3841_vm0, %v8593_v29, %v3838_v57  ;;  %v4233_v50 = vand.u32 2147483647, %v8613_v38 }
 0x81c   : > { %4401 = vperm.xlu0 %5845, %v4223_v42   ;;  %v4228_v55 = vadd.f32 %v8682_v58, %v4227_v22  ;;  %v3847_v17 = vsel %vm3844_vm1, %v3846_v6, %v3842_v41  ;;  %v4235_v43 = vand.u32 2147483648, %v8613_v38  ;;  %v3852_v32 = vmul.f32 %v8675_v37, %v3851_v15  ;;  %vm8771_vm4 = vmor %vm4229_vm2, %vm4230_vm3 }
 0x81d   : > { %v8760_v21 = vpop.f32.mrf.mxu2  ;;  %v3986_v10 = vsub.f32 1.0, %v3985_v2  ;;  %v3865_v19 = vmul.f32 %v8756_v53, %v8693_v26  ;;  %v4241_v28 = vsub.f32 1.0, %v4240_v7  ;;  %6072 = vrcp.f32 %v8737_v18 }
 0x81e   : > { %v4013_v29 = vmul.f32 %v8102_v56, %v4012_v48  ;;  %v3853_v11 = vadd.f32 %v8675_v37, %v3852_v32  ;;  %vm3854_vm5 = vweird.f32 %v8565_v20  ;;  %v3848_v38 = vmul.f32 %v8222_v49, %v3847_v17  ;;  %v3702_v49 = vpop.f32.mrf.mxu1 }
 0x81f   : > { %vm3855_vm6 = vweird.f32 %v8675_v37  ;;  %v3858_v15 = vand.u32 2147483647, %v8565_v20  ;;  %v3860_v0 = vand.u32 2147483648, %v8565_v20  ;;  %v4232_v4 = vsel %vm8771_vm4, %v8682_v58, %v4228_v55 }
 0x820   : > { %vm8786_vm7 = vcmp.eq.f32.partialorder %v4233_v50, 8.507059e+37  ;;  %v4236_v56 = vor.u32 1.1754944e-38, %v4235_v43  ;;  %vm8790_vm8 = vmor %vm3854_vm5, %vm3855_vm6  ;;  %v4242_v58 = vmul.f32 %v8728_v54, %v4241_v28  ;;  %v3987_v7 = vmul.f32 %v8720_v3, %v3986_v10 }
 0x821   : > { %v3857_v20 = vsel %vm8790_vm8, %v8675_v37, %v3853_v11  ;;  %vm3859_vm9 = vcmp.eq.f32.partialorder %v3858_v15, 8.507059e+37  ;;  %v3861_v2 = vor.u32 1.1754944e-38, %v3860_v0  ;;  %v3866_v27 = vsub.f32 1.0, %v3865_v19 }
 0x822   : > { %vm4244_vm10 = vweird.f32 %v8671_v59  ;;  %vm4245_vm11 = vweird.f32 %v8728_v54  ;;  %v8805_v40 = vadd.f32 1e-16, %v3702_v49  ;;  %v4237_v37 = vsel %vm8786_vm7, %v4236_v56, %v4232_v4 }
 0x823   : > { %4276 = vperm.xlu1 %5856, %v3848_v38   ;;  %v8803_v14 = vpop.eup %6072  ;;  %v3862_v62 = vsel %vm3859_vm9, %v3861_v2, %v3857_v20  ;;  %v4250_v9 = vand.u32 2147483648, %v8671_v59  ;;  %v4243_v23 = vadd.f32 %v8728_v54, %v4242_v58  ;;  %v4248_v8 = vand.u32 2147483647, %v8671_v59  ;;  %vm8817_vm14 = vmor %vm4244_vm10, %vm4245_vm11 }
 0x824   : > { %4331 = vperm.xlu0 %5845, %v4013_v29   ;;  %v3988_v57 = vadd.f32 %v8720_v3, %v3987_v7  ;;  %vm3990_vm12 = vweird.f32 %v8720_v3  ;;  %v8815_v22 = vadd.f32 1e-16, %v8380_v39  ;;  %v3995_v48 = vand.u32 2147483648, %v8654_v63 }
 0x825   : > { %v8798_v42 = vpop.f32.mrf.mxu2  ;;  %v4238_v41 = vmul.f32 %v8117_v31, %v4237_v37  ;;  %v3863_v55 = vmul.f32 %v8219_v1, %v3862_v62  ;;  %vm3989_vm15 = vweird.f32 %v8654_v63  ;;  %v3993_v59 = vand.u32 2147483647, %v8654_v63 }
 0x826   : > { %v3880_v17 = vmul.f32 %v8803_v14, %v8737_v18  ;;  %6074 = vrcp.f32 %v8805_v40  ;;  %v4251_v39 = vor.u32 1.1754944e-38, %v4250_v9  ;;  %vm8829_vm0 = vmor %vm3989_vm15, %vm3990_vm12  ;;  %v4247_v31 = vsel %vm8817_vm14, %v8728_v54, %v4243_v23 }
 0x827   : > { %vm4249_vm1 = vcmp.eq.f32.partialorder %v4248_v8, 8.507059e+37  ;;  %v3992_v1 = vsel %vm8829_vm0, %v8720_v3, %v3988_v57  ;;  %v3867_v63 = vmul.f32 %v8756_v53, %v3866_v27  ;;  %6076 = vrcp.f32 %v8815_v22 }
 0x828   : > { %v3996_v32 = vor.u32 1.1754944e-38, %v3995_v48  ;;  %vm3994_vm2 = vcmp.eq.f32.partialorder %v3993_v59, 8.507059e+37  ;;  %vm3869_vm3 = vweird.f32 %v8693_v26  ;;  %vm3870_vm4 = vweird.f32 %v8756_v53 }
 0x829   : > { %v4252_v19 = vsel %vm4249_vm1, %v4251_v39, %v4247_v31  ;;  %v3875_v54 = vand.u32 2147483648, %v8693_v26  ;;  %v3881_v52 = vsub.f32 1.0, %v3880_v17  ;;  %v3868_v3 = vadd.f32 %v8756_v53, %v3867_v63  ;;  %vm8848_vm5 = vmor %vm3869_vm3, %vm3870_vm4 }
 0x82a   : > { %v3997_v28 = vsel %vm3994_vm2, %v3996_v32, %v3992_v1  ;;  %v3873_v29 = vand.u32 2147483647, %v8693_v26  ;;  %v4253_v15 = vmul.f32 %v8100_v47, %v4252_v19  ;;  %v8857_v33 = vadd.f32 1e-16, %v8760_v21 }
 0x82b   : > { %4281 = vperm.xlu1 %5856, %v3863_v55   ;;  %v3998_v0 = vmul.f32 %v8106_v45, %v3997_v28  ;;  %v3876_v56 = vor.u32 1.1754944e-38, %v3875_v54  ;;  %v3872_v26 = vsel %vm8848_vm5, %v8756_v53, %v3868_v3  ;;  %v3882_v47 = vmul.f32 %v8803_v14, %v3881_v52 }
 0x82c   : > { %4406 = vperm.xlu0 %5845, %v4238_v41   ;;  %v8846_v11 = vpop.eup %6074  ;;  %vm3874_vm6 = vcmp.eq.f32.partialorder %v3873_v29, 8.507059e+37  ;;  %vm3884_vm7 = vweird.f32 %v8737_v18  ;;  %vm3885_vm8 = vweird.f32 %v8803_v14  ;;  %v3890_v53 = vand.u32 2147483648, %v8737_v18 }
 0x82d   : > { %v3738_v43 = vpop.f32.mrf.mxu2  ;;  %v8854_v4 = vpop.eup %6076  ;;  %v3895_v46 = vmul.f32 %v8846_v11, %v8805_v40  ;;  %v3877_v58 = vsel %vm3874_vm6, %v3876_v56, %v3872_v26  ;;  %v3883_v27 = vadd.f32 %v8803_v14, %v3882_v47  ;;  %v3888_v37 = vand.u32 2147483647, %v8737_v18  ;;  %vm8878_vm9 = vmor %vm3884_vm7, %vm3885_vm8 }
 0x82e   : > { %v3739_v10 = vadd.f32 1e-16, %v3738_v43  ;;  %v8867_v20 = vmul.f32 %v8854_v4, %v8815_v22  ;;  %v3878_v23 = vmul.f32 %v8191_v24, %v3877_v58  ;;  %v3891_v41 = vor.u32 1.1754944e-38, %v3890_v53 }
 0x82f   : > { %v3896_v7 = vsub.f32 1.0, %v3895_v46  ;;  %v8885_v55 = vadd.f32 1e-16, %v8662_v13  ;;  %v3887_v18 = vsel %vm8878_vm9, %v8803_v14, %v3883_v27  ;;  %vm8890_vm11 = vcmp.eq.f32.partialorder %v3888_v37, 8.507059e+37 }
 0x830   : > { %6078 = vrcp.f32 %v3739_v10  ;;  %v4083_v8 = vand.u32 2147483647, %v3739_v10  ;;  %v4085_v57 = vand.u32 2147483648, %v3739_v10  ;;  %v3776_v6 = vsub.f32 1.0, %v8867_v20 }
 0x831   : > { %6080 = vrcp.f32 %v8857_v33  ;;  %v3897_v24 = vmul.f32 %v8846_v11, %v3896_v7  ;;  %v8898_v39 = vadd.f32 1e-16, %v8798_v42  ;;  %vm4079_vm12 = vweird.f32 %v3739_v10 }
 0x832   : > { %vm3899_vm14 = vweird.f32 %v8805_v40  ;;  %vm4084_vm0 = vcmp.eq.f32.partialorder %v4083_v8, 8.507059e+37  ;;  %v4086_v14 = vor.u32 1.1754944e-38, %v4085_v57  ;;  %vm3900_vm1 = vweird.f32 %v8846_v11 }
 0x833   : > { %4326 = vperm.xlu1 %5856, %v3998_v0   ;;  %v3892_v42 = vsel %vm8890_vm11, %v3891_v41, %v3887_v18  ;;  %v3905_v32 = vand.u32 2147483648, %v8805_v40  ;;  %v3898_v19 = vadd.f32 %v8846_v11, %v3897_v24  ;;  %v3903_v28 = vand.u32 2147483647, %v8805_v40  ;;  %vm8918_vm2 = vmor %vm3899_vm14, %vm3900_vm1 }
 0x834   : > { %4411 = vperm.xlu0 %5845, %v4253_v15   ;;  %v3893_v38 = vmul.f32 %v8188_v30, %v3892_v42  ;;  %v3777_v30 = vmul.f32 %v8854_v4, %v3776_v6  ;;  %vm3779_vm6 = vweird.f32 %v8815_v22  ;;  %vm3780_vm8 = vweird.f32 %v8854_v4 }
 0x835   : > { %v3741_v49 = vpop.f32.mrf.mxu2  ;;  %v3906_v46 = vor.u32 1.1754944e-38, %v3905_v32  ;;  %v3902_v40 = vsel %vm8918_vm2, %v8846_v11, %v3898_v19  ;;  %vm8932_vm4 = vcmp.eq.f32.partialorder %v3903_v28, 8.507059e+37  ;;  %v3785_v11 = vand.u32 2147483648, %v8815_v22 }
 0x836   : > { %v6079_v45 = vpop.eup %6078  ;;  %v8869_v21 = vadd.f32 1e-16, %v3741_v49  ;;  %v3783_v9 = vand.u32 2147483647, %v8815_v22  ;;  %vm4049_vm2 = vweird.f32 %v8857_v33 }
 0x837   : > { %v4075_v2 = vmul.f32 %v6079_v45, %v3739_v10  ;;  %vm4080_vm10 = vweird.f32 %v6079_v45  ;;  %v8895_v17 = vpop.eup %6080  ;;  %v3786_v24 = vor.u32 1.1754944e-38, %v3785_v11  ;;  %v4068_v11 = vand.u32 2147483647, %v8898_v39 }
 0x838   : > { %6082 = vrcp.f32 %v8869_v21  ;;  %vm4081_vm15 = vmor %vm4079_vm12, %vm4080_vm10  ;;  %v4045_v54 = vmul.f32 %v8895_v17, %v8857_v33  ;;  %v4100_v15 = vand.u32 2147483648, %v8869_v21  ;;  %v4098_v56 = vand.u32 2147483647, %v8869_v21 }
 0x839   : > { %v4076_v62 = vsub.f32 1.0, %v4075_v2  ;;  %vm4094_vm5 = vweird.f32 %v8869_v21  ;;  %vm8960_vm10 = vmor %vm3779_vm6, %vm3780_vm8  ;;  %vm3784_vm12 = vcmp.eq.f32.partialorder %v3783_v9, 8.507059e+37 }
 0x83a   : > { %v4046_v47 = vsub.f32 1.0, %v4045_v54  ;;  %v4101_v2 = vor.u32 1.1754944e-38, %v4100_v15  ;;  %vm4099_vm9 = vcmp.eq.f32.partialorder %v4098_v56, 8.507059e+37 }
 0x83b   : > { %v4077_v48 = vmul.f32 %v6079_v45, %v4076_v62  ;;  %4286 = vperm.xlu1 %5856, %v3878_v23   ;;  %v3778_v62 = vadd.f32 %v8854_v4, %v3777_v30 }
 0x83c   : > { %v4047_v18 = vmul.f32 %v8895_v17, %v4046_v47 }
 0x83d   : > { %v3744_v50 = vpop.f32.mrf.mxu2  ;;  %v4078_v31 = vadd.f32 %v6079_v45, %v4077_v48 }
 0x83e   : > { %v6083_v13 = vpop.eup %6082  ;;  %v8901_v1 = vadd.f32 1e-16, %v3744_v50  ;;  %v3782_v50 = vsel %vm8960_vm10, %v8854_v4, %v3778_v62 }
 0x83f   : > { %v4090_v63 = vmul.f32 %v6083_v13, %v8869_v21  ;;  %v4082_v43 = vsel %vm4081_vm15, %v6079_v45, %v4078_v31  ;;  %vm4095_vm3 = vweird.f32 %v6083_v13  ;;  %v3907_v21 = vsel %vm8932_vm4, %v3906_v46, %v3902_v40 }
 0x840   : > { %6084 = vrcp.f32 %v8901_v1  ;;  %v4087_v10 = vsel %vm4084_vm0, %v4086_v14, %v4082_v43  ;;  %vm4096_vm7 = vmor %vm4094_vm5, %vm4095_vm3  ;;  %v3908_v48 = vmul.f32 %v8185_v44, %v3907_v21  ;;  %v4115_v41 = vand.u32 2147483648, %v8901_v1 }
 0x841   : > { %6086 = vrcp.f32 %v8898_v39  ;;  %v4091_v52 = vsub.f32 1.0, %v4090_v63  ;;  %v4088_v3 = vmul.f32 %v8236_v61, %v4087_v10  ;;  %v8927_v61 = vadd.f32 1e-16, %v8716_v36 }
 0x842   : > { %6088 = vrcp.f32 %v8885_v55  ;;  %vm4109_vm14 = vweird.f32 %v8901_v1  ;;  %v4116_v14 = vor.u32 1.1754944e-38, %v4115_v41  ;;  %v4048_v63 = vadd.f32 %v8895_v17, %v4047_v18 }
 0x843   : > { %4356 = vperm.xlu0 %5845, %v4088_v3   ;;  %v4092_v0 = vmul.f32 %v6083_v13, %v4091_v52  ;;  %4291 = vperm.xlu1 %5856, %v3893_v38   ;;  %vm4050_vm0 = vweird.f32 %v8895_v17  ;;  %v3787_v10 = vsel %vm3784_vm12, %v3786_v24, %v3782_v50  ;;  %v4053_v3 = vand.u32 2147483647, %v8857_v33  ;;  %v2792_v52 = vld [vmem:[#allocation2 + $0x68] sm:$0xf] }
 0x844   : > { %vm8984_vm3 = vmor %vm4049_vm2, %vm4050_vm0  ;;  %v3788_v38 = vmul.f32 %v8257_v51, %v3787_v10  ;;  %v4023_v21 = vand.u32 2147483647, %v8885_v55  ;;  %vm4069_vm0 = vcmp.eq.f32.partialorder %v4068_v11, 8.507059e+37 }
 0x845   : > { %v3747_v49 = vpop.f32.mrf.mxu2  ;;  %v4093_v45 = vadd.f32 %v6083_v13, %v4092_v0  ;;  %v4052_v0 = vsel %vm8984_vm3, %v8895_v17, %v4048_v63  ;;  %vm4054_vm6 = vcmp.eq.f32.partialorder %v4053_v3, 8.507059e+37  ;;  %vm4034_vm3 = vweird.f32 %v8927_v61  ;;  %v2809_v3 = vld [vmem:[#allocation2 + $0xf0] sm:$0xf] }
 0x846   : > { %v6085_v36 = vpop.eup %6084  ;;  %v8939_v20 = vadd.f32 1e-16, %v3747_v49 }
 0x847   : > { %v8944_v58 = vpop.eup %6086  ;;  %v4105_v53 = vmul.f32 %v6085_v36, %v8901_v1  ;;  %v4097_v7 = vsel %vm4096_vm7, %v6083_v13, %v4093_v45  ;;  %vm4110_vm11 = vweird.f32 %v6085_v36 }
 0x848   : > { %v8949_v27 = vpop.eup %6088  ;;  %6090 = vrcp.f32 %v8939_v20  ;;  %v4102_v37 = vsel %vm4099_vm9, %v4101_v2, %v4097_v7  ;;  %v4060_v6 = vmul.f32 %v8944_v58, %v8898_v39  ;;  %vm4111_vm15 = vmor %vm4109_vm14, %vm4110_vm11  ;;  %v4130_v15 = vand.u32 2147483648, %v8939_v20 }
 0x849   : > { %6092 = vrcp.f32 %v8927_v61  ;;  %v4106_v23 = vsub.f32 1.0, %v4105_v53  ;;  %v4103_v8 = vmul.f32 %v8208_v25, %v4102_v37  ;;  %v4113_v25 = vand.u32 2147483647, %v8901_v1 }
 0x84a   : > { %v4015_v22 = vmul.f32 %v8949_v27, %v8885_v55  ;;  %v4061_v13 = vsub.f32 1.0, %v4060_v6  ;;  %v4055_v1 = vand.u32 2147483648, %v8857_v33  ;;  %vm4124_vm5 = vweird.f32 %v8939_v20 }
 0x84b   : > { %4361 = vperm.xlu0 %5845, %v4103_v8   ;;  %v4107_v59 = vmul.f32 %v6085_v36, %v4106_v23  ;;  %4296 = vperm.xlu1 %5856, %v3908_v48   ;;  %vm4114_vm1 = vcmp.eq.f32.partialorder %v4113_v25, 8.507059e+37  ;;  %v4131_v30 = vor.u32 1.1754944e-38, %v4130_v15  ;;  %vm4065_vm9 = vweird.f32 %v8944_v58  ;;  %v2808_v15 = vld [vmem:[#allocation2 + $0xe8] sm:$0xf] }
 0x84c   : > { %v4016_v4 = vsub.f32 1.0, %v4015_v22  ;;  %v4062_v46 = vmul.f32 %v8944_v58, %v4061_v13  ;;  %v4056_v33 = vor.u32 1.1754944e-38, %v4055_v1  ;;  %vm4020_vm10 = vweird.f32 %v8949_v27 }
 0x84d   : > { %v4108_v44 = vadd.f32 %v6085_v36, %v4107_v59  ;;  %vm4064_vm11 = vweird.f32 %v8898_v39  ;;  %v4025_v53 = vand.u32 2147483648, %v8885_v55  ;;  %vm4019_vm14 = vweird.f32 %v8885_v55 }
 0x84e   : > { %v6091_v31 = vpop.eup %6090  ;;  %v4017_v40 = vmul.f32 %v8949_v27, %v4016_v4  ;;  %v4057_v47 = vsel %vm4054_vm6, %v4056_v33, %v4052_v0  ;;  %v4063_v49 = vadd.f32 %v8944_v58, %v4062_v46  ;;  %vm4066_vm12 = vmor %vm4064_vm11, %vm4065_vm9  ;;  %v2791_v0 = vld [vmem:[#allocation2 + $0x60] sm:$0xf]  ;;  %v2790_v46 = vld [vmem:[#allocation2 + $0x58] sm:$0xf] }
 0x84f   : > { %v8978_v43 = vpop.eup %6092  ;;  %v4120_v42 = vmul.f32 %v6091_v31, %v8939_v20  ;;  %v4112_v32 = vsel %vm4111_vm15, %v6085_v36, %v4108_v44  ;;  %vm4125_vm4 = vweird.f32 %v6091_v31  ;;  %v4070_v36 = vand.u32 2147483648, %v8898_v39  ;;  %vm4021_vm15 = vmor %vm4019_vm14, %vm4020_vm10  ;;  %v2807_v33 = vld [vmem:[#allocation2 + $0xe0] sm:$0xf] }
 0x850   : > { %v4117_v19 = vsel %vm4114_vm1, %v4116_v14, %v4112_v32  ;;  %v4030_v29 = vmul.f32 %v8978_v43, %v8927_v61  ;;  %vm4126_vm7 = vmor %vm4124_vm5, %vm4125_vm4  ;;  %v4018_v2 = vadd.f32 %v8949_v27, %v4017_v40  ;;  %v4058_v7 = vmul.f32 %v8242_v60, %v4057_v47 }
 0x851   : > { %v4121_v28 = vsub.f32 1.0, %v4120_v42  ;;  %v4118_v54 = vmul.f32 %v8205_v35, %v4117_v19  ;;  %v4128_v35 = vand.u32 2147483647, %v8939_v20  ;;  %v4067_v37 = vsel %vm4066_vm12, %v8944_v58, %v4063_v49  ;;  %v2794_v42 = vld [vmem:[#allocation2 + $0x78] sm:$0xf] }
 0x852   : > { %v4031_v51 = vsub.f32 1.0, %v4030_v29  ;;  %v4022_v9 = vsel %vm4021_vm15, %v8949_v27, %v4018_v2  ;;  %v4026_v39 = vor.u32 1.1754944e-38, %v4025_v53  ;;  %vm4024_vm1 = vcmp.eq.f32.partialorder %v4023_v21, 8.507059e+37  ;;  %v2789_v49 = vld [vmem:[#allocation2 + $0x50] sm:$0xf] }
 0x853   : > { %4366 = vperm.xlu0 %5845, %v4118_v54   ;;  %v4122_v56 = vmul.f32 %v6091_v31, %v4121_v28  ;;  %4256 = vperm.xlu1 %5856, %v3788_v38   ;;  %vm4129_vm8 = vcmp.eq.f32.partialorder %v4128_v35, 8.507059e+37  ;;  %vm4035_vm2 = vweird.f32 %v8978_v43  ;;  %v4040_v58 = vand.u32 2147483648, %v8927_v61  ;;  %v2810_v28 = vld [vmem:[#allocation2 + $0xf8] sm:$0xf]  ;;  %v2793_v54 = vld [vmem:[#allocation2 + $0x70] sm:$0xf] }
 0x854   : > { %v4032_v62 = vmul.f32 %v8978_v43, %v4031_v51  ;;  %v4027_v57 = vsel %vm4024_vm1, %v4026_v39, %v4022_v9  ;;  %v4038_v27 = vand.u32 2147483647, %v8927_v61  ;;  %vm4036_vm4 = vmor %vm4034_vm3, %vm4035_vm2  ;;  %v2826_v32 = vunpack.c.l.bf16 %v2794_v42  ;;  %v2788_v53 = vld [vmem:[#allocation2 + $0x48] sm:$0xf]  ;;  %v2785_v42 = vld [vmem:[#allocation2 + $0x30] sm:$0xf] }
 0x855   : > { %v4123_v26 = vadd.f32 %v6091_v31, %v4122_v56  ;;  %v4028_v48 = vmul.f32 %v8267_v5, %v4027_v57  ;;  %v4041_v18 = vor.u32 1.1754944e-38, %v4040_v58  ;;  %v2842_v29 = vunpack.c.l.bf16 %v2810_v28  ;;  %v2804_v9 = vld [vmem:[#allocation2 + $0xc8] sm:$0xf]  ;;  %v2803_v58 = vld [vmem:[#allocation2 + $0xc0] sm:$0xf] }
 0x856   : > { %v4033_v55 = vadd.f32 %v8978_v43, %v4032_v62  ;;  %vm4039_vm5 = vcmp.eq.f32.partialorder %v4038_v27, 8.507059e+37  ;;  %v2825_v38 = vunpack.c.l.bf16 %v2793_v54  ;;  %v2824_v56 = vunpack.c.l.bf16 %v2792_v52 }
 0x857   : > { %v4127_v17 = vsel %vm4126_vm7, %v6091_v31, %v4123_v26  ;;  %v2841_v35 = vunpack.c.l.bf16 %v2809_v3  ;;  %v2840_v51 = vunpack.c.l.bf16 %v2808_v15  ;;  %v2822_v2 = vunpack.c.l.bf16 %v2790_v46  ;;  %v2781_v15 = vld [vmem:[#allocation2 + $0x10] sm:$0xf]  ;;  %v4499_v46 = vld [vmem:[#allocation4 + $0x68] sm:$0xff] }
 0x858   : > { %v4132_v45 = vsel %vm4129_vm8, %v4131_v30, %v4127_v17  ;;  %v4037_v41 = vsel %vm4036_vm4, %v8978_v43, %v4033_v55  ;;  %v2823_v30 = vunpack.c.l.bf16 %v2791_v0  ;;  %v2821_v21 = vunpack.c.l.bf16 %v2789_v49 }
 0x859   : > { %v4133_v20 = vmul.f32 %v8202_v12, %v4132_v45  ;;  %v4071_v12 = vor.u32 1.1754944e-38, %v4070_v36  ;;  %v4042_v24 = vsel %vm4039_vm5, %v4041_v18, %v4037_v41  ;;  %v2806_v45 = vld [vmem:[#allocation2 + $0xd8] sm:$0xf]  ;;  %v2820_v39 = vunpack.c.l.bf16 %v2788_v53 }
 0x85a   : > { %v2836_v27 = vunpack.c.l.bf16 %v2804_v9  ;;  %v2835_v18 = vunpack.c.l.bf16 %v2803_v58  ;;  %v2797_v58 = vld [vmem:[#allocation2 + $0x90] sm:$0xf] }
 0x85b   : > { %4371 = vperm.xlu0 %5845, %v4133_v20   ;;  %4346 = vperm.xlu1 %5856, %v4058_v7   ;;  %v4072_v8 = vsel %vm4069_vm0, %v4071_v12, %v4067_v37  ;;  %v2839_v20 = vunpack.c.l.bf16 %v2807_v33  ;;  %v2805_v7 = vld [vmem:[#allocation2 + $0xd0] sm:$0xf]  ;;  %v2838_v37 = vunpack.c.l.bf16 %v2806_v45  ;;  %v2780_v33 = vld [vmem:[#allocation2 + $0x8] sm:$0xf] }
 0x85c   : > { %v4073_v6 = vmul.f32 %v8239_v34, %v4072_v8  ;;  %v4043_v34 = vmul.f32 %v8264_v16, %v4042_v24  ;;  %v2837_v8 = vunpack.c.l.bf16 %v2805_v7  ;;  %v2801_v45 = vld [vmem:[#allocation2 + $0xb0] sm:$0xf] }
 0x85d   : > { %v9017_v60 = vpop.permute.xlu1 %4301  ;;  %v2833_v7 = vunpack.c.l.bf16 %v2801_v45  ;;  %v4541_v45 = vld [vmem:[#allocation7 + $0x70] sm:$0xff] }
 0x85e   : > { %v9015_v23 = vpop.permute.xlu0 %4376  ;;  %v4423_v24 = vmul.f32 %v9017_v60, %v2820_v39 }
 0x863   : > { %4351 = vperm.xlu0 %5845, %v4073_v6   ;;  %4336 = vperm.xlu1 %5856, %v4028_v48  }
 0x865   : > { %v9029_v25 = vpop.permute.xlu1 %4261 }
 0x866   : > { %v9027_v59 = vpop.permute.xlu0 %4381 }
 0x86b   : > { %4341 = vperm.xlu0 %5845, %v4043_v34  }
 0x86d   : > { %v4307_v61 = vpop.permute.xlu1 %4306 }
 0x86e   : > { %v9032_v22 = vpop.permute.xlu0 %4386  ;;  %v4424_v48 = vmul.f32 %v4307_v61, %v2821_v21 }
 0x86f   : > { %v4440_v34 = vmul.f32 %v9032_v22, %v2837_v8  ;;  %v2784_v22 = vld [vmem:[#allocation2 + $0x28] sm:$0xf]  ;;  %v2798_v8 = vld [vmem:[#allocation2 + $0x98] sm:$0xf] }
 0x870   : > { %v2816_v28 = vunpack.c.l.bf16 %v2784_v22 }
 0x875   : > { %v9034_v5 = vpop.permute.xlu1 %4266 }
 0x876   : > { %v4392_v50 = vpop.permute.xlu0 %4391 }
 0x877   : > { %v4441_v41 = vmul.f32 %v4392_v50, %v2838_v37  ;;  %v2787_v50 = vld [vmem:[#allocation2 + $0x40] sm:$0xf] }
 0x878   : > { %v2799_v37 = vld [vmem:[#allocation2 + $0xa0] sm:$0xf] }
 0x87d   : > { %v4312_v31 = vpop.permute.xlu1 %4311 }
 0x87e   : > { %v4322_v44 = vpop.permute.xlu0 %4321  ;;  %v4425_v57 = vmul.f32 %v4312_v31, %v2822_v2  ;;  %v4438_v31 = vmul.f32 %v9015_v23, %v2835_v18  ;;  %v2782_v23 = vld [vmem:[#allocation2 + $0x18] sm:$0xf] }
 0x87f   : > { %v4427_v36 = vmul.f32 %v4322_v44, %v2824_v56  ;;  %v4439_v44 = vmul.f32 %v9027_v59, %v2836_v27  ;;  %v2814_v0 = vunpack.c.l.bf16 %v2782_v23  ;;  %v4487_v23 = vld [vmem:[#allocation4 + $0x8] sm:$0xff] }
 0x885   : > { %v9036_v14 = vpop.permute.xlu1 %4271 }
 0x886   : > { %v4397_v13 = vpop.permute.xlu0 %4396  ;;  %v4417_v49 = vmul.f32 %v9036_v14, %v2814_v0  ;;  %v4495_v14 = vld [vmem:[#allocation4 + $0x48] sm:$0xff]  ;;  %v4553_v0 = vld [vmem:[#allocation7 + $0xd0] sm:$0xff] }
 0x887   : > { %v4442_v55 = vmul.f32 %v4397_v13, %v2839_v20 }
 0x88d   : > { %v4317_v43 = vpop.permute.xlu1 %4316 }
 0x88e   : > { %v4402_v63 = vpop.permute.xlu0 %4401  ;;  %v4426_v12 = vmul.f32 %v4317_v43, %v2823_v30  ;;  %v2819_v43 = vunpack.c.l.bf16 %v2787_v50  ;;  %v4498_v30 = vld [vmem:[#allocation4 + $0x60] sm:$0xff]  ;;  %v4491_v50 = vld [vmem:[#allocation4 + $0x28] sm:$0xff] }
 0x88f   : > { %v4443_v62 = vmul.f32 %v4402_v63, %v2840_v51  ;;  %v2786_v63 = vld [vmem:[#allocation2 + $0x38] sm:$0xf] }
 0x890   : > { %v2818_v60 = vunpack.c.l.bf16 %v2786_v63  ;;  %v2802_v51 = vld [vmem:[#allocation2 + $0xb8] sm:$0xf]  ;;  %v2796_v63 = vld [vmem:[#allocation2 + $0x88] sm:$0xf] }
 0x891   : > { %v2834_v2 = vunpack.c.l.bf16 %v2802_v51  ;;  %v4548_v51 = vld [vmem:[#allocation7 + $0xa8] sm:$0xff] }
 0x895   : > { %v9038_v4 = vpop.permute.xlu1 %4276 }
 0x896   : > { %v4332_v10 = vpop.permute.xlu0 %4331 }
 0x897   : > { %v4429_v16 = vmul.f32 %v4332_v10, %v2826_v32 }
 0x899   : > { %4446 = vmatpush.msrb.mxu3 %v4429_v16  ;;  %v2817_v16 = vunpack.c.l.bf16 %v2785_v42  ;;  %v2795_v42 = vld [vmem:[#allocation2 + $0x80] sm:$0xf] }
 0x89d   : > { %v9040_v1 = vpop.permute.xlu1 %4281 }
 0x89e   : > { %v4407_v19 = vpop.permute.xlu0 %4406  ;;  %v4419_v56 = vmul.f32 %v9040_v1, %v2816_v28  ;;  %v4497_v1 = vld [vmem:[#allocation4 + $0x58] sm:$0xff] }
 0x89f   : > { %v4444_v11 = vmul.f32 %v4407_v19, %v2841_v35  ;;  %v2783_v19 = vld [vmem:[#allocation2 + $0x20] sm:$0xf]  ;;  %v4489_v28 = vld [vmem:[#allocation4 + $0x18] sm:$0xff] }
 0x8a0   : > { %v2815_v52 = vunpack.c.l.bf16 %v2783_v19  ;;  %v4490_v19 = vld [vmem:[#allocation4 + $0x20] sm:$0xff] }
 0x8a5   : > { %v4327_v26 = vpop.permute.xlu1 %4326 }
 0x8a6   : > { %v4412_v40 = vpop.permute.xlu0 %4411  ;;  %v4428_v17 = vmul.f32 %v4327_v26, %v2825_v38  ;;  %v4500_v38 = vld [vmem:[#allocation4 + $0x70] sm:$0xff]  ;;  %v4418_v26 = vmul.f32 %v9038_v4, %v2815_v52  ;;  %v4486_v52 = vld [vmem:[#allocation4] sm:$0xff] }
 0x8a7   : > { %v4445_v47 = vmul.f32 %v4412_v40, %v2842_v29  ;;  %v4501_v29 = vld [vmem:[#allocation4 + $0x78] sm:$0xff]  ;;  %v2813_v40 = vunpack.c.l.bf16 %v2781_v15  ;;  %v4496_v4 = vld [vmem:[#allocation4 + $0x50] sm:$0xff]  ;;  %v4556_v15 = vld [vmem:[#allocation7 + $0xe8] sm:$0xff] }
 0x8a8   : > { %4447 = vmatpush.msrb.mxu3 %v4428_v17  ;;  %4506 = vmatpush.msra.mxu1 %v4501_v29  ;;  %v2812_v17 = vunpack.c.l.bf16 %v2780_v33  ;;  %v4558_v29 = vld [vmem:[#allocation7 + $0xf8] sm:$0xff]  ;;  %v4549_v33 = vld [vmem:[#allocation7 + $0xb0] sm:$0xff] }
 0x8a9   : > { %4466 = vmatpush.msrb.mxu0 %v4445_v47  ;;  %v2779_v47 = vld [vmem:[#allocation2] sm:$0xf]  ;;  %v4416_v20 = vmul.f32 %v9034_v5, %v2813_v40  ;;  %v4550_v40 = vld [vmem:[#allocation7 + $0xb8] sm:$0xff] }
 0x8aa   : > { %4448 = vmatpush.msrb.mxu3 %v4427_v36  ;;  %4507 = vmatpush.msra.mxu1 %v4500_v38  ;;  %v2811_v53 = vunpack.c.l.bf16 %v2779_v47  ;;  %v4415_v21 = vmul.f32 %v9029_v25, %v2812_v17  ;;  %v9398_v25 = vld [vmem:[#allocation82_spill] sm:$0xff]  ;;  %v4555_v38 = vld [vmem:[#allocation7 + $0xe0] sm:$0xff]  ;;  %v4546_v47 = vld [vmem:[#allocation7 + $0x98] sm:$0xff] }
 0x8ab   : > { %4467 = vmatpush.msrb.mxu0 %v4444_v11  ;;  %v2800_v11 = vld [vmem:[#allocation2 + $0xa8] sm:$0xf]  ;;  %v9399_v27 = vunpack.i.l.bf16 %v9398_v25  ;;  %v4543_v17 = vld [vmem:[#allocation7 + $0x80] sm:$0xff] }
 0x8ac   : > { %4449 = vmatpush.msrb.mxu3 %v4426_v12  ;;  %4508 = vmatpush.msra.mxu1 %v4499_v46  ;;  %v2832_v12 = vunpack.c.l.bf16 %v2800_v11  ;;  %v4552_v46 = vld [vmem:[#allocation7 + $0xc8] sm:$0xff]  ;;  %v4538_v11 = vld [vmem:[#allocation7 + $0x58] sm:$0xff] }
 0x8ad   : > { %4468 = vmatpush.msrb.mxu0 %v4443_v62  ;;  %v4287_v6 = vpop.permute.xlu1 %4286 }
 0x8ae   : > { %4450 = vmatpush.msrb.mxu3 %v4425_v57  ;;  %v4420_v3 = vmul.f32 %v4287_v6, %v2817_v16  ;;  %4509 = vmatpush.msra.mxu1 %v4498_v30  ;;  %v2831_v57 = vunpack.c.l.bf16 %v2799_v37  ;;  %v4545_v30 = vld [vmem:[#allocation7 + $0x90] sm:$0xff] }
 0x8af   : > { %4469 = vmatpush.msrb.mxu0 %v4442_v55  ;;  %v4494_v55 = vld [vmem:[#allocation4 + $0x40] sm:$0xff] }
 0x8b0   : > { %4451 = vmatpush.msrb.mxu3 %v4424_v48  ;;  %4510 = vmatpush.msra.mxu1 %v4497_v1  ;;  %v2830_v48 = vunpack.c.l.bf16 %v2798_v8  ;;  %v4539_v1 = vld [vmem:[#allocation7 + $0x60] sm:$0xff]  ;;  %v4530_v8 = vld [vmem:[#allocation7 + $0x18] sm:$0xff] }
 0x8b1   : > { %4470 = vmatpush.msrb.mxu0 %v4441_v41  ;;  %v4493_v41 = vld [vmem:[#allocation4 + $0x38] sm:$0xff] }
 0x8b2   : > { %4452 = vmatpush.msrb.mxu3 %v4423_v24  ;;  %4511 = vmatpush.msra.mxu1 %v4496_v4  ;;  %v4536_v4 = vld [vmem:[#allocation7 + $0x48] sm:$0xff] }
 0x8b3   : > { %4471 = vmatpush.msrb.mxu0 %v4440_v34  ;;  %v2829_v34 = vunpack.c.l.bf16 %v2797_v58 }
 0x8b4   : > { %4512 = vmatpush.msra.mxu1 %v4495_v14 }
 0x8b5   : > { %4472 = vmatpush.msrb.mxu0 %v4439_v44  ;;  %v9046_v13 = vpop.permute.xlu0 %4356  ;;  %v4292_v61 = vpop.permute.xlu1 %4291  ;;  %v4492_v44 = vld [vmem:[#allocation4 + $0x30] sm:$0xff] }
 0x8b6   : > { %v4421_v54 = vmul.f32 %v4292_v61, %v2818_v60  ;;  %4513 = vmatpush.msra.mxu1 %v4494_v55  ;;  %v4434_v24 = vmul.f32 %v9046_v13, %v2831_v57  ;;  %v2828_v60 = vunpack.c.l.bf16 %v2796_v63  ;;  %v4527_v57 = vld [vmem:[#allocation7] sm:$0xff] }
 0x8b7   : > { %4473 = vmatpush.msrb.mxu0 %v4438_v31  ;;  %v5965_v55 = vld [vmem:[%s9094_s6] ss:$0 sm:$0xff] }
 0x8b8   : > { %4514 = vmatpush.msra.mxu1 %v4493_v41 }
 0x8ba   : > { %4515 = vmatpush.msra.mxu1 %v4492_v44 }
 0x8bc   : > { %4516 = vmatpush.msra.mxu1 %v4491_v50 }
 0x8bd   : > { %v9048_v32 = vpop.permute.xlu0 %4361  ;;  %v4297_v10 = vpop.permute.xlu1 %4296 }
 0x8be   : > { %v4422_v59 = vmul.f32 %v4297_v10, %v2819_v43  ;;  %v4435_v6 = vmul.f32 %v9048_v32, %v2832_v12  ;;  %v2827_v32 = vunpack.c.l.bf16 %v2795_v42  ;;  %4517 = vmatpush.msra.mxu1 %v4490_v19  ;;  %v4531_v12 = vld [vmem:[#allocation7 + $0x20] sm:$0xff] }
 0x8c0   : > { %4453 = vmatpush.msrb.mxu3 %v4422_v59  ;;  %v9400_v59 = vunpack.i.h.bf16 %v9398_v25  ;;  %4518 = vmatpush.msra.mxu1 %v4489_v28 }
 0x8c2   : > { %4454 = vmatpush.msrb.mxu3 %v4421_v54  ;;  %v4488_v54 = vld [vmem:[#allocation4 + $0x10] sm:$0xff] }
 0x8c3   : > { %4519 = vmatpush.msra.mxu1 %v4488_v54 }
 0x8c4   : > { %4455 = vmatpush.msrb.mxu3 %v4420_v3  ;;  %v4557_v3 = vld [vmem:[#allocation7 + $0xf0] sm:$0xff] }
 0x8c5   : > { %v4367_v35 = vpop.permute.xlu0 %4366  ;;  %v4257_v36 = vpop.permute.xlu1 %4256  ;;  %4520 = vmatpush.msra.mxu1 %v4487_v23 }
 0x8c6   : > { %4456 = vmatpush.msrb.mxu3 %v4419_v56  ;;  %v4414_v39 = vmul.f32 %v4257_v36, %v2811_v53  ;;  %v4436_v5 = vmul.f32 %v4367_v35, %v2833_v7  ;;  %v4554_v56 = vld [vmem:[#allocation7 + $0xd8] sm:$0xff]  ;;  %v4551_v35 = vld [vmem:[#allocation7 + $0xc0] sm:$0xff]  ;;  %v4533_v7 = vld [vmem:[#allocation7 + $0x30] sm:$0xff] }
 0x8c7   : > { %4521 = vmatpush.msra.mxu1 %v4486_v52  ;;  %v4542_v36 = vld [vmem:[#allocation7 + $0x78] sm:$0xff]  ;;  %v4535_v53 = vld [vmem:[#allocation7 + $0x40] sm:$0xff] }
 0x8c8   : > { %4457 = vmatpush.msrb.mxu3 %v4418_v26  ;;  %v4547_v26 = vld [vmem:[#allocation7 + $0xa0] sm:$0xff] }
 0x8ca   : > { %4458 = vmatpush.msrb.mxu3 %v4417_v49  ;;  %v4544_v49 = vld [vmem:[#allocation7 + $0x88] sm:$0xff] }
 0x8cc   : > { %4459 = vmatpush.msrb.mxu3 %v4416_v20  ;;  %v4537_v20 = vld [vmem:[#allocation7 + $0x50] sm:$0xff] }
 0x8cd   : > { %v4372_v62 = vpop.permute.xlu0 %4371  ;;  %v4347_v18 = vpop.permute.xlu1 %4346 }
 0x8ce   : > { %v4437_v9 = vmul.f32 %v4372_v62, %v2834_v2  ;;  %4460 = vmatpush.msrb.mxu3 %v4415_v21  ;;  %v4432_v43 = vmul.f32 %v4347_v18, %v2829_v34  ;;  %v4540_v2 = vld [vmem:[#allocation7 + $0x68] sm:$0xff]  ;;  %v4534_v21 = vld [vmem:[#allocation7 + $0x38] sm:$0xff] }
 0x8d0   : > { %4474 = vmatpush.msrb.mxu0 %v4437_v9  ;;  %4461 = vmatpush.msrb.mxu3 %v4414_v39  ;;  %v4532_v9 = vld [vmem:[#allocation7 + $0x28] sm:$0xff]  ;;  %v4529_v39 = vld [vmem:[#allocation7 + $0x10] sm:$0xff] }
 0x8d1   : > { %4462 = vmatmul.f32.vlgmr.msrb.gmra.mxu3 %v9399_v27  ;;  %v4559_v27 = vld [vmem:[%s9096_s8] sm:$0x3] }
 0x8d2   : > { %4475 = vmatpush.msrb.mxu0 %v4436_v5  ;;  %4565 = vmatpush.msra.mxu3 %v4557_v3  ;;  %v4528_v5 = vld [vmem:[#allocation7 + $0x8] sm:$0xff] }
 0x8d4   : > { %4476 = vmatpush.msrb.mxu0 %v4435_v6  ;;  %4566 = vmatpush.msra.mxu3 %v4555_v38 }
 0x8d5   : > { %v4352_v31 = vpop.permute.xlu0 %4351  ;;  %v4337_v22 = vpop.permute.xlu1 %4336 }
 0x8d6   : > { %v4433_v61 = vmul.f32 %v4352_v31, %v2830_v48  ;;  %4477 = vmatpush.msrb.mxu0 %v4434_v24  ;;  %v4430_v16 = vmul.f32 %v4337_v22, %v2827_v32  ;;  %4567 = vmatpush.msra.mxu3 %v4553_v0  ;;  %v4562_v48 = vperm.slane %v4559_v27, 1  ;;  %v4561_v24 = vperm.slane %v4559_v27, 0 }
 0x8d8   : > { %4478 = vmatpush.msrb.mxu0 %v4433_v61  ;;  %4568 = vmatpush.msra.mxu3 %v4551_v35 }
 0x8da   : > { %4479 = vmatpush.msrb.mxu0 %v4432_v43  ;;  %4569 = vmatpush.msra.mxu3 %v4549_v33 }
 0x8dc   : > { %4570 = vmatpush.msra.mxu3 %v4547_v26 }
 0x8dd   : > { %v4342_v10 = vpop.permute.xlu0 %4341 }
 0x8de   : > { %v4431_v13 = vmul.f32 %v4342_v10, %v2828_v60  ;;  %4571 = vmatpush.msra.mxu3 %v4545_v30 }
 0x8e0   : > { %4480 = vmatpush.msrb.mxu0 %v4431_v13  ;;  %4572 = vmatpush.msra.mxu3 %v4543_v17 }
 0x8e2   : > { %4481 = vmatpush.msrb.mxu0 %v4430_v16  ;;  %4573 = vmatpush.msra.mxu3 %v4541_v45 }
 0x8e3   : > { %4482 = vmatmul.f32.vlgmr.msrb.gmra.mxu0 %v9400_v59 }
 0x8e4   : > { %4585 = vmatpush.msra.mxu0 %v4558_v29  ;;  %4574 = vmatpush.msra.mxu3 %v4539_v1 }
 0x8e6   : > { %4586 = vmatpush.msra.mxu0 %v4556_v15  ;;  %4575 = vmatpush.msra.mxu3 %v4537_v20 }
 0x8e8   : > { %4587 = vmatpush.msra.mxu0 %v4554_v56  ;;  %4576 = vmatpush.msra.mxu3 %v4535_v53 }
 0x8ea   : > { %4588 = vmatpush.msra.mxu0 %v4552_v46  ;;  %4577 = vmatpush.msra.mxu3 %v4533_v7 }
 0x8ec   : > { %4589 = vmatpush.msra.mxu0 %v4550_v40  ;;  %4578 = vmatpush.msra.mxu3 %v4531_v12 }
 0x8ee   : > { %4590 = vmatpush.msra.mxu0 %v4548_v51  ;;  %4579 = vmatpush.msra.mxu3 %v4529_v39 }
 0x8f0   : > { %4591 = vmatpush.msra.mxu0 %v4546_v47  ;;  %4580 = vmatpush.msra.mxu3 %v4527_v57 }
 0x8f2   : > { %4592 = vmatpush.msra.mxu0 %v4544_v49 }
 0x8f4   : > { %4593 = vmatpush.msra.mxu0 %v4542_v36 }
 0x8f6   : > { %4594 = vmatpush.msra.mxu0 %v4540_v2 }
 0x8f8   : > { %4595 = vmatpush.msra.mxu0 %v4538_v11 }
 0x8fa   : > { %4596 = vmatpush.msra.mxu0 %v4536_v4 }
 0x8fc   : > { %4597 = vmatpush.msra.mxu0 %v4534_v21 }
 0x8fe   : > { %4598 = vmatpush.msra.mxu0 %v4532_v9 }
 0x900   : > { %4599 = vmatpush.msra.mxu0 %v4530_v8 }
 0x902   : > { %4600 = vmatpush.msra.mxu0 %v4528_v5 }
 0x954   : > { %v4463_v37 = vpop.f32.mrf.mxu3 }
 0x960   : > { %v4483_v62 = vpop.f32.mrf.mxu0 }
 0x961   : > { %v4484_v14 = vadd.f32 %v4483_v62, %v4463_v37 }
 0x963   : > { %4522 = vmatmul.f32.vlgmr.msra.gmra.mxu1 %v4484_v14 }
 0x9e0   : > { %v4523_v58 = vpop.f32.mrf.mxu1 }
 0x9e1   : > { %v4524_v6 = vadd.f32 %v5965_v55, %v4523_v58 }
 0x9e3   : > { %v4526_v25 = vmax.f32 %v4524_v6, 0.0 }
 0x9e5   : > { %4581 = vmatmul.f32.vlgmr.msra.gmra.mxu3 %v4526_v25  ;;  %4601 = vmatmul.f32.vlgmr.msra.gmra.mxu0 %v4526_v25 }
 0xa62   : > { %v4602_v41 = vpop.f32.mrf.mxu0 }
 0xa63   : > { %v4603_v18 = vadd.f32 %v4602_v41, %v4562_v48 }
 0xa65   : > { %v4607_v44 = vrot.slane %v4603_v18, 6 }
 0xa68   : > { %v4582_v34 = vpop.f32.mrf.mxu3 }
 0xa69   : > { %v4583_v31 = vadd.f32 %v4582_v34, %v4561_v24 }
 0xa6b   : > { %v4608_v61 = vsel %vm3657_vm13, %v4583_v31, %v4607_v44 }
 0xa6c   : > { %4610 = vst [vmem:[#allocation9] sm:$0xf] %v4608_v61 }
 0xa6d PF: > { %s9401_s21 = sadd.s32 4294967295, %s6247_s13   ;;  %s4619_s28 = sshll.u32 %s9097_s9, 4  ;;  %s4620_s28 = int_to_ptr.hbm [resolvable:$true] %s4619_s28 }
 0xa6e   : > { %p5795_p0 = scmp.eq.s32.totalorder %s9401_s21, 5  ;;  %s6256_s29 = smov [#allocation9]  }
 0xa6f   : > { %s4617_s19 = sshll.u32 %s6256_s29, 4  ;;  %s4618_s19 = int_to_ptr.vmem [resolvable:$true] %s4617_s19 }
 0xa70   : > { %5781 = dma.vmem_to_hbm [thread:$0]  (%p5795_p0), %s4618_s19, 64, %s4620_s28, [#allocation6]  }
 0xa71   : > { %6226 = dma.done.wait (%p5795_p0), [#allocation6], 64  }
 0xa72   : > { %6228 = vsyncadd (%p5795_p0), [#allocation6], 4294967232 }
 0xa73 PF: > { %s22_s13 = sadd.s32 1, %s6247_s13   ;;  %s9402_s30 = smov %s6239_s11 }
 0xa74   : > { %p19_p1 = scmp.ge.s32.totalorder %s22_s13, 8   ;;  %s9403_s10 = smov %s6243_s12 }
 0xa75   : > { %s9404_s11 = smov %s9407_s15  ;;  %s9405_s12 = smov %s9411_s16 }
 0xa76   :  { %21 = sbr.rel (!%p19_p1) target bundleno = 5 (0x5), region = 112 }
 0xa7b   :  { %4633 = vsyncpa [#allocation5], 1 }
 0xa7c   :  { %4635 = vsyncpa [#allocation5 + $0x1], 1 }
 0xa7d   :  { %4636 = vsyncpa [#allocation8], 1 }
 0xa7e   :  { %4637 = vsyncpa [#allocation6], 1 }
 0xa7f   :  { %4639 = vsyncpa [#allocation6 + $0x1], 1 }

</bundles_post_ra>
